<compile_context>
chip_gen: v5e
topology: v5e:2x2
jax: 0.10.0
libtpu: 0.0.40
codegen_flags: <defaults>
</compile_context>

<pallas_src>
import functools

import jax
import jax.numpy as jnp
from jax.experimental import pallas as pl
from jax.experimental.pallas import tpu as pltpu

C = 64   # in/out channels (fixed by the module)
K = 16   # conv kernel size (fixed by the module)


def _residual_block1_kernel(xeo_ref, w1p_ref, w2p_ref, shift_ref, b2_ref,
                            out_ref, *, lo, slab_out):
    # xeo_ref : (B, 2C, Lo+7) f32  even(rows 0:64)/odd(rows 64:128) streams of
    #                              the conv1-padded input, per batch element
    # w1p_ref : (C, K*C) bf16      conv1 weights with BN scale folded,
    #                              column index = 64*t + cin
    # w2p_ref : (C, K*C) bf16      conv2 weights, column index = 64*t + cin
    # shift_ref, b2_ref : (C, 1) f32  folded BN shift / conv2 bias
    # out_ref : (1, C, B*Lo) f32 slab    (slab_out=True,  Lo not 128-aligned)
    #           (B, C, Lo)   f32 blocks  (slab_out=False, Lo 128-aligned)
    B = xeo_ref.shape[0]
    Lo = lo

    # ---- conv1 (k=16, stride=2, pad=7) with BN scale pre-folded -------------
    # out1[co,o] = sum_{t,ci} W1s[co,ci,t] * xpad[ci, 2o+t]
    #   tap t=2q   -> even stream (rows  0:64 ) at lane offset q
    #   tap t=2q+1 -> odd  stream (rows 64:128) at lane offset q
    # -> 8 accumulated (64,128)x(128,B*Lo) matmuls on VMEM-resident slices,
    #    no im2col scratch, no scratch stores.
    acc1 = None
    for q in range(K // 2):
        rhs = jnp.concatenate(
            [xeo_ref[b, :, q:q + Lo] for b in range(B)],
            axis=-1).astype(jnp.bfloat16)                        # (2C, B*Lo)
        part = jnp.dot(w1p_ref[:, q * 2 * C:(q + 1) * 2 * C], rhs,
                       preferred_element_type=jnp.float32)
        acc1 = part if acc1 is None else acc1 + part

    # ---- BatchNorm shift (scale already in weights) + ReLU ------------------
    # TODO(synk): training-mode Dropout(p=0.2) mask not implemented (eval mode).
    y16 = jnp.maximum(acc1 + shift_ref[...], 0.0).astype(jnp.bfloat16)

    # ---- conv2 (k=16, stride=1, 'same' -> pad 7 left / 8 right) -------------
    # Zero-padded activations held in registers (small: (C, Lo+15) bf16 per
    # batch element); 16 accumulated (64,64)x(64,B*Lo) matmuls over their
    # shifted slices.  Again: no scratch expansion, no scratch stores.
    zl = jnp.zeros((C, 7), jnp.bfloat16)
    zr = jnp.zeros((C, 8), jnp.bfloat16)
    ypads = [jnp.concatenate([zl, y16[:, b * Lo:(b + 1) * Lo], zr], axis=-1)
             for b in range(B)]                                   # (C, Lo+15)
    acc2 = None
    for t in range(K):
        rhs = jnp.concatenate([yp[:, t:t + Lo] for yp in ypads], axis=-1)
        part = jnp.dot(w2p_ref[:, t * C:(t + 1) * C], rhs,
                       preferred_element_type=jnp.float32)
        acc2 = part if acc2 is None else acc2 + part

    # ---- epilogue: MaxPool1d(2) residual branch (exact f32) + bias + store --
    #   x[c,2o] = xo[c,o+3], x[c,2o+1] = xe[c,o+4]
    mp = jnp.concatenate(
        [jnp.maximum(xeo_ref[b, C:, 3:3 + Lo], xeo_ref[b, :C, 4:4 + Lo])
         for b in range(B)], axis=-1)                             # (C, B*Lo)
    res = acc2 + b2_ref[...] + mp
    if slab_out:
        out_ref[0] = res                                          # lane-dense slab
    else:
        for b in range(B):                                        # Lo % 128 == 0
            out_ref[b] = res[:, b * Lo:(b + 1) * Lo]


def _pick_batch_block(n, lo, lane_target=512, lane_cap=1024):
    """Pick the batch fold B: lane-dense (>=128-lane) output slabs, >=2 grid
    steps (>=4 preferred: v7x megacore + DMA/compute overlap), tile capped so
    registers/VMEM stay comfortable on all generations (incl. v7x 64 MiB)."""
    def score(d):
        blo = d * lo
        g = n // d
        return (blo <= lane_cap,        # fits the tile cap
                blo >= 128,             # lane-dense (unmasked) output stores
                g >= 2,                 # megacore sharding possible
                g >= 4,                 # per-core double-buffering (v7x)
                min(blo, lane_target),  # amortize per-step overhead
                -blo)                   # beyond target: prefer smaller
    return max((d for d in range(1, n + 1) if n % d == 0), key=score)


def residual_block_1(x, w1, b1, gamma, beta, rmean, rvar, w2, b2,
                     eps=1e-5, batch_block=None):
    """x: (N, 64, L) float32, L even. Returns (N, 64, L//2) float32."""
    N, Cc, L = x.shape
    assert Cc == C and L % 2 == 0
    Lo = L // 2
    Lh = Lo + 7                               # length of each even/odd stream
    B = batch_block if batch_block is not None else _pick_batch_block(N, Lo)
    assert N % B == 0
    G = N // B
    BLo = B * Lo
    slab_out = (Lo % 128) != 0
    # TODO(synk): very long sequences (Lo >> 1024) would additionally want a
    #             length grid axis with halo handling; not needed at these sizes.

    # Eval-mode BatchNorm folding: scale into conv1 weights, shift kept apart.
    scale = gamma / jnp.sqrt(rvar + eps)                  # (C,)
    shift = beta + (b1 - rmean) * scale                   # (C,)
    w1s = w1 * scale[:, None, None]

    # Pad for conv1 (7 each side), de-interleave even/odd length positions and
    # stack on the channel axis (2C = 128 sublanes).  Kept f32 so the maxpool
    # branch is exact; matmul operands are cast to bf16 in-kernel.
    xp = jnp.pad(x, ((0, 0), (0, 0), (7, 7)))             # (N, C, L+14)
    xeo = jnp.concatenate([xp[:, :, 0::2], xp[:, :, 1::2]], axis=1)  # (N,2C,Lh)

    # Packed bf16 weights: column index = 64*tap + cin.
    w1p = jnp.transpose(w1s, (0, 2, 1)).reshape(C, K * C).astype(jnp.bfloat16)
    w2p = jnp.transpose(w2, (0, 2, 1)).reshape(C, K * C).astype(jnp.bfloat16)

    kernel = functools.partial(_residual_block1_kernel, lo=Lo, slab_out=slab_out)

    if slab_out:
        out_shape = jax.ShapeDtypeStruct((G, C, BLo), jnp.float32)
        out_spec = pl.BlockSpec((1, C, BLo), lambda g: (g, 0, 0))
    else:
        out_shape = jax.ShapeDtypeStruct((N, C, Lo), jnp.float32)
        out_spec = pl.BlockSpec((B, C, Lo), lambda g: (g, 0, 0))

    out = pl.pallas_call(
        kernel,
        out_shape=out_shape,
        grid=(G,),
        in_specs=[
            pl.BlockSpec((B, 2 * C, Lh), lambda g: (g, 0, 0)),   # xeo (f32)
            pl.BlockSpec((C, K * C), lambda g: (0, 0)),          # w1p (bf16)
            pl.BlockSpec((C, K * C), lambda g: (0, 0)),          # w2p (bf16)
            pl.BlockSpec((C, 1), lambda g: (0, 0)),              # BN shift
            pl.BlockSpec((C, 1), lambda g: (0, 0)),              # conv2 bias
        ],
        out_specs=out_spec,
        compiler_params=pltpu.CompilerParams(
            dimension_semantics=("parallel",),
            vmem_limit_bytes=32 * 1024 * 1024),
    )(xeo, w1p, w2p, shift[:, None], b2[:, None])

    if slab_out:
        # (G, C, B*Lo) lane-dense slab -> (N, C, Lo)
        out = out.reshape(G, C, B, Lo).transpose(0, 2, 1, 3).reshape(N, C, Lo)
    return out


def reference(x, w1, b1, gamma, beta, rmean, rvar, w2, b2, eps=1e-5,
              matmul_dtype=jnp.float32):
    """Pure-JAX reference matching the PyTorch eval-mode forward."""
    dn = jax.lax.conv_dimension_numbers(x.shape, w1.shape, ("NCH", "OIH", "NCH"))
    a = jax.lax.conv_general_dilated(
        x.astype(matmul_dtype), w1.astype(matmul_dtype), window_strides=(2,),
        padding=[(7, 7)], dimension_numbers=dn,
        preferred_element_type=jnp.float32) + b1[None, :, None]
    a = (a - rmean[None, :, None]) / jnp.sqrt(rvar[None, :, None] + eps)
    a = a * gamma[None, :, None] + beta[None, :, None]
    a = jnp.maximum(a, 0.0)
    a = jax.lax.conv_general_dilated(
        a.astype(matmul_dtype), w2.astype(matmul_dtype), window_strides=(1,),
        padding=[(7, 8)], dimension_numbers=dn,
        preferred_element_type=jnp.float32) + b2[None, :, None]
    N_, C_, L_ = x.shape
    mp = jnp.max(x[:, :, :(L_ // 2) * 2].reshape(N_, C_, L_ // 2, 2), axis=-1)
    return a + mp


def reference_kernel_numerics(x, w1, b1, gamma, beta, rmean, rvar, w2, b2,
                              eps=1e-5):
    """Reference mirroring the kernel's numerics exactly: BN scale folded into
    the conv1 weights BEFORE the bf16 cast, bf16 matmul inputs, f32 accum."""
    scale = gamma / jnp.sqrt(rvar + eps)
    shift = beta + (b1 - rmean) * scale
    w1s = w1 * scale[:, None, None]
    dn = jax.lax.conv_dimension_numbers(x.shape, w1s.shape, ("NCH", "OIH", "NCH"))
    a = jax.lax.conv_general_dilated(
        x.astype(jnp.bfloat16), w1s.astype(jnp.bfloat16), window_strides=(2,),
        padding=[(7, 7)], dimension_numbers=dn,
        preferred_element_type=jnp.float32) + shift[None, :, None]
    a = jnp.maximum(a, 0.0)
    a = jax.lax.conv_general_dilated(
        a.astype(jnp.bfloat16), w2.astype(jnp.bfloat16), window_strides=(1,),
        padding=[(7, 8)], dimension_numbers=dn,
        preferred_element_type=jnp.float32) + b2[None, :, None]
    N_, C_, L_ = x.shape
    mp = jnp.max(x[:, :, :(L_ // 2) * 2].reshape(N_, C_, L_ // 2, 2), axis=-1)
    return a + mp


if __name__ == "__main__":
    key = jax.random.PRNGKey(0)
    ks = jax.random.split(key, 9)

    # Deterministic synthetic parameters (shapes from the module __init__).
    w1 = 0.05 * jax.random.normal(ks[1], (C, C, K), jnp.float32)
    b1 = 0.01 * jax.random.normal(ks[2], (C,), jnp.float32)
    gamma = 1.0 + 0.1 * jax.random.normal(ks[3], (C,), jnp.float32)
    beta = 0.05 * jax.random.normal(ks[4], (C,), jnp.float32)
    rmean = 0.1 * jax.random.normal(ks[5], (C,), jnp.float32)
    rvar = 0.5 + 0.5 * jax.random.uniform(ks[6], (C,), jnp.float32)
    w2 = 0.05 * jax.random.normal(ks[7], (C, C, K), jnp.float32)
    b2 = 0.01 * jax.random.normal(ks[8], (C,), jnp.float32)

    # Exercise both output layouts: lane-dense slab (Lo < 128) and direct
    # (B, C, Lo) blocks (Lo a multiple of 128, no wrapper relayout).
    for (N, L) in [(4, 128), (2, 256)]:
        x = jax.random.normal(jax.random.fold_in(ks[0], L), (N, C, L),
                              jnp.float32)

        out = residual_block_1(x, w1, b1, gamma, beta, rmean, rvar, w2, b2)
        out = jax.block_until_ready(out)
        assert out.shape == (N, C, L // 2), out.shape

        # Tight check vs a reference with the kernel's bf16/f32 numerics
        # (validates indexing, stride-2 even/odd mapping, 'same' pad, fusion).
        ref_b = reference_kernel_numerics(x, w1, b1, gamma, beta, rmean, rvar,
                                          w2, b2)
        err_b = float(jnp.max(jnp.abs(out - ref_b)))
        if err_b > 5e-3:
            raise AssertionError(
                f"(N={N}, L={L}) mismatch vs bf16-matmul reference, "
                f"max abs err = {err_b}")

        # Looser sanity check vs the exact f32 module forward (bf16 MXU inputs
        # introduce a small, bounded approximation).
        ref_f = reference(x, w1, b1, gamma, beta, rmean, rvar, w2, b2,
                          matmul_dtype=jnp.float32)
        err_f = float(jnp.max(jnp.abs(out - ref_f)))
        if err_f > 5e-2:
            raise AssertionError(
                f"(N={N}, L={L}) mismatch vs f32 reference, "
                f"max abs err = {err_f}")

    print("KERNEL_OK")
</pallas_src>

<mosaic_0001>
module attributes {stable_mosaic.version = 11 : i64} {
  func.func @_residual_block1_kernel(%arg0: i32, %arg1: memref<2x128x71xf32, #tpu.memory_space<vmem>>, %arg2: memref<64x1024xbf16, #tpu.memory_space<vmem>>, %arg3: memref<64x1024xbf16, #tpu.memory_space<vmem>>, %arg4: memref<64x1xf32, #tpu.memory_space<vmem>>, %arg5: memref<64x1xf32, #tpu.memory_space<vmem>>, %arg6: memref<1x64x128xf32, #tpu.memory_space<vmem>>) attributes {dimension_semantics = [#tpu.dimension_semantics<parallel>], iteration_bounds = array<i64: 2>, scalar_prefetch = 0 : i64, scratch_operands = 0 : i64, tpu.core_type = #tpu.core_type<tc>, window_params = [{transform_indices = @transform_0, window_bounds = array<i64: 2, 128, 71>}, {pipeline_mode = #tpu.pipeline_mode<synchronous>, transform_indices = @transform_1, window_bounds = array<i64: 64, 1024>}, {pipeline_mode = #tpu.pipeline_mode<synchronous>, transform_indices = @transform_2, window_bounds = array<i64: 64, 1024>}, {pipeline_mode = #tpu.pipeline_mode<synchronous>, transform_indices = @transform_3, window_bounds = array<i64: 64, 1>}, {pipeline_mode = #tpu.pipeline_mode<synchronous>, transform_indices = @transform_4, window_bounds = array<i64: 64, 1>}, {transform_indices = @transform_5, window_bounds = array<i64: 1, 64, 128>}]} {
    %c0 = arith.constant 0 : index
    %c0_0 = arith.constant 0 : index
    %c0_1 = arith.constant 0 : index
    %0 = vector.load %arg1[%c0, %c0_0, %c0_1] : memref<2x128x71xf32, #tpu.memory_space<vmem>>, vector<1x128x64xf32>
    %1 = vector.shape_cast %0 : vector<1x128x64xf32> to vector<128x64xf32>
    %c1 = arith.constant 1 : index
    %c0_2 = arith.constant 0 : index
    %c0_3 = arith.constant 0 : index
    %2 = vector.load %arg1[%c1, %c0_2, %c0_3] : memref<2x128x71xf32, #tpu.memory_space<vmem>>, vector<1x128x64xf32>
    %3 = vector.shape_cast %2 : vector<1x128x64xf32> to vector<128x64xf32>
    %4 = tpu.concatenate %1, %3 in 1 : vector<128x64xf32>, vector<128x64xf32> -> vector<128x128xf32>
    %5 = arith.truncf %4 : vector<128x128xf32> to vector<128x128xbf16>
    %c0_4 = arith.constant 0 : index
    %c0_5 = arith.constant 0 : index
    %6 = vector.load %arg2[%c0_4, %c0_5] : memref<64x1024xbf16, #tpu.memory_space<vmem>>, vector<64x128xbf16>
    %cst = arith.constant dense<0.000000e+00> : vector<64x128xf32>
    %7 = tpu.matmul %6, %5, %cst {dimension_numbers = #tpu.dot_dimension_numbers<[1], [0], [0], [1], [0, 0, 1, 1], [], []>} : vector<64x128xbf16>, vector<128x128xbf16>, vector<64x128xf32> -> vector<64x128xf32>
    %c0_6 = arith.constant 0 : index
    %c0_7 = arith.constant 0 : index
    %c1_8 = arith.constant 1 : index
    %8 = vector.load %arg1[%c0_6, %c0_7, %c1_8] : memref<2x128x71xf32, #tpu.memory_space<vmem>>, vector<1x128x64xf32>
    %9 = vector.shape_cast %8 : vector<1x128x64xf32> to vector<128x64xf32>
    %c1_9 = arith.constant 1 : index
    %c0_10 = arith.constant 0 : index
    %c1_11 = arith.constant 1 : index
    %10 = vector.load %arg1[%c1_9, %c0_10, %c1_11] : memref<2x128x71xf32, #tpu.memory_space<vmem>>, vector<1x128x64xf32>
    %11 = vector.shape_cast %10 : vector<1x128x64xf32> to vector<128x64xf32>
    %12 = tpu.concatenate %9, %11 in 1 : vector<128x64xf32>, vector<128x64xf32> -> vector<128x128xf32>
    %13 = arith.truncf %12 : vector<128x128xf32> to vector<128x128xbf16>
    %c0_12 = arith.constant 0 : index
    %c128 = arith.constant 128 : index
    %14 = vector.load %arg2[%c0_12, %c128] : memref<64x1024xbf16, #tpu.memory_space<vmem>>, vector<64x128xbf16>
    %cst_13 = arith.constant dense<0.000000e+00> : vector<64x128xf32>
    %15 = tpu.matmul %14, %13, %cst_13 {dimension_numbers = #tpu.dot_dimension_numbers<[1], [0], [0], [1], [0, 0, 1, 1], [], []>} : vector<64x128xbf16>, vector<128x128xbf16>, vector<64x128xf32> -> vector<64x128xf32>
    %16 = arith.addf %7, %15 : vector<64x128xf32>
    %c0_14 = arith.constant 0 : index
    %c0_15 = arith.constant 0 : index
    %c2 = arith.constant 2 : index
    %17 = vector.load %arg1[%c0_14, %c0_15, %c2] : memref<2x128x71xf32, #tpu.memory_space<vmem>>, vector<1x128x64xf32>
    %18 = vector.shape_cast %17 : vector<1x128x64xf32> to vector<128x64xf32>
    %c1_16 = arith.constant 1 : index
    %c0_17 = arith.constant 0 : index
    %c2_18 = arith.constant 2 : index
    %19 = vector.load %arg1[%c1_16, %c0_17, %c2_18] : memref<2x128x71xf32, #tpu.memory_space<vmem>>, vector<1x128x64xf32>
    %20 = vector.shape_cast %19 : vector<1x128x64xf32> to vector<128x64xf32>
    %21 = tpu.concatenate %18, %20 in 1 : vector<128x64xf32>, vector<128x64xf32> -> vector<128x128xf32>
    %22 = arith.truncf %21 : vector<128x128xf32> to vector<128x128xbf16>
    %c0_19 = arith.constant 0 : index
    %c256 = arith.constant 256 : index
    %23 = vector.load %arg2[%c0_19, %c256] : memref<64x1024xbf16, #tpu.memory_space<vmem>>, vector<64x128xbf16>
    %cst_20 = arith.constant dense<0.000000e+00> : vector<64x128xf32>
    %24 = tpu.matmul %23, %22, %cst_20 {dimension_numbers = #tpu.dot_dimension_numbers<[1], [0], [0], [1], [0, 0, 1, 1], [], []>} : vector<64x128xbf16>, vector<128x128xbf16>, vector<64x128xf32> -> vector<64x128xf32>
    %25 = arith.addf %16, %24 : vector<64x128xf32>
    %c0_21 = arith.constant 0 : index
    %c0_22 = arith.constant 0 : index
    %c3 = arith.constant 3 : index
    %26 = vector.load %arg1[%c0_21, %c0_22, %c3] : memref<2x128x71xf32, #tpu.memory_space<vmem>>, vector<1x128x64xf32>
    %27 = vector.shape_cast %26 : vector<1x128x64xf32> to vector<128x64xf32>
    %c1_23 = arith.constant 1 : index
    %c0_24 = arith.constant 0 : index
    %c3_25 = arith.constant 3 : index
    %28 = vector.load %arg1[%c1_23, %c0_24, %c3_25] : memref<2x128x71xf32, #tpu.memory_space<vmem>>, vector<1x128x64xf32>
    %29 = vector.shape_cast %28 : vector<1x128x64xf32> to vector<128x64xf32>
    %30 = tpu.concatenate %27, %29 in 1 : vector<128x64xf32>, vector<128x64xf32> -> vector<128x128xf32>
    %31 = arith.truncf %30 : vector<128x128xf32> to vector<128x128xbf16>
    %c0_26 = arith.constant 0 : index
    %c384 = arith.constant 384 : index
    %32 = vector.load %arg2[%c0_26, %c384] : memref<64x1024xbf16, #tpu.memory_space<vmem>>, vector<64x128xbf16>
    %cst_27 = arith.constant dense<0.000000e+00> : vector<64x128xf32>
    %33 = tpu.matmul %32, %31, %cst_27 {dimension_numbers = #tpu.dot_dimension_numbers<[1], [0], [0], [1], [0, 0, 1, 1], [], []>} : vector<64x128xbf16>, vector<128x128xbf16>, vector<64x128xf32> -> vector<64x128xf32>
    %34 = arith.addf %25, %33 : vector<64x128xf32>
    %c0_28 = arith.constant 0 : index
    %c0_29 = arith.constant 0 : index
    %c4 = arith.constant 4 : index
    %35 = vector.load %arg1[%c0_28, %c0_29, %c4] : memref<2x128x71xf32, #tpu.memory_space<vmem>>, vector<1x128x64xf32>
    %36 = vector.shape_cast %35 : vector<1x128x64xf32> to vector<128x64xf32>
    %c1_30 = arith.constant 1 : index
    %c0_31 = arith.constant 0 : index
    %c4_32 = arith.constant 4 : index
    %37 = vector.load %arg1[%c1_30, %c0_31, %c4_32] : memref<2x128x71xf32, #tpu.memory_space<vmem>>, vector<1x128x64xf32>
    %38 = vector.shape_cast %37 : vector<1x128x64xf32> to vector<128x64xf32>
    %39 = tpu.concatenate %36, %38 in 1 : vector<128x64xf32>, vector<128x64xf32> -> vector<128x128xf32>
    %40 = arith.truncf %39 : vector<128x128xf32> to vector<128x128xbf16>
    %c0_33 = arith.constant 0 : index
    %c512 = arith.constant 512 : index
    %41 = vector.load %arg2[%c0_33, %c512] : memref<64x1024xbf16, #tpu.memory_space<vmem>>, vector<64x128xbf16>
    %cst_34 = arith.constant dense<0.000000e+00> : vector<64x128xf32>
    %42 = tpu.matmul %41, %40, %cst_34 {dimension_numbers = #tpu.dot_dimension_numbers<[1], [0], [0], [1], [0, 0, 1, 1], [], []>} : vector<64x128xbf16>, vector<128x128xbf16>, vector<64x128xf32> -> vector<64x128xf32>
    %43 = arith.addf %34, %42 : vector<64x128xf32>
    %c0_35 = arith.constant 0 : index
    %c0_36 = arith.constant 0 : index
    %c5 = arith.constant 5 : index
    %44 = vector.load %arg1[%c0_35, %c0_36, %c5] : memref<2x128x71xf32, #tpu.memory_space<vmem>>, vector<1x128x64xf32>
    %45 = vector.shape_cast %44 : vector<1x128x64xf32> to vector<128x64xf32>
    %c1_37 = arith.constant 1 : index
    %c0_38 = arith.constant 0 : index
    %c5_39 = arith.constant 5 : index
    %46 = vector.load %arg1[%c1_37, %c0_38, %c5_39] : memref<2x128x71xf32, #tpu.memory_space<vmem>>, vector<1x128x64xf32>
    %47 = vector.shape_cast %46 : vector<1x128x64xf32> to vector<128x64xf32>
    %48 = tpu.concatenate %45, %47 in 1 : vector<128x64xf32>, vector<128x64xf32> -> vector<128x128xf32>
    %49 = arith.truncf %48 : vector<128x128xf32> to vector<128x128xbf16>
    %c0_40 = arith.constant 0 : index
    %c640 = arith.constant 640 : index
    %50 = vector.load %arg2[%c0_40, %c640] : memref<64x1024xbf16, #tpu.memory_space<vmem>>, vector<64x128xbf16>
    %cst_41 = arith.constant dense<0.000000e+00> : vector<64x128xf32>
    %51 = tpu.matmul %50, %49, %cst_41 {dimension_numbers = #tpu.dot_dimension_numbers<[1], [0], [0], [1], [0, 0, 1, 1], [], []>} : vector<64x128xbf16>, vector<128x128xbf16>, vector<64x128xf32> -> vector<64x128xf32>
    %52 = arith.addf %43, %51 : vector<64x128xf32>
    %c0_42 = arith.constant 0 : index
    %c0_43 = arith.constant 0 : index
    %c6 = arith.constant 6 : index
    %53 = vector.load %arg1[%c0_42, %c0_43, %c6] : memref<2x128x71xf32, #tpu.memory_space<vmem>>, vector<1x128x64xf32>
    %54 = vector.shape_cast %53 : vector<1x128x64xf32> to vector<128x64xf32>
    %c1_44 = arith.constant 1 : index
    %c0_45 = arith.constant 0 : index
    %c6_46 = arith.constant 6 : index
    %55 = vector.load %arg1[%c1_44, %c0_45, %c6_46] : memref<2x128x71xf32, #tpu.memory_space<vmem>>, vector<1x128x64xf32>
    %56 = vector.shape_cast %55 : vector<1x128x64xf32> to vector<128x64xf32>
    %57 = tpu.concatenate %54, %56 in 1 : vector<128x64xf32>, vector<128x64xf32> -> vector<128x128xf32>
    %58 = arith.truncf %57 : vector<128x128xf32> to vector<128x128xbf16>
    %c0_47 = arith.constant 0 : index
    %c768 = arith.constant 768 : index
    %59 = vector.load %arg2[%c0_47, %c768] : memref<64x1024xbf16, #tpu.memory_space<vmem>>, vector<64x128xbf16>
    %cst_48 = arith.constant dense<0.000000e+00> : vector<64x128xf32>
    %60 = tpu.matmul %59, %58, %cst_48 {dimension_numbers = #tpu.dot_dimension_numbers<[1], [0], [0], [1], [0, 0, 1, 1], [], []>} : vector<64x128xbf16>, vector<128x128xbf16>, vector<64x128xf32> -> vector<64x128xf32>
    %61 = arith.addf %52, %60 : vector<64x128xf32>
    %c0_49 = arith.constant 0 : index
    %c0_50 = arith.constant 0 : index
    %c7 = arith.constant 7 : index
    %62 = vector.load %arg1[%c0_49, %c0_50, %c7] : memref<2x128x71xf32, #tpu.memory_space<vmem>>, vector<1x128x64xf32>
    %63 = vector.shape_cast %62 : vector<1x128x64xf32> to vector<128x64xf32>
    %c1_51 = arith.constant 1 : index
    %c0_52 = arith.constant 0 : index
    %c7_53 = arith.constant 7 : index
    %64 = vector.load %arg1[%c1_51, %c0_52, %c7_53] : memref<2x128x71xf32, #tpu.memory_space<vmem>>, vector<1x128x64xf32>
    %65 = vector.shape_cast %64 : vector<1x128x64xf32> to vector<128x64xf32>
    %66 = tpu.concatenate %63, %65 in 1 : vector<128x64xf32>, vector<128x64xf32> -> vector<128x128xf32>
    %67 = arith.truncf %66 : vector<128x128xf32> to vector<128x128xbf16>
    %c0_54 = arith.constant 0 : index
    %c896 = arith.constant 896 : index
    %68 = vector.load %arg2[%c0_54, %c896] : memref<64x1024xbf16, #tpu.memory_space<vmem>>, vector<64x128xbf16>
    %cst_55 = arith.constant dense<0.000000e+00> : vector<64x128xf32>
    %69 = tpu.matmul %68, %67, %cst_55 {dimension_numbers = #tpu.dot_dimension_numbers<[1], [0], [0], [1], [0, 0, 1, 1], [], []>} : vector<64x128xbf16>, vector<128x128xbf16>, vector<64x128xf32> -> vector<64x128xf32>
    %70 = arith.addf %61, %69 : vector<64x128xf32>
    %c0_56 = arith.constant 0 : index
    %c0_57 = arith.constant 0 : index
    %71 = vector.load %arg4[%c0_56, %c0_57] : memref<64x1xf32, #tpu.memory_space<vmem>>, vector<64x1xf32>
    %72 = vector.broadcast %71 : vector<64x1xf32> to vector<64x128xf32>
    %73 = arith.addf %70, %72 : vector<64x128xf32>
    %cst_58 = arith.constant 0.000000e+00 : f32
    %74 = vector.broadcast %cst_58 : f32 to vector<64x128xf32>
    %75 = arith.maximumf %73, %74 : vector<64x128xf32>
    %76 = arith.truncf %75 : vector<64x128xf32> to vector<64x128xbf16>
    %cst_59 = arith.constant 0.000000e+00 : bf16
    %77 = vector.broadcast %cst_59 : bf16 to vector<64x7xbf16>
    %cst_60 = arith.constant 0.000000e+00 : bf16
    %78 = vector.broadcast %cst_60 : bf16 to vector<64x8xbf16>
    %79 = vector.extract_strided_slice %76 {offsets = [0, 0], sizes = [64, 64], strides = [1, 1]} : vector<64x128xbf16> to vector<64x64xbf16>
    %80 = tpu.concatenate %77, %79, %78 in 1 : vector<64x7xbf16>, vector<64x64xbf16>, vector<64x8xbf16> -> vector<64x79xbf16>
    %81 = vector.extract_strided_slice %76 {offsets = [0, 64], sizes = [64, 64], strides = [1, 1]} : vector<64x128xbf16> to vector<64x64xbf16>
    %82 = tpu.concatenate %77, %81, %78 in 1 : vector<64x7xbf16>, vector<64x64xbf16>, vector<64x8xbf16> -> vector<64x79xbf16>
    %83 = vector.extract_strided_slice %80 {offsets = [0, 0], sizes = [64, 64], strides = [1, 1]} : vector<64x79xbf16> to vector<64x64xbf16>
    %84 = vector.extract_strided_slice %82 {offsets = [0, 0], sizes = [64, 64], strides = [1, 1]} : vector<64x79xbf16> to vector<64x64xbf16>
    %85 = tpu.concatenate %83, %84 in 1 : vector<64x64xbf16>, vector<64x64xbf16> -> vector<64x128xbf16>
    %c0_61 = arith.constant 0 : index
    %c0_62 = arith.constant 0 : index
    %86 = vector.load %arg3[%c0_61, %c0_62] : memref<64x1024xbf16, #tpu.memory_space<vmem>>, vector<64x64xbf16>
    %cst_63 = arith.constant dense<0.000000e+00> : vector<64x128xf32>
    %87 = tpu.matmul %86, %85, %cst_63 {dimension_numbers = #tpu.dot_dimension_numbers<[1], [0], [0], [1], [0, 0, 1, 1], [], []>} : vector<64x64xbf16>, vector<64x128xbf16>, vector<64x128xf32> -> vector<64x128xf32>
    %88 = vector.extract_strided_slice %80 {offsets = [0, 1], sizes = [64, 64], strides = [1, 1]} : vector<64x79xbf16> to vector<64x64xbf16>
    %89 = vector.extract_strided_slice %82 {offsets = [0, 1], sizes = [64, 64], strides = [1, 1]} : vector<64x79xbf16> to vector<64x64xbf16>
    %90 = tpu.concatenate %88, %89 in 1 : vector<64x64xbf16>, vector<64x64xbf16> -> vector<64x128xbf16>
    %c0_64 = arith.constant 0 : index
    %c64 = arith.constant 64 : index
    %91 = vector.load %arg3[%c0_64, %c64] : memref<64x1024xbf16, #tpu.memory_space<vmem>>, vector<64x64xbf16>
    %cst_65 = arith.constant dense<0.000000e+00> : vector<64x128xf32>
    %92 = tpu.matmul %91, %90, %cst_65 {dimension_numbers = #tpu.dot_dimension_numbers<[1], [0], [0], [1], [0, 0, 1, 1], [], []>} : vector<64x64xbf16>, vector<64x128xbf16>, vector<64x128xf32> -> vector<64x128xf32>
    %93 = arith.addf %87, %92 : vector<64x128xf32>
    %94 = vector.extract_strided_slice %80 {offsets = [0, 2], sizes = [64, 64], strides = [1, 1]} : vector<64x79xbf16> to vector<64x64xbf16>
    %95 = vector.extract_strided_slice %82 {offsets = [0, 2], sizes = [64, 64], strides = [1, 1]} : vector<64x79xbf16> to vector<64x64xbf16>
    %96 = tpu.concatenate %94, %95 in 1 : vector<64x64xbf16>, vector<64x64xbf16> -> vector<64x128xbf16>
    %c0_66 = arith.constant 0 : index
    %c128_67 = arith.constant 128 : index
    %97 = vector.load %arg3[%c0_66, %c128_67] : memref<64x1024xbf16, #tpu.memory_space<vmem>>, vector<64x64xbf16>
    %cst_68 = arith.constant dense<0.000000e+00> : vector<64x128xf32>
    %98 = tpu.matmul %97, %96, %cst_68 {dimension_numbers = #tpu.dot_dimension_numbers<[1], [0], [0], [1], [0, 0, 1, 1], [], []>} : vector<64x64xbf16>, vector<64x128xbf16>, vector<64x128xf32> -> vector<64x128xf32>
    %99 = arith.addf %93, %98 : vector<64x128xf32>
    %100 = vector.extract_strided_slice %80 {offsets = [0, 3], sizes = [64, 64], strides = [1, 1]} : vector<64x79xbf16> to vector<64x64xbf16>
    %101 = vector.extract_strided_slice %82 {offsets = [0, 3], sizes = [64, 64], strides = [1, 1]} : vector<64x79xbf16> to vector<64x64xbf16>
    %102 = tpu.concatenate %100, %101 in 1 : vector<64x64xbf16>, vector<64x64xbf16> -> vector<64x128xbf16>
    %c0_69 = arith.constant 0 : index
    %c192 = arith.constant 192 : index
    %103 = vector.load %arg3[%c0_69, %c192] : memref<64x1024xbf16, #tpu.memory_space<vmem>>, vector<64x64xbf16>
    %cst_70 = arith.constant dense<0.000000e+00> : vector<64x128xf32>
    %104 = tpu.matmul %103, %102, %cst_70 {dimension_numbers = #tpu.dot_dimension_numbers<[1], [0], [0], [1], [0, 0, 1, 1], [], []>} : vector<64x64xbf16>, vector<64x128xbf16>, vector<64x128xf32> -> vector<64x128xf32>
    %105 = arith.addf %99, %104 : vector<64x128xf32>
    %106 = vector.extract_strided_slice %80 {offsets = [0, 4], sizes = [64, 64], strides = [1, 1]} : vector<64x79xbf16> to vector<64x64xbf16>
    %107 = vector.extract_strided_slice %82 {offsets = [0, 4], sizes = [64, 64], strides = [1, 1]} : vector<64x79xbf16> to vector<64x64xbf16>
    %108 = tpu.concatenate %106, %107 in 1 : vector<64x64xbf16>, vector<64x64xbf16> -> vector<64x128xbf16>
    %c0_71 = arith.constant 0 : index
    %c256_72 = arith.constant 256 : index
    %109 = vector.load %arg3[%c0_71, %c256_72] : memref<64x1024xbf16, #tpu.memory_space<vmem>>, vector<64x64xbf16>
    %cst_73 = arith.constant dense<0.000000e+00> : vector<64x128xf32>
    %110 = tpu.matmul %109, %108, %cst_73 {dimension_numbers = #tpu.dot_dimension_numbers<[1], [0], [0], [1], [0, 0, 1, 1], [], []>} : vector<64x64xbf16>, vector<64x128xbf16>, vector<64x128xf32> -> vector<64x128xf32>
    %111 = arith.addf %105, %110 : vector<64x128xf32>
    %112 = vector.extract_strided_slice %80 {offsets = [0, 5], sizes = [64, 64], strides = [1, 1]} : vector<64x79xbf16> to vector<64x64xbf16>
    %113 = vector.extract_strided_slice %82 {offsets = [0, 5], sizes = [64, 64], strides = [1, 1]} : vector<64x79xbf16> to vector<64x64xbf16>
    %114 = tpu.concatenate %112, %113 in 1 : vector<64x64xbf16>, vector<64x64xbf16> -> vector<64x128xbf16>
    %c0_74 = arith.constant 0 : index
    %c320 = arith.constant 320 : index
    %115 = vector.load %arg3[%c0_74, %c320] : memref<64x1024xbf16, #tpu.memory_space<vmem>>, vector<64x64xbf16>
    %cst_75 = arith.constant dense<0.000000e+00> : vector<64x128xf32>
    %116 = tpu.matmul %115, %114, %cst_75 {dimension_numbers = #tpu.dot_dimension_numbers<[1], [0], [0], [1], [0, 0, 1, 1], [], []>} : vector<64x64xbf16>, vector<64x128xbf16>, vector<64x128xf32> -> vector<64x128xf32>
    %117 = arith.addf %111, %116 : vector<64x128xf32>
    %118 = vector.extract_strided_slice %80 {offsets = [0, 6], sizes = [64, 64], strides = [1, 1]} : vector<64x79xbf16> to vector<64x64xbf16>
    %119 = vector.extract_strided_slice %82 {offsets = [0, 6], sizes = [64, 64], strides = [1, 1]} : vector<64x79xbf16> to vector<64x64xbf16>
    %120 = tpu.concatenate %118, %119 in 1 : vector<64x64xbf16>, vector<64x64xbf16> -> vector<64x128xbf16>
    %c0_76 = arith.constant 0 : index
    %c384_77 = arith.constant 384 : index
    %121 = vector.load %arg3[%c0_76, %c384_77] : memref<64x1024xbf16, #tpu.memory_space<vmem>>, vector<64x64xbf16>
    %cst_78 = arith.constant dense<0.000000e+00> : vector<64x128xf32>
    %122 = tpu.matmul %121, %120, %cst_78 {dimension_numbers = #tpu.dot_dimension_numbers<[1], [0], [0], [1], [0, 0, 1, 1], [], []>} : vector<64x64xbf16>, vector<64x128xbf16>, vector<64x128xf32> -> vector<64x128xf32>
    %123 = arith.addf %117, %122 : vector<64x128xf32>
    %124 = vector.extract_strided_slice %80 {offsets = [0, 7], sizes = [64, 64], strides = [1, 1]} : vector<64x79xbf16> to vector<64x64xbf16>
    %125 = vector.extract_strided_slice %82 {offsets = [0, 7], sizes = [64, 64], strides = [1, 1]} : vector<64x79xbf16> to vector<64x64xbf16>
    %126 = tpu.concatenate %124, %125 in 1 : vector<64x64xbf16>, vector<64x64xbf16> -> vector<64x128xbf16>
    %c0_79 = arith.constant 0 : index
    %c448 = arith.constant 448 : index
    %127 = vector.load %arg3[%c0_79, %c448] : memref<64x1024xbf16, #tpu.memory_space<vmem>>, vector<64x64xbf16>
    %cst_80 = arith.constant dense<0.000000e+00> : vector<64x128xf32>
    %128 = tpu.matmul %127, %126, %cst_80 {dimension_numbers = #tpu.dot_dimension_numbers<[1], [0], [0], [1], [0, 0, 1, 1], [], []>} : vector<64x64xbf16>, vector<64x128xbf16>, vector<64x128xf32> -> vector<64x128xf32>
    %129 = arith.addf %123, %128 : vector<64x128xf32>
    %130 = vector.extract_strided_slice %80 {offsets = [0, 8], sizes = [64, 64], strides = [1, 1]} : vector<64x79xbf16> to vector<64x64xbf16>
    %131 = vector.extract_strided_slice %82 {offsets = [0, 8], sizes = [64, 64], strides = [1, 1]} : vector<64x79xbf16> to vector<64x64xbf16>
    %132 = tpu.concatenate %130, %131 in 1 : vector<64x64xbf16>, vector<64x64xbf16> -> vector<64x128xbf16>
    %c0_81 = arith.constant 0 : index
    %c512_82 = arith.constant 512 : index
    %133 = vector.load %arg3[%c0_81, %c512_82] : memref<64x1024xbf16, #tpu.memory_space<vmem>>, vector<64x64xbf16>
    %cst_83 = arith.constant dense<0.000000e+00> : vector<64x128xf32>
    %134 = tpu.matmul %133, %132, %cst_83 {dimension_numbers = #tpu.dot_dimension_numbers<[1], [0], [0], [1], [0, 0, 1, 1], [], []>} : vector<64x64xbf16>, vector<64x128xbf16>, vector<64x128xf32> -> vector<64x128xf32>
    %135 = arith.addf %129, %134 : vector<64x128xf32>
    %136 = vector.extract_strided_slice %80 {offsets = [0, 9], sizes = [64, 64], strides = [1, 1]} : vector<64x79xbf16> to vector<64x64xbf16>
    %137 = vector.extract_strided_slice %82 {offsets = [0, 9], sizes = [64, 64], strides = [1, 1]} : vector<64x79xbf16> to vector<64x64xbf16>
    %138 = tpu.concatenate %136, %137 in 1 : vector<64x64xbf16>, vector<64x64xbf16> -> vector<64x128xbf16>
    %c0_84 = arith.constant 0 : index
    %c576 = arith.constant 576 : index
    %139 = vector.load %arg3[%c0_84, %c576] : memref<64x1024xbf16, #tpu.memory_space<vmem>>, vector<64x64xbf16>
    %cst_85 = arith.constant dense<0.000000e+00> : vector<64x128xf32>
    %140 = tpu.matmul %139, %138, %cst_85 {dimension_numbers = #tpu.dot_dimension_numbers<[1], [0], [0], [1], [0, 0, 1, 1], [], []>} : vector<64x64xbf16>, vector<64x128xbf16>, vector<64x128xf32> -> vector<64x128xf32>
    %141 = arith.addf %135, %140 : vector<64x128xf32>
    %142 = vector.extract_strided_slice %80 {offsets = [0, 10], sizes = [64, 64], strides = [1, 1]} : vector<64x79xbf16> to vector<64x64xbf16>
    %143 = vector.extract_strided_slice %82 {offsets = [0, 10], sizes = [64, 64], strides = [1, 1]} : vector<64x79xbf16> to vector<64x64xbf16>
    %144 = tpu.concatenate %142, %143 in 1 : vector<64x64xbf16>, vector<64x64xbf16> -> vector<64x128xbf16>
    %c0_86 = arith.constant 0 : index
    %c640_87 = arith.constant 640 : index
    %145 = vector.load %arg3[%c0_86, %c640_87] : memref<64x1024xbf16, #tpu.memory_space<vmem>>, vector<64x64xbf16>
    %cst_88 = arith.constant dense<0.000000e+00> : vector<64x128xf32>
    %146 = tpu.matmul %145, %144, %cst_88 {dimension_numbers = #tpu.dot_dimension_numbers<[1], [0], [0], [1], [0, 0, 1, 1], [], []>} : vector<64x64xbf16>, vector<64x128xbf16>, vector<64x128xf32> -> vector<64x128xf32>
    %147 = arith.addf %141, %146 : vector<64x128xf32>
    %148 = vector.extract_strided_slice %80 {offsets = [0, 11], sizes = [64, 64], strides = [1, 1]} : vector<64x79xbf16> to vector<64x64xbf16>
    %149 = vector.extract_strided_slice %82 {offsets = [0, 11], sizes = [64, 64], strides = [1, 1]} : vector<64x79xbf16> to vector<64x64xbf16>
    %150 = tpu.concatenate %148, %149 in 1 : vector<64x64xbf16>, vector<64x64xbf16> -> vector<64x128xbf16>
    %c0_89 = arith.constant 0 : index
    %c704 = arith.constant 704 : index
    %151 = vector.load %arg3[%c0_89, %c704] : memref<64x1024xbf16, #tpu.memory_space<vmem>>, vector<64x64xbf16>
    %cst_90 = arith.constant dense<0.000000e+00> : vector<64x128xf32>
    %152 = tpu.matmul %151, %150, %cst_90 {dimension_numbers = #tpu.dot_dimension_numbers<[1], [0], [0], [1], [0, 0, 1, 1], [], []>} : vector<64x64xbf16>, vector<64x128xbf16>, vector<64x128xf32> -> vector<64x128xf32>
    %153 = arith.addf %147, %152 : vector<64x128xf32>
    %154 = vector.extract_strided_slice %80 {offsets = [0, 12], sizes = [64, 64], strides = [1, 1]} : vector<64x79xbf16> to vector<64x64xbf16>
    %155 = vector.extract_strided_slice %82 {offsets = [0, 12], sizes = [64, 64], strides = [1, 1]} : vector<64x79xbf16> to vector<64x64xbf16>
    %156 = tpu.concatenate %154, %155 in 1 : vector<64x64xbf16>, vector<64x64xbf16> -> vector<64x128xbf16>
    %c0_91 = arith.constant 0 : index
    %c768_92 = arith.constant 768 : index
    %157 = vector.load %arg3[%c0_91, %c768_92] : memref<64x1024xbf16, #tpu.memory_space<vmem>>, vector<64x64xbf16>
    %cst_93 = arith.constant dense<0.000000e+00> : vector<64x128xf32>
    %158 = tpu.matmul %157, %156, %cst_93 {dimension_numbers = #tpu.dot_dimension_numbers<[1], [0], [0], [1], [0, 0, 1, 1], [], []>} : vector<64x64xbf16>, vector<64x128xbf16>, vector<64x128xf32> -> vector<64x128xf32>
    %159 = arith.addf %153, %158 : vector<64x128xf32>
    %160 = vector.extract_strided_slice %80 {offsets = [0, 13], sizes = [64, 64], strides = [1, 1]} : vector<64x79xbf16> to vector<64x64xbf16>
    %161 = vector.extract_strided_slice %82 {offsets = [0, 13], sizes = [64, 64], strides = [1, 1]} : vector<64x79xbf16> to vector<64x64xbf16>
    %162 = tpu.concatenate %160, %161 in 1 : vector<64x64xbf16>, vector<64x64xbf16> -> vector<64x128xbf16>
    %c0_94 = arith.constant 0 : index
    %c832 = arith.constant 832 : index
    %163 = vector.load %arg3[%c0_94, %c832] : memref<64x1024xbf16, #tpu.memory_space<vmem>>, vector<64x64xbf16>
    %cst_95 = arith.constant dense<0.000000e+00> : vector<64x128xf32>
    %164 = tpu.matmul %163, %162, %cst_95 {dimension_numbers = #tpu.dot_dimension_numbers<[1], [0], [0], [1], [0, 0, 1, 1], [], []>} : vector<64x64xbf16>, vector<64x128xbf16>, vector<64x128xf32> -> vector<64x128xf32>
    %165 = arith.addf %159, %164 : vector<64x128xf32>
    %166 = vector.extract_strided_slice %80 {offsets = [0, 14], sizes = [64, 64], strides = [1, 1]} : vector<64x79xbf16> to vector<64x64xbf16>
    %167 = vector.extract_strided_slice %82 {offsets = [0, 14], sizes = [64, 64], strides = [1, 1]} : vector<64x79xbf16> to vector<64x64xbf16>
    %168 = tpu.concatenate %166, %167 in 1 : vector<64x64xbf16>, vector<64x64xbf16> -> vector<64x128xbf16>
    %c0_96 = arith.constant 0 : index
    %c896_97 = arith.constant 896 : index
    %169 = vector.load %arg3[%c0_96, %c896_97] : memref<64x1024xbf16, #tpu.memory_space<vmem>>, vector<64x64xbf16>
    %cst_98 = arith.constant dense<0.000000e+00> : vector<64x128xf32>
    %170 = tpu.matmul %169, %168, %cst_98 {dimension_numbers = #tpu.dot_dimension_numbers<[1], [0], [0], [1], [0, 0, 1, 1], [], []>} : vector<64x64xbf16>, vector<64x128xbf16>, vector<64x128xf32> -> vector<64x128xf32>
    %171 = arith.addf %165, %170 : vector<64x128xf32>
    %172 = vector.extract_strided_slice %80 {offsets = [0, 15], sizes = [64, 64], strides = [1, 1]} : vector<64x79xbf16> to vector<64x64xbf16>
    %173 = vector.extract_strided_slice %82 {offsets = [0, 15], sizes = [64, 64], strides = [1, 1]} : vector<64x79xbf16> to vector<64x64xbf16>
    %174 = tpu.concatenate %172, %173 in 1 : vector<64x64xbf16>, vector<64x64xbf16> -> vector<64x128xbf16>
    %c0_99 = arith.constant 0 : index
    %c960 = arith.constant 960 : index
    %175 = vector.load %arg3[%c0_99, %c960] : memref<64x1024xbf16, #tpu.memory_space<vmem>>, vector<64x64xbf16>
    %cst_100 = arith.constant dense<0.000000e+00> : vector<64x128xf32>
    %176 = tpu.matmul %175, %174, %cst_100 {dimension_numbers = #tpu.dot_dimension_numbers<[1], [0], [0], [1], [0, 0, 1, 1], [], []>} : vector<64x64xbf16>, vector<64x128xbf16>, vector<64x128xf32> -> vector<64x128xf32>
    %177 = arith.addf %171, %176 : vector<64x128xf32>
    %c0_101 = arith.constant 0 : index
    %c64_102 = arith.constant 64 : index
    %c3_103 = arith.constant 3 : index
    %178 = vector.load %arg1[%c0_101, %c64_102, %c3_103] : memref<2x128x71xf32, #tpu.memory_space<vmem>>, vector<1x64x64xf32>
    %179 = vector.shape_cast %178 : vector<1x64x64xf32> to vector<64x64xf32>
    %c0_104 = arith.constant 0 : index
    %c0_105 = arith.constant 0 : index
    %c4_106 = arith.constant 4 : index
    %180 = vector.load %arg1[%c0_104, %c0_105, %c4_106] : memref<2x128x71xf32, #tpu.memory_space<vmem>>, vector<1x64x64xf32>
    %181 = vector.shape_cast %180 : vector<1x64x64xf32> to vector<64x64xf32>
    %182 = arith.maximumf %179, %181 : vector<64x64xf32>
    %c1_107 = arith.constant 1 : index
    %c64_108 = arith.constant 64 : index
    %c3_109 = arith.constant 3 : index
    %183 = vector.load %arg1[%c1_107, %c64_108, %c3_109] : memref<2x128x71xf32, #tpu.memory_space<vmem>>, vector<1x64x64xf32>
    %184 = vector.shape_cast %183 : vector<1x64x64xf32> to vector<64x64xf32>
    %c1_110 = arith.constant 1 : index
    %c0_111 = arith.constant 0 : index
    %c4_112 = arith.constant 4 : index
    %185 = vector.load %arg1[%c1_110, %c0_111, %c4_112] : memref<2x128x71xf32, #tpu.memory_space<vmem>>, vector<1x64x64xf32>
    %186 = vector.shape_cast %185 : vector<1x64x64xf32> to vector<64x64xf32>
    %187 = arith.maximumf %184, %186 : vector<64x64xf32>
    %188 = tpu.concatenate %182, %187 in 1 : vector<64x64xf32>, vector<64x64xf32> -> vector<64x128xf32>
    %c0_113 = arith.constant 0 : index
    %c0_114 = arith.constant 0 : index
    %189 = vector.load %arg5[%c0_113, %c0_114] : memref<64x1xf32, #tpu.memory_space<vmem>>, vector<64x1xf32>
    %190 = vector.broadcast %189 : vector<64x1xf32> to vector<64x128xf32>
    %191 = arith.addf %177, %190 : vector<64x128xf32>
    %192 = arith.addf %191, %188 : vector<64x128xf32>
    %c0_115 = arith.constant 0 : index
    %c0_116 = arith.constant 0 : index
    %c0_117 = arith.constant 0 : index
    %193 = vector.load %arg6[%c0_115, %c0_116, %c0_117] : memref<1x64x128xf32, #tpu.memory_space<vmem>>, vector<1x64x128xf32>
    %194 = vector.shape_cast %193 : vector<1x64x128xf32> to vector<64x128xf32>
    %195 = vector.shape_cast %192 : vector<64x128xf32> to vector<1x64x128xf32>
    tpu.vector_store %arg6[%c0_115, %c0_116, %c0_117], %195 {strides = array<i32>} : memref<1x64x128xf32, #tpu.memory_space<vmem>>, vector<1x64x128xf32>,
    return
  }
  func.func @transform_0(%arg0: i32) -> (i32, i32, i32) {
    %c0_i32 = arith.constant 0 : i32
    %c0_i32_0 = arith.constant 0 : i32
    %c0_i32_1 = arith.constant 0 : i32
    return %arg0, %c0_i32, %c0_i32_0 : i32, i32, i32
  }
  func.func @transform_1(%arg0: i32) -> (i32, i32) {
    %c0_i32 = arith.constant 0 : i32
    %c0_i32_0 = arith.constant 0 : i32
    %c0_i32_1 = arith.constant 0 : i32
    return %c0_i32, %c0_i32_0 : i32, i32
  }
  func.func @transform_2(%arg0: i32) -> (i32, i32) {
    %c0_i32 = arith.constant 0 : i32
    %c0_i32_0 = arith.constant 0 : i32
    %c0_i32_1 = arith.constant 0 : i32
    return %c0_i32, %c0_i32_0 : i32, i32
  }
  func.func @transform_3(%arg0: i32) -> (i32, i32) {
    %c0_i32 = arith.constant 0 : i32
    %c0_i32_0 = arith.constant 0 : i32
    %c0_i32_1 = arith.constant 0 : i32
    return %c0_i32, %c0_i32_0 : i32, i32
  }
  func.func @transform_4(%arg0: i32) -> (i32, i32) {
    %c0_i32 = arith.constant 0 : i32
    %c0_i32_0 = arith.constant 0 : i32
    %c0_i32_1 = arith.constant 0 : i32
    return %c0_i32, %c0_i32_0 : i32, i32
  }
  func.func @transform_5(%arg0: i32) -> (i32, i32, i32) {
    %c0_i32 = arith.constant 0 : i32
    %c0_i32_0 = arith.constant 0 : i32
    %c0_i32_1 = arith.constant 0 : i32
    return %arg0, %c0_i32, %c0_i32_0 : i32, i32, i32
  }
}

</mosaic_0001>

<bundles_post_ra>
// kernel: tpu_custom_call.1
= control target key start
LH: loop header
LB: loop body
LE: loop exit
PB: predicated region body
PF: predicated region fallthrough
CT: control target
= control target key end

     0   :  { %10 = vsyncpa [#allocation3], 0  ;;  %s7464_s0 = inlined_call_operand.vmem [shape: f32[4,128,71], index: 0, kind: input, shape index: {}]   ;;  %s7465_s1 = inlined_call_operand.vmem [shape: bf16[64,1024], index: 1, kind: input, shape index: {}]   ;;  %s7466_s2 = inlined_call_operand.vmem [shape: bf16[64,1024], index: 2, kind: input, shape index: {}]   ;;  %s7467_s3 = inlined_call_operand.vmem [shape: f32[64,1], index: 3, kind: input, shape index: {}]   ;;  %s7468_s4 = inlined_call_operand.vmem [shape: f32[64,1], index: 4, kind: input, shape index: {}]   ;;  %s7469_s5 = inlined_call_operand.hbm [shape: f32[2,64,128], index: 5, kind: output, shape index: {}]  }
   0x1   :  { %12 = vsyncpa [#allocation3 + $0x1], 0  ;;  %s5031_s18 = smov 0   ;;  %s5033_s19 = smov 0  }
   0x2   :  { %s5035_s20 = smov 0   ;;  %s5037_s21 = smov 0  }
   0x3 LB: > { %s5052_s22 = sadd.s32 4294967295, %s4963_s21   ;;  %s3760_s23 = sadd.s32 4294967294, %s4963_s21   ;;  %s4963_s21 = sphi %s5037_s21, %s7565_s21   ;;  %s4959_s20 = sphi %s5035_s20, %s7564_s20   ;;  %s4955_s19 = sphi %s5033_s19, %s7563_s19   ;;  %s4951_s18 = sphi %s5031_s18, %s7562_s18  }
   0x4   : > { %s5056_s24 = sadd.s32 1, %s4963_s21   ;;  %s135_s25 = sadd.s32 1, %s4959_s20 }
   0x5   : > { %s132_s26 = ssub.s32 %s4963_s21, %s5056_s24  ;;  %p145_p0 = scmp.ne.s32.totalorder %s4959_s20, %s4955_s19 }
   0x6   : > { %p133_p1 = scmp.eq.s32.totalorder %s132_s26, 0  ;;  %p146_p2 = scmp.eq.s32.totalorder %s5052_s22, 1 }
   0x7   : > { %p151_p3 = scmp.ne.s32.totalorder %s4955_s19, %s4951_s18  ;;  %p152_p4 = scmp.eq.s32.totalorder %s3760_s23, 1 }
   0x8   : > { %s5067_s27 = scalar_select %p133_p1, %s4959_s20, %s135_s25  }
   0x9   : > { %p5069_p5 = por %p146_p2, %p145_p0  ;;  %p5073_p6 = por %p152_p4, %p151_p3 }
   0xa   : > { %p3763_p7 = scmp.ge.s32.totalorder %s4963_s21, 1  ;;  %p192_p8 = scmp.lt.s32.totalorder %s4963_s21, 3 }
   0xc   : > { %p193_p9 = pnand %p3763_p7, %p192_p8 }
   0xe   : > { %196 = sbr.rel (%p193_p9) target bundleno = 1423 (0x58f), region = 40 }
  0x13   : > { %s3765_s30 = sshll.u32 %s5052_s22, 1  ;;  %s4965_s10 = smov 64   ;;  %vm326_vm0 = vcmask 523264   ;;  %vm1843_vm1 = vcmask 56320   ;;  %vm1853_vm2 = vcmask 580608  }
  0x14   : > { %p222_p10 = scmp.lt.s32.totalorder %s3765_s30, 3  ;;  %s4966_s11 = smov 127  }
  0x15   : > { %s4967_s12 = smov 63   ;;  %s7488_s13 = smov 126  }
  0x16   : > { %s7567_s30 = smov (!%p222_p10, %s3765_s30), 3  ;;  %s4969_s14 = smov 62  }
  0x17   : > { %s4117_s6 = sshll.u32 %s7567_s30, 7  ;;  %s4970_s15 = smov 125  }
  0x18   : > { %s5083_s9 = scalar_lea.vmem %s7464_s0, %s4117_s6  ;;  %s7482_s16 = smov 61  }
  0x19   : > { %v3776_v0 = vld [vmem:[%s5083_s9 + $0xc0] sm:$0xff]  ;;  %v3777_v1 = vld [vmem:[%s5083_s9 + $0xc8] sm:$0xff]  ;;  %v3778_v9 = vld [vmem:[%s5083_s9 + $0xd0] sm:$0xff]  ;;  %s7484_s17 = smov 124   ;;  %s7472_s23 = smov 60  }
  0x1a   : > { %v3772_v2 = vld [vmem:[%s5083_s9 + $0xa0] sm:$0xff]  ;;  %v5088_v3 = vpack.i.bf16 %v3777_v1, %v3776_v0  ;;  %v3773_v4 = vld [vmem:[%s5083_s9 + $0xa8] sm:$0xff]  ;;  %v3779_v10 = vld [vmem:[%s5083_s9 + $0xd8] sm:$0xff]  ;;  %s7486_s25 = smov 123   ;;  %s7474_s26 = smov 59  }
  0x1b   : > { %v3768_v5 = vld [vmem:[%s5083_s9 + $0x80] sm:$0xff]  ;;  %v3769_v6 = vld [vmem:[%s5083_s9 + $0x88] sm:$0xff]  ;;  %v5093_v7 = vpack.i.bf16 %v3773_v4, %v3772_v2  ;;  %v3774_v11 = vld [vmem:[%s5083_s9 + $0xb0] sm:$0xff]  ;;  %v5109_v15 = vpack.i.bf16 %v3779_v10, %v3778_v9  ;;  %s7476_s30 = smov 122   ;;  %s7470_s6 = smov 58  }
  0x1c   : > { %v5095_v8 = vpack.i.bf16 %v3769_v6, %v3768_v5  ;;  %4279 = vrot.lane.b32.xlu2 %v5088_v3, %s4965_s10  ;;  %v3775_v12 = vld [vmem:[%s5083_s9 + $0xb8] sm:$0xff]  ;;  %v3770_v13 = vld [vmem:[%s5083_s9 + $0x90] sm:$0xff]  ;;  %v5123_v19 = vld [vmem:[%s5083_s9] sm:$0xff]  ;;  %s7480_s7 = smov 121   ;;  %s7527_s8 = smov 58  }
  0x1d   : > { %4269 = vrot.lane.b32.xlu1 %v5093_v7, %s4965_s10  ;;  %v3771_v14 = vld [vmem:[%s5083_s9 + $0x98] sm:$0xff]  ;;  %v5111_v16 = vpack.i.bf16 %v3775_v12, %v3774_v11  ;;  %v3782_v18 = vld [vmem:[%s5083_s9 + $0xf0] sm:$0xff]  ;;  %v5126_v20 = vld [vmem:[%s5083_s9 + $0x8] sm:$0xff] }
  0x1e   : > { %4259 = vrot.lane.b32.xlu0 %v5095_v8, %s4965_s10  ;;  %v5113_v17 = vpack.i.bf16 %v3771_v14, %v3770_v13  ;;  %v3783_v21 = vld [vmem:[%s5083_s9 + $0xf8] sm:$0xff]  ;;  %v3780_v22 = vld [vmem:[%s5083_s9 + $0xe0] sm:$0xff]  ;;  %v3781_v23 = vld [vmem:[%s5083_s9 + $0xe8] sm:$0xff]  ;;  %v5133_v24 = vpack.i.bf16 %v5126_v20, %v5123_v19 }
  0x1f   : > { %v5135_v25 = vpack.i.bf16 %v3783_v21, %v3782_v18  ;;  %v5137_v26 = vpack.i.bf16 %v3781_v23, %v3780_v22  ;;  %v5142_v27 = vld [vmem:[%s5083_s9 + $0x20] sm:$0xff]  ;;  %v5149_v28 = vld [vmem:[%s5083_s9 + $0x30] sm:$0xff]  ;;  %v5152_v29 = vld [vmem:[%s5083_s9 + $0x38] sm:$0xff] }
  0x20   : > { %v5155_v30 = vld [vmem:[%s5083_s9 + $0x28] sm:$0xff]  ;;  %v5158_v31 = vld [vmem:[%s5083_s9 + $0x10] sm:$0xff]  ;;  %v5161_v32 = vld [vmem:[%s5083_s9 + $0x18] sm:$0xff]  ;;  %v5165_v33 = vpack.i.bf16 %v5152_v29, %v5149_v28 }
  0x21   : > { %v5169_v34 = vpack.i.bf16 %v5155_v30, %v5142_v27  ;;  %v5173_v35 = vpack.i.bf16 %v5161_v32, %v5158_v31  ;;  %v5178_v36 = vld [vmem:[%s5083_s9 + $0x50] sm:$0xff]  ;;  %v5185_v37 = vld [vmem:[%s5083_s9 + $0x60] sm:$0xff]  ;;  %v5188_v38 = vld [vmem:[%s5083_s9 + $0x68] sm:$0xff] }
  0x22   : > { %v5191_v39 = vld [vmem:[%s5083_s9 + $0x58] sm:$0xff]  ;;  %v5194_v40 = vld [vmem:[%s5083_s9 + $0x40] sm:$0xff]  ;;  %v5197_v41 = vld [vmem:[%s5083_s9 + $0x48] sm:$0xff]  ;;  %v5201_v42 = vpack.i.bf16 %v5188_v38, %v5185_v37 }
  0x23   : > { %v5205_v43 = vpack.i.bf16 %v5191_v39, %v5178_v36  ;;  %v5209_v44 = vpack.i.bf16 %v5197_v41, %v5194_v40  ;;  %v243_v45 = vld [vmem:[%s5083_s9 + $0x70] sm:$0xff]  ;;  %v244_v46 = vld [vmem:[%s5083_s9 + $0x78] sm:$0xff] }
  0x24   : > { %4284 = vrot.lane.b32.xlu2 %v5109_v15, %s4965_s10  ;;  %v5219_v47 = vpack.i.bf16 %v244_v46, %v243_v45 }
  0x25   : > { %4274 = vrot.lane.b32.xlu1 %v5111_v16, %s4965_s10 }
  0x26   : > { %4264 = vrot.lane.b32.xlu0 %v5113_v17, %s4965_s10 }
  0x2c   : > { %4299 = vrot.lane.b32.xlu2 %v5133_v24, %s4966_s11 }
  0x2d   : > { %4294 = vrot.lane.b32.xlu1 %v5135_v25, %s4965_s10 }
  0x2e   : > { %4289 = vrot.lane.b32.xlu0 %v5137_v26, %s4965_s10 }
  0x34   : > { %4314 = vrot.lane.b32.xlu2 %v5165_v33, %s4966_s11 }
  0x35   : > { %4309 = vrot.lane.b32.xlu1 %v5169_v34, %s4966_s11 }
  0x36   : > { %4304 = vrot.lane.b32.xlu0 %v5173_v35, %s4966_s11 }
  0x3c   : > { %4329 = vrot.lane.b32.xlu2 %v5201_v42, %s4966_s11 }
  0x3d   : > { %4324 = vrot.lane.b32.xlu1 %v5205_v43, %s4966_s11 }
  0x3e   : > { %4319 = vrot.lane.b32.xlu0 %v5209_v44, %s4966_s11 }
  0x44   : > { %4344 = vrot.lane.b32.xlu2 %v5113_v17, %s4967_s12 }
  0x45   : > { %4339 = vrot.lane.b32.xlu1 %v5095_v8, %s4967_s12 }
  0x46   : > { %4334 = vrot.lane.b32.xlu0 %v5219_v47, %s4966_s11 }
  0x4c   : > { %4359 = vrot.lane.b32.xlu2 %v5088_v3, %s4967_s12 }
  0x4d   : > { %4354 = vrot.lane.b32.xlu1 %v5111_v16, %s4967_s12 }
  0x4e   : > { %4349 = vrot.lane.b32.xlu0 %v5093_v7, %s4967_s12 }
  0x54   : > { %4374 = vrot.lane.b32.xlu2 %v5135_v25, %s4967_s12 }
  0x55   : > { %4369 = vrot.lane.b32.xlu1 %v5137_v26, %s4967_s12 }
  0x56   : > { %4364 = vrot.lane.b32.xlu0 %v5109_v15, %s4967_s12 }
  0x5c   : > { %4389 = vrot.lane.b32.xlu2 %v5169_v34, %s7488_s13 }
  0x5d   : > { %4384 = vrot.lane.b32.xlu1 %v5173_v35, %s7488_s13 }
  0x5e   : > { %4379 = vrot.lane.b32.xlu0 %v5133_v24, %s7488_s13 }
  0x64   : > { %4404 = vrot.lane.b32.xlu2 %v5205_v43, %s7488_s13 }
  0x65   : > { %4399 = vrot.lane.b32.xlu1 %v5209_v44, %s7488_s13 }
  0x66   : > { %4394 = vrot.lane.b32.xlu0 %v5165_v33, %s7488_s13 }
  0x6c   : > { %4419 = vrot.lane.b32.xlu2 %v5095_v8, %s4969_s14 }
  0x6d   : > { %4414 = vrot.lane.b32.xlu1 %v5219_v47, %s7488_s13 }
  0x6e   : > { %4409 = vrot.lane.b32.xlu0 %v5201_v42, %s7488_s13  ;;  %s4981_s13 = smov 71  }
  0x74   : > { %4434 = vrot.lane.b32.xlu2 %v5111_v16, %s4969_s14 }
  0x75   : > { %4429 = vrot.lane.b32.xlu1 %v5093_v7, %s4969_s14 }
  0x76   : > { %4424 = vrot.lane.b32.xlu0 %v5113_v17, %s4969_s14  ;;  %v4280_v48 = vpop.permute.xlu2 %4279 }
  0x77   : > { %v4282_v11 = vunpack.i.h.bf16 %v4280_v48  ;;  %v4281_v18 = vunpack.i.l.bf16 %v4280_v48 }
  0x7c   : > { %4449 = vrot.lane.b32.xlu2 %v5137_v26, %s4969_s14 }
  0x7d   : > { %4444 = vrot.lane.b32.xlu1 %v5109_v15, %s4969_s14 }
  0x7e   : > { %4439 = vrot.lane.b32.xlu0 %v5088_v3, %s4969_s14  ;;  %v4285_v49 = vpop.permute.xlu2 %4284 }
  0x7f   : > { %v4287_v4 = vunpack.i.h.bf16 %v4285_v49  ;;  %v4286_v5 = vunpack.i.l.bf16 %v4285_v49 }
  0x81   : > { %v337_v21 = vsel %vm326_vm0, %v5178_v36, %v4286_v5  ;;  %v338_v22 = vsel %vm326_vm0, %v5191_v39, %v4287_v4 }
  0x82   : > { %v348_v23 = vpack.c.bf16 %v338_v22, %v337_v21 }
  0x84   : > { %4464 = vrot.lane.b32.xlu2 %v5173_v35, %s4970_s15 }
  0x85   : > { %4459 = vrot.lane.b32.xlu1 %v5133_v24, %s4970_s15 }
  0x86   : > { %4454 = vrot.lane.b32.xlu0 %v5135_v25, %s4969_s14  ;;  %v5275_v50 = vpop.permute.xlu2 %4299 }
  0x8c   : > { %4479 = vrot.lane.b32.xlu2 %v5209_v44, %s4970_s15 }
  0x8d   : > { %4474 = vrot.lane.b32.xlu1 %v5165_v33, %s4970_s15 }
  0x8e   : > { %4469 = vrot.lane.b32.xlu0 %v5169_v34, %s4970_s15  ;;  %v5283_v51 = vpop.permute.xlu2 %4314 }
  0x8f   : > { %v5285_v52 = vpop.permute.xlu1 %4269 }
  0x90   : > { %v5287_v53 = vpop.permute.xlu0 %4259  ;;  %v4272_v39 = vunpack.i.h.bf16 %v5285_v52 }
  0x94   : > { %4494 = vrot.lane.b32.xlu2 %v5219_v47, %s4970_s15 }
  0x95   : > { %4489 = vrot.lane.b32.xlu1 %v5201_v42, %s4970_s15 }
  0x96   : > { %4484 = vrot.lane.b32.xlu0 %v5205_v43, %s4970_s15  ;;  %v5295_v54 = vpop.permute.xlu2 %4329 }
  0x97   : > { %v4275_v55 = vpop.permute.xlu1 %4274 }
  0x98   : > { %v5297_v56 = vpop.permute.xlu0 %4264 }
  0x9c   : > { %4509 = vrot.lane.b32.xlu2 %v5093_v7, %s7482_s16 }
  0x9d   : > { %4504 = vrot.lane.b32.xlu1 %v5113_v17, %s7482_s16 }
  0x9e   : > { %4499 = vrot.lane.b32.xlu0 %v5095_v8, %s7482_s16  ;;  %v5305_v57 = vpop.permute.xlu2 %4344 }
  0x9f   : > { %v4295_v58 = vpop.permute.xlu1 %4294 }
  0xa0   : > { %v4290_v59 = vpop.permute.xlu0 %4289  ;;  %v4297_v60 = vunpack.i.h.bf16 %v4295_v58  ;;  %v4296_v61 = vunpack.i.l.bf16 %v4295_v58 }
  0xa1   : > { %v4292_v62 = vunpack.i.h.bf16 %v4290_v59  ;;  %v4291_v63 = vunpack.i.l.bf16 %v4290_v59  ;;  %v4266_v59 = vunpack.i.l.bf16 %v5297_v56 }
  0xa2   : > { %v341_v0 = vsel %vm326_vm0, %v243_v45, %v4296_v61  ;;  %v342_v1 = vsel %vm326_vm0, %v244_v46, %v4297_v60  ;;  %v335_v45 = vsel %vm326_vm0, %v5194_v40, %v4281_v18  ;;  %v336_v46 = vsel %vm326_vm0, %v5197_v41, %v4282_v11 }
  0xa3   : > { %v350_v2 = vpack.c.bf16 %v342_v1, %v341_v0  ;;  %v339_v6 = vsel %vm326_vm0, %v5185_v37, %v4291_v63  ;;  %v340_v9 = vsel %vm326_vm0, %v5188_v38, %v4292_v62  ;;  %v4277_v37 = vunpack.i.h.bf16 %v4275_v55 }
  0xa4   : > { %4524 = vrot.lane.b32.xlu2 %v5109_v15, %s7482_s16  ;;  %v349_v14 = vpack.c.bf16 %v340_v9, %v339_v6  ;;  %v4276_v38 = vunpack.i.l.bf16 %v4275_v55  ;;  %v347_v55 = vpack.c.bf16 %v336_v46, %v335_v45  ;;  %v4271_v40 = vunpack.i.l.bf16 %v5285_v52 }
  0xa5   : > { %580 = vmatpush.bf16.msra.mxu1 %v350_v2  ;;  %4519 = vrot.lane.b32.xlu1 %v5088_v3, %s7482_s16  ;;  %v334_v58 = vsel %vm326_vm0, %v5152_v29, %v4277_v37  ;;  %v4267_v61 = vunpack.i.h.bf16 %v5297_v56  ;;  %v332_v52 = vsel %vm326_vm0, %v5155_v30, %v4272_v39  ;;  %v4262_v56 = vunpack.i.h.bf16 %v5287_v53 }
  0xa6   : > { %4514 = vrot.lane.b32.xlu0 %v5111_v16, %s7482_s16  ;;  %v5319_v10 = vpop.permute.xlu2 %4359  ;;  %v333_v41 = vsel %vm326_vm0, %v5149_v28, %v4276_v38  ;;  %v331_v62 = vsel %vm326_vm0, %v5142_v27, %v4271_v40  ;;  %v4261_v0 = vunpack.i.l.bf16 %v5287_v53  ;;  %v329_v30 = vsel %vm326_vm0, %v5158_v31, %v4266_v59 }
  0xa7   : > { %v5321_v12 = vpop.permute.xlu1 %4309  ;;  %v346_v60 = vpack.c.bf16 %v334_v58, %v333_v41  ;;  %v345_v2 = vpack.c.bf16 %v332_v52, %v331_v62  ;;  %v330_v6 = vsel %vm326_vm0, %v5161_v32, %v4267_v61  ;;  %v328_v31 = vsel %vm326_vm0, %v5126_v20, %v4262_v56 }
  0xa8   : > { %v5323_v13 = vpop.permute.xlu0 %4304  ;;  %v327_v53 = vsel %vm326_vm0, %v5123_v19, %v4261_v0  ;;  %v4332_v20 = vunpack.i.h.bf16 %v5295_v54  ;;  %v4331_v37 = vunpack.i.l.bf16 %v5295_v54  ;;  %v4362_v54 = vunpack.i.h.bf16 %v5319_v10 }
  0xa9   : > { %581 = vmatpush.bf16.msra.mxu1 %v349_v14  ;;  %v344_v14 = vpack.c.bf16 %v330_v6, %v329_v30 }
  0xac   : > { %4539 = vrot.lane.b32.xlu2 %v5133_v24, %s7484_s17 }
  0xad   : > { %582 = vmatpush.bf16.msra.mxu1 %v348_v23  ;;  %4534 = vrot.lane.b32.xlu1 %v5135_v25, %s7482_s16  ;;  %v343_v23 = vpack.c.bf16 %v328_v31, %v327_v53  ;;  %v4312_v53 = vunpack.i.h.bf16 %v5321_v12 }
  0xae   : > { %4529 = vrot.lane.b32.xlu0 %v5137_v26, %s7482_s16  ;;  %v4375_v36 = vpop.permute.xlu2 %4374  ;;  %s7524_s16 = smov 122  }
  0xaf   : > { %v5340_v48 = vpop.permute.xlu1 %4324  ;;  %v4377_v28 = vunpack.i.h.bf16 %v4375_v36  ;;  %v4376_v29 = vunpack.i.l.bf16 %v4375_v36 }
  0xb0   : > { %v5342_v49 = vpop.permute.xlu0 %4319  ;;  %v4327_v40 = vunpack.i.h.bf16 %v5340_v48  ;;  %v4326_v41 = vunpack.i.l.bf16 %v5340_v48 }
  0xb1   : > { %583 = vmatpush.bf16.msra.mxu1 %v347_v55  ;;  %v4321_v61 = vunpack.i.l.bf16 %v5342_v49  ;;  %v4322_v52 = vunpack.i.h.bf16 %v5342_v49 }
  0xb3   : > { %v480_v30 = vsel %vm326_vm0, %v4322_v52, %v4362_v54 }
  0xb4   : > { %4554 = vrot.lane.b32.xlu2 %v5165_v33, %s7484_s17 }
  0xb5   : > { %584 = vmatpush.bf16.msra.mxu1 %v346_v60  ;;  %4549 = vrot.lane.b32.xlu1 %v5169_v34, %s7484_s17  ;;  %v4361_v60 = vunpack.i.l.bf16 %v5319_v10 }
  0xb6   : > { %4544 = vrot.lane.b32.xlu0 %v5173_v35, %s7484_s17  ;;  %v5361_v63 = vpop.permute.xlu2 %4389 }
  0xb7   : > { %v5365_v1 = vpop.permute.xlu1 %4339  ;;  %v479_v0 = vsel %vm326_vm0, %v4321_v61, %v4361_v60 }
  0xb8   : > { %v4335_v27 = vpop.permute.xlu0 %4334  ;;  %v491_v6 = vpack.c.bf16 %v480_v30, %v479_v0 }
  0xb9   : > { %v4337_v4 = vunpack.i.h.bf16 %v4335_v27  ;;  %v4336_v5 = vunpack.i.l.bf16 %v4335_v27  ;;  %585 = vmatpush.bf16.msra.mxu1 %v345_v2 }
  0xbb   : > { %v485_v9 = vsel %vm326_vm0, %v4336_v5, %v4376_v29  ;;  %v486_v11 = vsel %vm326_vm0, %v4337_v4, %v4377_v28  ;;  %v4317_v4 = vunpack.i.h.bf16 %v5283_v51  ;;  %v4316_v5 = vunpack.i.l.bf16 %v5283_v51 }
  0xbc   : > { %v494_v18 = vpack.c.bf16 %v486_v11, %v485_v9  ;;  %4569 = vrot.lane.b32.xlu2 %v5201_v42, %s7484_s17  ;;  %v4311_v51 = vunpack.i.l.bf16 %v5321_v12 }
  0xbd   : > { %586 = vmatpush.bf16.msra.mxu1 %v344_v14  ;;  %4564 = vrot.lane.b32.xlu1 %v5205_v43, %s7484_s17 }
  0xbe   : > { %4559 = vrot.lane.b32.xlu0 %v5209_v44, %s7484_s17  ;;  %527 = vmatpush.bf16.msra.mxu0 %v494_v18  ;;  %v5383_v32 = vpop.permute.xlu2 %4404 }
  0xbf   : > { %v4355_v21 = vpop.permute.xlu1 %4354 }
  0xc0   : > { %v5385_v22 = vpop.permute.xlu0 %4349  ;;  %v4357_v27 = vunpack.i.h.bf16 %v4355_v21  ;;  %v4356_v2 = vunpack.i.l.bf16 %v4355_v21  ;;  %v4347_v21 = vunpack.i.h.bf16 %v5305_v57 }
  0xc1   : > { %587 = vmatpush.bf16.msra.mxu1 %v343_v23  ;;  %v4352_v9 = vunpack.i.h.bf16 %v5385_v22  ;;  %v4351_v11 = vunpack.i.l.bf16 %v5385_v22  ;;  %v4346_v22 = vunpack.i.l.bf16 %v5305_v57  ;;  %v4307_v23 = vunpack.i.h.bf16 %v5323_v13 }
  0xc2   : > { %v477_v14 = vsel %vm326_vm0, %v4316_v5, %v4356_v2  ;;  %v478_v18 = vsel %vm326_vm0, %v4317_v4, %v4357_v27 }
  0xc3   : > { %v475_v12 = vsel %vm326_vm0, %v4311_v51, %v4351_v11 }
  0xc4   : > { %4584 = vrot.lane.b32.xlu2 %v5113_v17, %s7472_s23 }
  0xc5   : > { %4579 = vrot.lane.b32.xlu1 %v5095_v8, %s7472_s23 }
  0xc6   : > { %4574 = vrot.lane.b32.xlu0 %v5219_v47, %s7484_s17  ;;  %v5393_v19 = vpop.permute.xlu2 %4419  ;;  %s7525_s17 = smov 59  }
  0xc7   : > { %v4370_v38 = vpop.permute.xlu1 %4369 }
  0xc8   : > { %v4365_v45 = vpop.permute.xlu0 %4364  ;;  %v4372_v46 = vunpack.i.h.bf16 %v4370_v38  ;;  %v4371_v36 = vunpack.i.l.bf16 %v4370_v38  ;;  %v490_v38 = vpack.c.bf16 %v478_v18, %v477_v14 }
  0xc9   : > { %v4367_v39 = vunpack.i.h.bf16 %v4365_v45  ;;  %v4366_v55 = vunpack.i.l.bf16 %v4365_v45  ;;  %v4306_v45 = vunpack.i.l.bf16 %v5323_v13  ;;  %v4302_v13 = vunpack.i.h.bf16 %v5275_v50 }
  0xca   : > { %v483_v58 = vsel %vm326_vm0, %v4331_v37, %v4371_v36  ;;  %v484_v59 = vsel %vm326_vm0, %v4332_v20, %v4372_v46  ;;  %v476_v46 = vsel %vm326_vm0, %v4312_v53, %v4352_v9 }
  0xcb   : > { %v493_v62 = vpack.c.bf16 %v484_v59, %v483_v58  ;;  %v481_v28 = vsel %vm326_vm0, %v4326_v41, %v4366_v55  ;;  %v482_v48 = vsel %vm326_vm0, %v4327_v40, %v4367_v39  ;;  %v489_v36 = vpack.c.bf16 %v476_v46, %v475_v12 }
  0xcc   : > { %4599 = vrot.lane.b32.xlu2 %v5088_v3, %s7472_s23  ;;  %v492_v49 = vpack.c.bf16 %v482_v48, %v481_v28  ;;  %v4342_v39 = vunpack.i.h.bf16 %v5365_v1  ;;  %v4341_v55 = vunpack.i.l.bf16 %v5365_v1  ;;  %v473_v57 = vsel %vm326_vm0, %v4306_v45, %v4346_v22 }
  0xcd   : > { %4594 = vrot.lane.b32.xlu1 %v5111_v16, %s7472_s23  ;;  %528 = vmatpush.bf16.msra.mxu0 %v493_v62  ;;  %v474_v40 = vsel %vm326_vm0, %v4307_v23, %v4347_v21  ;;  %v4301_v41 = vunpack.i.l.bf16 %v5275_v50  ;;  %v4407_v12 = vunpack.i.h.bf16 %v5383_v32  ;;  %v4406_v46 = vunpack.i.l.bf16 %v5383_v32 }
  0xce   : > { %4589 = vrot.lane.b32.xlu0 %v5093_v7, %s7472_s23  ;;  %v5413_v29 = vpop.permute.xlu2 %4434  ;;  %v488_v60 = vpack.c.bf16 %v474_v40, %v473_v57  ;;  %v472_v62 = vsel %vm326_vm0, %v4302_v13, %v4342_v39 }
  0xcf   : > { %v5415_v56 = vpop.permute.xlu1 %4384  ;;  %v471_v61 = vsel %vm326_vm0, %v4301_v41, %v4341_v55 }
  0xd0   : > { %v5417_v10 = vpop.permute.xlu0 %4379  ;;  %v487_v54 = vpack.c.bf16 %v472_v62, %v471_v61 }
  0xd1   : > { %529 = vmatpush.bf16.msra.mxu0 %v492_v49 }
  0xd4   : > { %4614 = vrot.lane.b32.xlu2 %v5135_v25, %s7472_s23 }
  0xd5   : > { %4609 = vrot.lane.b32.xlu1 %v5137_v26, %s7472_s23  ;;  %530 = vmatpush.bf16.msra.mxu0 %v491_v6 }
  0xd6   : > { %4604 = vrot.lane.b32.xlu0 %v5109_v15, %s7472_s23  ;;  %v5435_v31 = vpop.permute.xlu2 %4449  ;;  %s7478_s23 = smov 57  }
  0xd7   : > { %v5440_v20 = vpop.permute.xlu1 %4399  ;;  %v4452_v27 = vunpack.i.h.bf16 %v5435_v31  ;;  %v4451_v30 = vunpack.i.l.bf16 %v5435_v31 }
  0xd8   : > { %v5442_v37 = vpop.permute.xlu0 %4394  ;;  %v4401_v32 = vunpack.i.l.bf16 %v5440_v20 }
  0xd9   : > { %531 = vmatpush.bf16.msra.mxu0 %v490_v38  ;;  %v4396_v61 = vunpack.i.l.bf16 %v5442_v37 }
  0xdc   : > { %4629 = vrot.lane.b32.xlu2 %v5169_v34, %s7486_s25 }
  0xdd   : > { %4624 = vrot.lane.b32.xlu1 %v5173_v35, %s7486_s25  ;;  %532 = vmatpush.bf16.msra.mxu0 %v489_v36 }
  0xde   : > { %4619 = vrot.lane.b32.xlu0 %v5133_v24, %s7486_s25  ;;  %v5459_v1 = vpop.permute.xlu2 %4464 }
  0xdf   : > { %v4415_v58 = vpop.permute.xlu1 %4414 }
  0xe0   : > { %v4410_v59 = vpop.permute.xlu0 %4409  ;;  %v4417_v4 = vunpack.i.h.bf16 %v4415_v58  ;;  %v4416_v5 = vunpack.i.l.bf16 %v4415_v58 }
  0xe1   : > { %533 = vmatpush.bf16.msra.mxu0 %v488_v60  ;;  %v4412_v11 = vunpack.i.h.bf16 %v4410_v59  ;;  %v4411_v14 = vunpack.i.l.bf16 %v4410_v59  ;;  %v4402_v59 = vunpack.i.h.bf16 %v5440_v20  ;;  %v4436_v60 = vunpack.i.l.bf16 %v5413_v29 }
  0xe3   : > { %v717_v31 = vsel %vm326_vm0, %v4411_v14, %v4451_v30  ;;  %v718_v45 = vsel %vm326_vm0, %v4412_v11, %v4452_v27  ;;  %v4392_v14 = vunpack.i.h.bf16 %v5361_v63 }
  0xe4   : > { %4644 = vrot.lane.b32.xlu2 %v5205_v43, %s7486_s25  ;;  %v727_v57 = vpack.c.bf16 %v718_v45, %v717_v31  ;;  %v4382_v31 = vunpack.i.h.bf16 %v5417_v10 }
  0xe5   : > { %4639 = vrot.lane.b32.xlu1 %v5209_v44, %s7486_s25  ;;  %534 = vmatpush.bf16.msra.mxu0 %v487_v54  ;;  %v4437_v54 = vunpack.i.h.bf16 %v5413_v29 }
  0xe6   : > { %4634 = vrot.lane.b32.xlu0 %v5165_v33, %s7486_s25  ;;  %v5469_v50 = vpop.permute.xlu2 %4479 }
  0xe7   : > { %v5471_v52 = vpop.permute.xlu1 %4429 }
  0xe8   : > { %v5473_v28 = vpop.permute.xlu0 %4424 }
  0xec   : > { %4659 = vrot.lane.b32.xlu2 %v5095_v8, %s7474_s26 }
  0xed   : > { %4654 = vrot.lane.b32.xlu1 %v5219_v47, %s7486_s25 }
  0xee   : > { %4649 = vrot.lane.b32.xlu0 %v5201_v42, %s7486_s25  ;;  %v5481_v48 = vpop.permute.xlu2 %4494  ;;  %s4982_s25 = smov 7  }
  0xef   : > { %v4445_v49 = vpop.permute.xlu1 %4444 }
  0xf0   : > { %v4440_v0 = vpop.permute.xlu0 %4439  ;;  %v4447_v23 = vunpack.i.h.bf16 %v4445_v49  ;;  %v4446_v38 = vunpack.i.l.bf16 %v4445_v49  ;;  %v4397_v49 = vunpack.i.h.bf16 %v5442_v37 }
  0xf1   : > { %v4442_v40 = vunpack.i.h.bf16 %v4440_v0  ;;  %v4441_v13 = vunpack.i.l.bf16 %v4440_v0 }
  0xf2   : > { %v715_v41 = vsel %vm326_vm0, %v4406_v46, %v4446_v38  ;;  %v716_v58 = vsel %vm326_vm0, %v4407_v12, %v4447_v23  ;;  %v712_v11 = vsel %vm326_vm0, %v4397_v49, %v4437_v54 }
  0xf3   : > { %v726_v62 = vpack.c.bf16 %v716_v58, %v715_v41  ;;  %v713_v0 = vsel %vm326_vm0, %v4401_v32, %v4441_v13  ;;  %v714_v27 = vsel %vm326_vm0, %v4402_v59, %v4442_v40 }
  0xf4   : > { %4674 = vrot.lane.b32.xlu2 %v5111_v16, %s7474_s26  ;;  %v725_v30 = vpack.c.bf16 %v714_v27, %v713_v0 }
  0xf5   : > { %4669 = vrot.lane.b32.xlu1 %v5093_v7, %s7474_s26 }
  0xf6   : > { %4664 = vrot.lane.b32.xlu0 %v5113_v17, %s7474_s26  ;;  %v5490_v2 = vpop.permute.xlu2 %4509 }
  0xf7   : > { %v5493_v6 = vpop.permute.xlu1 %4459 }
  0xf8   : > { %v4455_v9 = vpop.permute.xlu0 %4454 }
  0xf9   : > { %v4457_v18 = vunpack.i.h.bf16 %v4455_v9  ;;  %v4456_v53 = vunpack.i.l.bf16 %v4455_v9  ;;  %v4431_v9 = vunpack.i.l.bf16 %v5471_v52 }
  0xfb   : > { %v719_v51 = vsel %vm326_vm0, %v4416_v5, %v4456_v53  ;;  %v720_v21 = vsel %vm326_vm0, %v4417_v4, %v4457_v18  ;;  %v711_v4 = vsel %vm326_vm0, %v4396_v61, %v4436_v60  ;;  %v4432_v5 = vunpack.i.h.bf16 %v5471_v52 }
  0xfc   : > { %v728_v22 = vpack.c.bf16 %v720_v21, %v719_v51  ;;  %4689 = vrot.lane.b32.xlu2 %v5137_v26, %s7474_s26  ;;  %v4391_v18 = vunpack.i.l.bf16 %v5361_v63  ;;  %v724_v53 = vpack.c.bf16 %v712_v11, %v711_v4  ;;  %v4427_v51 = vunpack.i.h.bf16 %v5473_v28 }
  0xfd   : > { %4684 = vrot.lane.b32.xlu1 %v5109_v15, %s7474_s26  ;;  %v4426_v21 = vunpack.i.l.bf16 %v5473_v28  ;;  %v710_v23 = vsel %vm326_vm0, %v4392_v14, %v4432_v5  ;;  %v4387_v52 = vunpack.i.h.bf16 %v5415_v56  ;;  %v4386_v63 = vunpack.i.l.bf16 %v5415_v56 }
  0xfe   : > { %761 = vmatpush.bf16.msra.mxu2 %v728_v22  ;;  %4679 = vrot.lane.b32.xlu0 %v5088_v3, %s7474_s26  ;;  %v5507_v36 = vpop.permute.xlu2 %4524  ;;  %v709_v22 = vsel %vm326_vm0, %v4391_v18, %v4431_v9  ;;  %v4422_v28 = vunpack.i.h.bf16 %v5393_v19  ;;  %v4496_v60 = vunpack.i.l.bf16 %v5481_v48 }
  0xff   : > { %v5509_v39 = vpop.permute.xlu1 %4474  ;;  %v723_v46 = vpack.c.bf16 %v710_v23, %v709_v22  ;;  %v707_v56 = vsel %vm326_vm0, %v4386_v63, %v4426_v21  ;;  %v708_v40 = vsel %vm326_vm0, %v4387_v52, %v4427_v51  ;;  %v4481_v22 = vunpack.i.l.bf16 %v5469_v50 }
 0x100   : > { %v5511_v55 = vpop.permute.xlu0 %4469  ;;  %v722_v13 = vpack.c.bf16 %v708_v40, %v707_v56  ;;  %v706_v41 = vsel %vm326_vm0, %v4382_v31, %v4422_v28 }
 0x102   : > { %762 = vmatpush.bf16.msra.mxu2 %v727_v57  ;;  %v4381_v57 = vunpack.i.l.bf16 %v5417_v10 }
 0x104   : > { %4704 = vrot.lane.b32.xlu2 %v5173_v35, %s7476_s30 }
 0x105   : > { %4699 = vrot.lane.b32.xlu1 %v5133_v24, %s7476_s30 }
 0x106   : > { %763 = vmatpush.bf16.msra.mxu2 %v726_v62  ;;  %4694 = vrot.lane.b32.xlu0 %v5135_v25, %s7474_s26  ;;  %v5529_v20 = vpop.permute.xlu2 %4539 }
 0x107   : > { %v5531_v29 = vpop.permute.xlu1 %4489 }
 0x108   : > { %v5533_v37 = vpop.permute.xlu0 %4484  ;;  %v4491_v27 = vunpack.i.l.bf16 %v5531_v29 }
 0x109   : > { %v4486_v4 = vunpack.i.l.bf16 %v5533_v37  ;;  %v4487_v9 = vunpack.i.h.bf16 %v5533_v37 }
 0x10a   : > { %764 = vmatpush.bf16.msra.mxu2 %v725_v30  ;;  %v4526_v30 = vunpack.i.l.bf16 %v5507_v36 }
 0x10c   : > { %4719 = vrot.lane.b32.xlu2 %v5209_v44, %s7476_s30  ;;  %v4421_v44 = vunpack.i.l.bf16 %v5393_v19  ;;  %v904_v37 = vsel %vm326_vm0, %v4486_v4, %v4526_v30  ;;  %v4863_v4 = vld [vmem:[%s5083_s9 + $0xf0] sm:$0xff] }
 0x10d   : > { %4714 = vrot.lane.b32.xlu1 %v5165_v33, %s7476_s30 }
 0x10e   : > { %765 = vmatpush.bf16.msra.mxu2 %v724_v53  ;;  %4709 = vrot.lane.b32.xlu0 %v5169_v34, %s7476_s30  ;;  %v5553_v38 = vpop.permute.xlu2 %4554  ;;  %v705_v19 = vsel %vm326_vm0, %v4381_v57, %v4421_v44  ;;  %v4477_v44 = vunpack.i.h.bf16 %v5509_v39  ;;  %v4472_v57 = vunpack.i.h.bf16 %v5511_v55 }
 0x10f   : > { %v5558_v45 = vpop.permute.xlu1 %4504  ;;  %v721_v59 = vpack.c.bf16 %v706_v41, %v705_v19 }
 0x110   : > { %v5560_v12 = vpop.permute.xlu0 %4499  ;;  %v4507_v41 = vunpack.i.h.bf16 %v5558_v45 }
 0x112   : > { %766 = vmatpush.bf16.msra.mxu2 %v723_v46  ;;  %v4512_v46 = vunpack.i.h.bf16 %v5490_v2 }
 0x114   : > { %4734 = vrot.lane.b32.xlu2 %v5219_v47, %s7476_s30 }
 0x115   : > { %4729 = vrot.lane.b32.xlu1 %v5201_v42, %s7476_s30 }
 0x116   : > { %767 = vmatpush.bf16.msra.mxu2 %v722_v13  ;;  %4724 = vrot.lane.b32.xlu0 %v5205_v43, %s7476_s30  ;;  %v5573_v10 = vpop.permute.xlu2 %4569  ;;  %v4497_v43 = vunpack.i.h.bf16 %v5481_v48  ;;  %v4527_v48 = vunpack.i.h.bf16 %v5507_v36  ;;  %s7528_s30 = smov 121  }
 0x117   : > { %v4520_v58 = vpop.permute.xlu1 %4519 }
 0x118   : > { %v5575_v32 = vpop.permute.xlu0 %4514  ;;  %v4522_v53 = vunpack.i.h.bf16 %v4520_v58  ;;  %v905_v21 = vsel %vm326_vm0, %v4487_v9, %v4527_v48  ;;  %v4462_v9 = vunpack.i.h.bf16 %v5493_v6 }
 0x119   : > { %v915_v23 = vpack.c.bf16 %v905_v21, %v904_v37  ;;  %v4516_v52 = vunpack.i.l.bf16 %v5575_v32  ;;  %v3802_v37 = vld [vmem:[%s7465_s1] sm:$0xf] }
 0x11a   : > { %768 = vmatpush.bf16.msra.mxu2 %v721_v59  ;;  %v899_v59 = vsel %vm326_vm0, %v4472_v57, %v4512_v46  ;;  %v4870_v57 = vld [vmem:[%s5083_s9 + $0x58] sm:$0xff] }
 0x11c   : > { %4749 = vrot.lane.b32.xlu2 %v5093_v7, %s7470_s6  ;;  %v4492_v7 = vunpack.i.h.bf16 %v5531_v29 }
 0x11d   : > { %4744 = vrot.lane.b32.xlu1 %v5113_v17, %s7470_s6 }
 0x11e   : > { %4739 = vrot.lane.b32.xlu0 %v5095_v8, %s7470_s6  ;;  %v5583_v42 = vpop.permute.xlu2 %4584 }
 0x11f   : > { %v4535_v47 = vpop.permute.xlu1 %4534 }
 0x120   : > { %v4537_v61 = vunpack.i.h.bf16 %v4535_v47  ;;  %v4536_v62 = vunpack.i.l.bf16 %v4535_v47  ;;  %v4530_v54 = vpop.permute.xlu0 %4529 }
 0x121   : > { %v4532_v49 = vunpack.i.h.bf16 %v4530_v54  ;;  %v4531_v0 = vunpack.i.l.bf16 %v4530_v54 }
 0x122   : > { %v908_v17 = vsel %vm326_vm0, %v4496_v60, %v4536_v62  ;;  %v909_v8 = vsel %vm326_vm0, %v4497_v43, %v4537_v61  ;;  %v4466_v43 = vunpack.i.l.bf16 %v5459_v1  ;;  %v4502_v60 = vunpack.i.h.bf16 %v5560_v12 }
 0x123   : > { %v917_v5 = vpack.c.bf16 %v909_v8, %v908_v17  ;;  %v906_v11 = vsel %vm326_vm0, %v4491_v27, %v4531_v0  ;;  %v907_v29 = vsel %vm326_vm0, %v4492_v7, %v4532_v49  ;;  %v4501_v49 = vunpack.i.l.bf16 %v5560_v12  ;;  %v4861_v0 = vld [vmem:[%s5083_s9 + $0x60] sm:$0xff]  ;;  %v4862_v7 = vld [vmem:[%s5083_s9 + $0x68] sm:$0xff]  ;;  %v4865_v12 = vld [vmem:[%s5083_s9 + $0x70] sm:$0xff] }
 0x124   : > { %4764 = vrot.lane.b32.xlu2 %v5109_v15, %s7470_s6  ;;  %v916_v36 = vpack.c.bf16 %v907_v29, %v906_v11  ;;  %v4521_v15 = vunpack.i.l.bf16 %v4520_v58  ;;  %v4506_v58 = vunpack.i.l.bf16 %v5558_v45  ;;  %v4461_v11 = vunpack.i.l.bf16 %v5493_v6  ;;  %v4866_v29 = vld [vmem:[%s5083_s9 + $0x78] sm:$0xff] }
 0x125   : > { %4759 = vrot.lane.b32.xlu1 %v5088_v3, %s7470_s6  ;;  %950 = vmatpush.bf16.msra.mxu3 %v917_v5  ;;  %v4482_v3 = vunpack.i.h.bf16 %v5469_v50  ;;  %v4476_v50 = vunpack.i.l.bf16 %v5509_v39  ;;  %v4864_v5 = vld [vmem:[%s5083_s9 + $0xf8] sm:$0xff] }
 0x126   : > { %4754 = vrot.lane.b32.xlu0 %v5111_v16, %s7470_s6  ;;  %v5603_v14 = vpop.permute.xlu2 %4599  ;;  %v4517_v16 = vunpack.i.h.bf16 %v5575_v32  ;;  %v902_v63 = vsel %vm326_vm0, %v4481_v22, %v4521_v15  ;;  %v4122_v32 = vld [vmem:[%s7465_s1 + $0x20] sm:$0xf0]  ;;  %v896_v27 = vsel %vm326_vm0, %v4466_v43, %v4506_v58  ;;  %v4803_v48 = vpack.i.bf16 %v4864_v5, %v4863_v4  ;;  %v3806_v5 = vld [vmem:[%s7465_s1 + $0x40] sm:$0xf] }
 0x127   : > { %v5605_v18 = vpop.permute.xlu1 %4549  ;;  %v903_v28 = vsel %vm326_vm0, %v4482_v3, %v4522_v53  ;;  %v900_v19 = vsel %vm326_vm0, %v4476_v50, %v4516_v52  ;;  %v4118_v53 = vld [vmem:[%s7465_s1 + $0x1c] sm:$0xf0]  ;;  %v4867_v50 = vld [vmem:[%s5083_s9 + $0xd0] sm:$0xff] }
 0x128   : > { %v5608_v51 = vpop.permute.xlu0 %4544  ;;  %v914_v40 = vpack.c.bf16 %v903_v28, %v902_v63  ;;  %v901_v39 = vsel %vm326_vm0, %v4477_v44, %v4517_v16  ;;  %v3803_v22 = vor.u32 %v4118_v53, %v3802_v37  ;;  %v895_v16 = vsel %vm326_vm0, %v4462_v9, %v4502_v60  ;;  %v4873_v60 = vld [vmem:[%s5083_s9 + $0xb0] sm:$0xff] }
 0x129   : > { %951 = vmatpush.bf16.msra.mxu3 %v916_v36  ;;  %v4798_v36 = vpack.i.bf16 %v4866_v29, %v4865_v12  ;;  %v4601_v9 = vunpack.i.l.bf16 %v5603_v14 }
 0x12a   : > { %588 = vmatmul.bf16.vlgmr.msra.gmra.mxu1 %v3803_v22 }
 0x12c   : > { %4779 = vrot.lane.b32.xlu2 %v5133_v24, %s7480_s7  ;;  %v4511_v24 = vunpack.i.l.bf16 %v5490_v2 }
 0x12d   : > { %4774 = vrot.lane.b32.xlu1 %v5135_v25, %s7470_s6  ;;  %952 = vmatpush.bf16.msra.mxu3 %v915_v23  ;;  %v4471_v25 = vunpack.i.l.bf16 %v5511_v55  ;;  %v3786_v55 = vld [vmem:[%s7465_s1 + $0x4] sm:$0xf]  ;;  %v894_v23 = vsel %vm326_vm0, %v4461_v11, %v4501_v49 }
 0x12e   : > { %4769 = vrot.lane.b32.xlu0 %v5137_v26, %s7470_s6  ;;  %v4615_v31 = vpop.permute.xlu2 %4614  ;;  %v913_v26 = vpack.c.bf16 %v901_v39, %v900_v19  ;;  %v3787_v45 = vor.u32 %v4122_v32, %v3786_v55  ;;  %v910_v28 = vpack.c.bf16 %v895_v16, %v894_v23  ;;  %v4872_v19 = vld [vmem:[%s5083_s9 + $0xe8] sm:$0xff]  ;;  %v4571_v32 = vunpack.i.l.bf16 %v5573_v10  ;;  %s7526_s6 = smov 60  }
 0x12f   : > { %v5628_v56 = vpop.permute.xlu1 %4564  ;;  %v898_v2 = vsel %vm326_vm0, %v4471_v25, %v4511_v24  ;;  %v4617_v61 = vunpack.i.h.bf16 %v4615_v31  ;;  %v4616_v62 = vunpack.i.l.bf16 %v4615_v31  ;;  %v4868_v31 = vld [vmem:[%s5083_s9 + $0xd8] sm:$0xff]  ;;  %v4869_v24 = vld [vmem:[%s5083_s9 + $0x50] sm:$0xff]  ;;  %v4871_v25 = vld [vmem:[%s5083_s9 + $0xe0] sm:$0xff] }
 0x130   : > { %v5631_v13 = vpop.permute.xlu0 %4559  ;;  %535 = vmatmul.bf16.vlgmr.msra.gmra.mxu0 %v3787_v45  ;;  %v4823_v46 = vpack.i.bf16 %v4868_v31, %v4867_v50  ;;  %v4813_v39 = vpack.i.bf16 %v4872_v19, %v4871_v25  ;;  %v4880_v23 = vld [vmem:[%s5083_s9 + $0x88] sm:$0xff]  ;;  %v4881_v31 = vld [vmem:[%s5083_s9 + $0x90] sm:$0xff]  ;;  %v4883_v25 = vld [vmem:[%s5083_s9 + $0xa0] sm:$0xff] }
 0x131   : > { %953 = vmatpush.bf16.msra.mxu3 %v914_v40  ;;  %v4818_v40 = vpack.i.bf16 %v4870_v57, %v4869_v24  ;;  %v4561_v11 = vunpack.i.l.bf16 %v5631_v13  ;;  %v4557_v57 = vunpack.i.h.bf16 %v5553_v38  ;;  %v4884_v19 = vld [vmem:[%s5083_s9 + $0xa8] sm:$0xff] }
 0x134   : > { %4794 = vrot.lane.b32.xlu2 %v5165_v33, %s7480_s7  ;;  %v4467_v33 = vunpack.i.h.bf16 %v5459_v1 }
 0x135   : > { %4789 = vrot.lane.b32.xlu1 %v5169_v34, %s7480_s7  ;;  %954 = vmatpush.bf16.msra.mxu3 %v913_v26  ;;  %v912_v34 = vpack.c.bf16 %v899_v59, %v898_v2  ;;  %v3790_v26 = vld [vmem:[%s7465_s1 + $0x44] sm:$0xf]  ;;  %v4572_v2 = vunpack.i.h.bf16 %v5573_v10 }
 0x136   : > { %4784 = vrot.lane.b32.xlu0 %v5173_v35, %s7480_s7  ;;  %v5653_v47 = vpop.permute.xlu2 %4629  ;;  %v4808_v35 = vpack.i.bf16 %v4862_v7, %v4861_v0  ;;  %v897_v17 = vsel %vm326_vm0, %v4467_v33, %v4507_v41  ;;  %v4123_v41 = vld [vmem:[%s7465_s1 + $0x60] sm:$0xf0]  ;;  %v4876_v0 = vld [vmem:[%s5083_s9 + $0xc8] sm:$0xff] }
 0x137   : > { %v5656_v54 = vpop.permute.xlu1 %4579  ;;  %v911_v15 = vpack.c.bf16 %v897_v17, %v896_v27  ;;  %v3791_v58 = vor.u32 %v4123_v41, %v3790_v26  ;;  %v4878_v27 = vld [vmem:[%s5083_s9 + $0x48] sm:$0xff] }
 0x138   : > { %v4575_v1 = vpop.permute.xlu0 %4574 }
 0x139   : > { %v4577_v8 = vunpack.i.h.bf16 %v4575_v1  ;;  %v4576_v30 = vunpack.i.l.bf16 %v4575_v1  ;;  %955 = vmatpush.bf16.msra.mxu3 %v912_v34  ;;  %v4875_v1 = vld [vmem:[%s5083_s9 + $0xc0] sm:$0xff] }
 0x13a   : > { %v4833_v7 = vpack.i.bf16 %v4876_v0, %v4875_v1  ;;  %v3810_v0 = vld [vmem:[%s7465_s1 + $0x80] sm:$0xf] }
 0x13b   : > { %v1097_v21 = vsel %vm326_vm0, %v4576_v30, %v4616_v62  ;;  %v1098_v3 = vsel %vm326_vm0, %v4577_v8, %v4617_v61  ;;  %v4874_v61 = vld [vmem:[%s5083_s9 + $0xb8] sm:$0xff]  ;;  %v4567_v8 = vunpack.i.h.bf16 %v5628_v56  ;;  %v4566_v30 = vunpack.i.l.bf16 %v5628_v56 }
 0x13c   : > { %4809 = vrot.lane.b32.xlu2 %v4808_v35, %s7480_s7  ;;  %v1106_v6 = vpack.c.bf16 %v1098_v3, %v1097_v21  ;;  %v4838_v62 = vpack.i.bf16 %v4874_v61, %v4873_v60  ;;  %v4877_v35 = vld [vmem:[%s5083_s9 + $0x40] sm:$0xff]  ;;  %v4602_v56 = vunpack.i.h.bf16 %v5603_v14  ;;  %v1091_v14 = vsel %vm326_vm0, %v4561_v11, %v4601_v9 }
 0x13d   : > { %4804 = vrot.lane.b32.xlu1 %v4803_v48, %s7478_s23  ;;  %956 = vmatpush.bf16.msra.mxu3 %v911_v15  ;;  %v4828_v17 = vpack.i.bf16 %v4878_v27, %v4877_v35  ;;  %v4119_v48 = vld [vmem:[%s7465_s1 + $0x5c] sm:$0xf0] }
 0x13e   : > { %4799 = vrot.lane.b32.xlu0 %v4798_v36, %s7480_s7  ;;  %1139 = vmatpush.bf16.msrb.mxu0 %v1106_v6  ;;  %v5682_v52 = vpop.permute.xlu2 %4644  ;;  %v3807_v29 = vor.u32 %v4119_v48, %v3806_v5  ;;  %v4562_v36 = vunpack.i.h.bf16 %v5631_v13  ;;  %v4879_v6 = vld [vmem:[%s5083_s9 + $0x80] sm:$0xff] }
 0x13f   : > { %v5684_v63 = vpop.permute.xlu1 %4594  ;;  %v4853_v16 = vpack.i.bf16 %v4880_v23, %v4879_v6  ;;  %v4121_v6 = vld [vmem:[%s7465_s1 + $0xdc] sm:$0xf0] }
 0x140   : > { %v5686_v44 = vpop.permute.xlu0 %4589  ;;  %540 = vmatmul.bf16.gmra.mxu0 %v3791_v58  ;;  %593 = vmatmul.bf16.gmra.mxu1 %v3807_v29  ;;  %v4597_v13 = vunpack.i.h.bf16 %v5684_v63  ;;  %v4596_v3 = vunpack.i.l.bf16 %v5684_v63  ;;  %v4843_v63 = vpack.i.bf16 %v4884_v19, %v4883_v25  ;;  %v4126_v29 = vld [vmem:[%s7465_s1 + $0x24] sm:$0xf0] }
 0x141   : > { %957 = vmatpush.bf16.msra.mxu3 %v910_v28  ;;  %v1092_v28 = vsel %vm326_vm0, %v4562_v36, %v4602_v56  ;;  %v4592_v26 = vunpack.i.h.bf16 %v5686_v44  ;;  %v4591_v41 = vunpack.i.l.bf16 %v5686_v44  ;;  %v4552_v44 = vunpack.i.h.bf16 %v5605_v18  ;;  %v4127_v25 = vld [vmem:[%s7465_s1 + $0x64] sm:$0xf0] }
 0x144   : > { %4824 = vrot.lane.b32.xlu2 %v4823_v46, %s7478_s23  ;;  %v4882_v46 = vld [vmem:[%s5083_s9 + $0x98] sm:$0xff] }
 0x145   : > { %4819 = vrot.lane.b32.xlu1 %v4818_v40, %s7480_s7  ;;  %v4848_v24 = vpack.i.bf16 %v4882_v46, %v4881_v31  ;;  %v4556_v40 = vunpack.i.l.bf16 %v5553_v38  ;;  %v4124_v38 = vld [vmem:[%s7465_s1 + $0xa0] sm:$0xf0] }
 0x146   : > { %4814 = vrot.lane.b32.xlu0 %v4813_v39, %s7478_s23  ;;  %v5704_v55 = vpop.permute.xlu2 %4659  ;;  %v1103_v39 = vpack.c.bf16 %v1092_v28, %v1091_v14  ;;  %v4130_v28 = vld [vmem:[%s7465_s1 + $0x28] sm:$0xf0] }
 0x147   : > { %v4610_v59 = vpop.permute.xlu1 %4609  ;;  %v1089_v58 = vsel %vm326_vm0, %v4556_v40, %v4596_v3  ;;  %v3814_v3 = vld [vmem:[%s7465_s1 + $0xc0] sm:$0xf]  ;;  %v3822_v40 = vld [vmem:[%s7465_s1 + $0x48] sm:$0xf] }
 0x148   : > { %v4612_v45 = vunpack.i.h.bf16 %v4610_v59  ;;  %v4611_v33 = vunpack.i.l.bf16 %v4610_v59  ;;  %v4605_v43 = vpop.permute.xlu0 %4604  ;;  %v3794_v59 = vld [vmem:[%s7465_s1 + $0x84] sm:$0xf]  ;;  %v3815_v23 = vor.u32 %v4121_v6, %v3814_v3  ;;  %v3823_v19 = vor.u32 %v4127_v25, %v3822_v40  ;;  %v3854_v6 = vld [vmem:[%s7465_s1 + $0x50] sm:$0xf] }
 0x149   : > { %v4607_v34 = vunpack.i.h.bf16 %v4605_v43  ;;  %v4606_v49 = vunpack.i.l.bf16 %v4605_v43  ;;  %v4586_v43 = vunpack.i.l.bf16 %v5583_v42 }
 0x14a   : > { %v1095_v10 = vsel %vm326_vm0, %v4571_v32, %v4611_v33  ;;  %v1096_v4 = vsel %vm326_vm0, %v4572_v2, %v4612_v45  ;;  %v1090_v2 = vsel %vm326_vm0, %v4557_v57, %v4597_v13  ;;  %v3795_v32 = vor.u32 %v4124_v38, %v3794_v59 }
 0x14b   : > { %v1105_v12 = vpack.c.bf16 %v1096_v4, %v1095_v10  ;;  %v1093_v37 = vsel %vm326_vm0, %v4566_v30, %v4606_v49  ;;  %v1094_v53 = vsel %vm326_vm0, %v4567_v8, %v4607_v34  ;;  %v4551_v45 = vunpack.i.l.bf16 %v5605_v18 }
 0x14c   : > { %4839 = vrot.lane.b32.xlu2 %v4838_v62, %s7478_s23  ;;  %v1104_v21 = vpack.c.bf16 %v1094_v53, %v1093_v37  ;;  %v4587_v33 = vunpack.i.h.bf16 %v5583_v42  ;;  %v1102_v61 = vpack.c.bf16 %v1090_v2, %v1089_v58  ;;  %v4547_v62 = vunpack.i.h.bf16 %v5608_v51  ;;  %v4120_v42 = vld [vmem:[%s7465_s1 + $0x9c] sm:$0xf0]  ;;  %v4125_v37 = vld [vmem:[%s7465_s1 + $0xe0] sm:$0xf0] }
 0x14d   : > { %4834 = vrot.lane.b32.xlu1 %v4833_v7, %s7478_s23  ;;  %1140 = vmatpush.bf16.msrb.mxu0 %v1105_v12  ;;  %v4546_v34 = vunpack.i.l.bf16 %v5608_v51  ;;  %v1087_v1 = vsel %vm326_vm0, %v4551_v45, %v4591_v41  ;;  %v1088_v18 = vsel %vm326_vm0, %v4552_v44, %v4592_v26  ;;  %v3811_v27 = vor.u32 %v4120_v42, %v3810_v0  ;;  %v3838_v0 = vld [vmem:[%s7465_s1 + $0x4c] sm:$0xf] }
 0x14e   : > { %4829 = vrot.lane.b32.xlu0 %v4828_v17, %s7480_s7  ;;  %v5742_v50 = vpop.permute.xlu2 %4674  ;;  %v1101_v35 = vpack.c.bf16 %v1088_v18, %v1087_v1  ;;  %v4582_v51 = vunpack.i.h.bf16 %v5656_v54  ;;  %v4581_v17 = vunpack.i.l.bf16 %v5656_v54  ;;  %v1086_v30 = vsel %vm326_vm0, %v4547_v62, %v4587_v33  ;;  %v3818_v54 = vld [vmem:[%s7465_s1 + $0x8] sm:$0xf]  ;;  %v4131_v42 = vld [vmem:[%s7465_s1 + $0x68] sm:$0xf0]  ;;  %s7521_s7 = smov 124  }
 0x14f   : > { %v5732_v15 = vpop.permute.xlu1 %4624  ;;  %v1085_v8 = vsel %vm326_vm0, %v4546_v34, %v4586_v43  ;;  %v4542_v10 = vunpack.i.h.bf16 %v5529_v20  ;;  %v4541_v4 = vunpack.i.l.bf16 %v5529_v20  ;;  %v3819_v36 = vor.u32 %v4126_v29, %v3818_v54  ;;  %v3798_v20 = vld [vmem:[%s7465_s1 + $0xc4] sm:$0xf] }
 0x150   : > { %v5737_v22 = vpop.permute.xlu0 %4619  ;;  %545 = vmatmul.bf16.gmra.mxu0 %v3795_v32  ;;  %v1100_v48 = vpack.c.bf16 %v1086_v30, %v1085_v8  ;;  %598 = vmatmul.bf16.gmra.mxu1 %v3811_v27  ;;  %v4646_v8 = vunpack.i.l.bf16 %v5682_v52 }
 0x151   : > { %1141 = vmatpush.bf16.msrb.mxu0 %v1104_v21  ;;  %v1083_v11 = vsel %vm326_vm0, %v4541_v4, %v4581_v17  ;;  %v1084_v12 = vsel %vm326_vm0, %v4542_v10, %v4582_v51  ;;  %769 = vmatmul.bf16.vlgmr.msra.gmra.mxu2 %v3819_v36  ;;  %v3799_v21 = vor.u32 %v4125_v37, %v3798_v20  ;;  %v4647_v17 = vunpack.i.h.bf16 %v5682_v52  ;;  %v4128_v52 = vld [vmem:[%s7465_s1 + $0xa4] sm:$0xf0] }
 0x152   : > { %v1099_v56 = vpack.c.bf16 %v1084_v12, %v1083_v11  ;;  %v3839_v51 = vor.u32 %v4131_v42, %v3838_v0  ;;  %v3826_v12 = vld [vmem:[%s7465_s1 + $0x88] sm:$0xf]  ;;  %v4677_v20 = vunpack.i.h.bf16 %v5742_v50  ;;  %v4676_v37 = vunpack.i.l.bf16 %v5742_v50 }
 0x153   : > { %v3827_v54 = vor.u32 %v4128_v52, %v3826_v12  ;;  %v4621_v0 = vunpack.i.l.bf16 %v5737_v22 }
 0x154   : > { %4854 = vrot.lane.b32.xlu2 %v4853_v16, %s7478_s23  ;;  %v3834_v16 = vld [vmem:[%s7465_s1 + $0xc] sm:$0xf] }
 0x155   : > { %4849 = vrot.lane.b32.xlu1 %v4848_v24, %s7478_s23  ;;  %1142 = vmatpush.bf16.msrb.mxu0 %v1103_v39  ;;  %v3835_v31 = vor.u32 %v4130_v28, %v3834_v16  ;;  %v4134_v39 = vld [vmem:[%s7465_s1 + $0x2c] sm:$0xf0] }
 0x156   : > { %4844 = vrot.lane.b32.xlu0 %v4843_v63, %s7478_s23  ;;  %v5781_v7 = vpop.permute.xlu2 %4689  ;;  %v3850_v63 = vld [vmem:[%s7465_s1 + $0x10] sm:$0xf]  ;;  %s7522_s23 = smov 61  }
 0x157   : > { %v5767_v60 = vpop.permute.xlu1 %4639  ;;  %958 = vmatmul.bf16.vlgmr.msra.gmra.mxu3 %v3835_v31  ;;  %v3851_v26 = vor.u32 %v4134_v39, %v3850_v63  ;;  %v4692_v58 = vunpack.i.h.bf16 %v5781_v7  ;;  %v4691_v2 = vunpack.i.l.bf16 %v5781_v7  ;;  %v4632_v63 = vunpack.i.h.bf16 %v5653_v47 }
 0x158   : > { %v5771_v49 = vpop.permute.xlu0 %4634  ;;  %v4642_v29 = vunpack.i.h.bf16 %v5767_v60  ;;  %v4631_v39 = vunpack.i.l.bf16 %v5653_v47 }
 0x159   : > { %1143 = vmatpush.bf16.msrb.mxu0 %v1102_v61  ;;  %v4636_v16 = vunpack.i.l.bf16 %v5771_v49 }
 0x15d   : > { %1144 = vmatpush.bf16.msrb.mxu0 %v1101_v35 }
 0x15e   : > { %v5803_v53 = vpop.permute.xlu2 %4704 }
 0x15f   : > { %v4655_v5 = vpop.permute.xlu1 %4654 }
 0x160   : > { %v4650_v9 = vpop.permute.xlu0 %4649  ;;  %550 = vmatmul.bf16.gmra.mxu0 %v3799_v21  ;;  %603 = vmatmul.bf16.gmra.mxu1 %v3815_v23  ;;  %v4657_v59 = vunpack.i.h.bf16 %v4655_v5  ;;  %v4656_v44 = vunpack.i.l.bf16 %v4655_v5  ;;  %v4637_v21 = vunpack.i.h.bf16 %v5771_v49  ;;  %v4135_v23 = vld [vmem:[%s7465_s1 + $0x6c] sm:$0xf0] }
 0x161   : > { %1145 = vmatpush.bf16.msrb.mxu0 %v1100_v48  ;;  %774 = vmatmul.bf16.gmra.mxu2 %v3823_v19  ;;  %v4651_v38 = vunpack.i.l.bf16 %v4650_v9  ;;  %v4652_v45 = vunpack.i.h.bf16 %v4650_v9  ;;  %v3855_v31 = vor.u32 %v4135_v23, %v3854_v6  ;;  %v1278_v19 = vsel %vm326_vm0, %v4636_v16, %v4676_v37 }
 0x162   : > { %v1279_v49 = vsel %vm326_vm0, %v4637_v21, %v4677_v20 }
 0x163   : > { %v1284_v18 = vsel %vm326_vm0, %v4651_v38, %v4691_v2  ;;  %v1285_v27 = vsel %vm326_vm0, %v4652_v45, %v4692_v58  ;;  %v1291_v58 = vpack.c.bf16 %v1279_v49, %v1278_v19  ;;  %v3842_v2 = vld [vmem:[%s7465_s1 + $0x8c] sm:$0xf]  ;;  %v4627_v45 = vunpack.i.h.bf16 %v5732_v15 }
 0x164   : > { %v1294_v4 = vpack.c.bf16 %v1285_v27, %v1284_v18  ;;  %v4622_v18 = vunpack.i.h.bf16 %v5737_v22  ;;  %v4136_v22 = vld [vmem:[%s7465_s1 + $0xac] sm:$0xf0] }
 0x165   : > { %1146 = vmatpush.bf16.msrb.mxu0 %v1099_v56  ;;  %v4641_v56 = vunpack.i.l.bf16 %v5767_v60 }
 0x166   : > { %v5821_v46 = vpop.permute.xlu2 %4719 }
 0x167   : > { %v5805_v14 = vpop.permute.xlu1 %4669  ;;  %963 = vmatmul.bf16.gmra.mxu3 %v3839_v51  ;;  %v3858_v51 = vld [vmem:[%s7465_s1 + $0x90] sm:$0xf] }
 0x168   : > { %v5807_v13 = vpop.permute.xlu0 %4664  ;;  %v4672_v40 = vunpack.i.h.bf16 %v5805_v14  ;;  %v4671_v25 = vunpack.i.l.bf16 %v5805_v14  ;;  %v4132_v14 = vld [vmem:[%s7465_s1 + $0xa8] sm:$0xf0] }
 0x169   : > { %v3843_v47 = vor.u32 %v4132_v14, %v3842_v2  ;;  %v4137_v14 = vld [vmem:[%s7465_s1 + $0xec] sm:$0xf0] }
 0x16e   : > { %v5839_v33 = vpop.permute.xlu2 %4734 }
 0x16f   : > { %v4685_v24 = vpop.permute.xlu1 %4684  ;;  %v4737_v21 = vunpack.i.h.bf16 %v5839_v33 }
 0x170   : > { %v4680_v57 = vpop.permute.xlu0 %4679  ;;  %1147 = vmatmul.bf16.vlgmr.msrb.gmra.mxu0 %v3851_v26  ;;  %v4687_v7 = vunpack.i.h.bf16 %v4685_v24  ;;  %v4686_v35 = vunpack.i.l.bf16 %v4685_v24  ;;  %v4667_v26 = vunpack.i.h.bf16 %v5807_v13 }
 0x171   : > { %v4682_v5 = vunpack.i.h.bf16 %v4680_v57  ;;  %v4681_v48 = vunpack.i.l.bf16 %v4680_v57  ;;  %779 = vmatmul.bf16.gmra.mxu2 %v3827_v54 }
 0x172   : > { %v1282_v9 = vsel %vm326_vm0, %v4646_v8, %v4686_v35  ;;  %v1283_v11 = vsel %vm326_vm0, %v4647_v17, %v4687_v7  ;;  %v1275_v7 = vsel %vm326_vm0, %v4627_v45, %v4667_v26  ;;  %v4129_v35 = vld [vmem:[%s7465_s1 + $0xe4] sm:$0xf0] }
 0x173   : > { %v1293_v3 = vpack.c.bf16 %v1283_v11, %v1282_v9  ;;  %v1280_v60 = vsel %vm326_vm0, %v4641_v56, %v4681_v48  ;;  %v1281_v28 = vsel %vm326_vm0, %v4642_v29, %v4682_v5  ;;  %v3866_v5 = vld [vmem:[%s7465_s1 + $0x14] sm:$0xf]  ;;  %v3846_v29 = vld [vmem:[%s7465_s1 + $0xcc] sm:$0xf] }
 0x174   : > { %v1292_v57 = vpack.c.bf16 %v1281_v28, %v1280_v60  ;;  %v4138_v48 = vld [vmem:[%s7465_s1 + $0x30] sm:$0xf0]  ;;  %v4133_v56 = vld [vmem:[%s7465_s1 + $0xe8] sm:$0xf0] }
 0x175   : > { %v3867_v54 = vor.u32 %v4138_v48, %v3866_v5  ;;  %v3847_v20 = vor.u32 %v4133_v56, %v3846_v29 }
 0x176   : > { %v5867_v36 = vpop.permute.xlu2 %4749 }
 0x177   : > { %v5835_v41 = vpop.permute.xlu1 %4699  ;;  %968 = vmatmul.bf16.gmra.mxu3 %v3843_v47 }
 0x178   : > { %v4695_v32 = vpop.permute.xlu0 %4694 }
 0x179   : > { %v4697_v43 = vunpack.i.h.bf16 %v4695_v32  ;;  %v4696_v61 = vunpack.i.l.bf16 %v4695_v32  ;;  %v1276_v32 = vsel %vm326_vm0, %v4631_v39, %v4671_v25 }
 0x17b   : > { %v1286_v62 = vsel %vm326_vm0, %v4656_v44, %v4696_v61  ;;  %v1287_v34 = vsel %vm326_vm0, %v4657_v59, %v4697_v43  ;;  %v4666_v59 = vunpack.i.l.bf16 %v5807_v13  ;;  %v1277_v44 = vsel %vm326_vm0, %v4632_v63, %v4672_v40 }
 0x17c   : > { %v1295_v1 = vpack.c.bf16 %v1287_v34, %v1286_v62  ;;  %v4626_v43 = vunpack.i.l.bf16 %v5732_v15  ;;  %v4662_v62 = vunpack.i.h.bf16 %v5704_v55  ;;  %v4661_v34 = vunpack.i.l.bf16 %v5704_v55  ;;  %v3830_v15 = vld [vmem:[%s7465_s1 + $0xc8] sm:$0xf] }
 0x17d   : > { %v3831_v55 = vor.u32 %v4129_v35, %v3830_v15 }
 0x17e   : > { %1328 = vmatpush.bf16.msrb.mxu1 %v1295_v1  ;;  %v5899_v38 = vpop.permute.xlu2 %4764  ;;  %v1290_v1 = vpack.c.bf16 %v1277_v44, %v1276_v32  ;;  %v1274_v42 = vsel %vm326_vm0, %v4626_v43, %v4666_v59  ;;  %v1272_v17 = vsel %vm326_vm0, %v4621_v0, %v4661_v34  ;;  %v1273_v8 = vsel %vm326_vm0, %v4622_v18, %v4662_v62 }
 0x17f   : > { %v5853_v30 = vpop.permute.xlu1 %4714  ;;  %v1289_v27 = vpack.c.bf16 %v1275_v7, %v1274_v42  ;;  %v1288_v52 = vpack.c.bf16 %v1273_v8, %v1272_v17  ;;  %v4767_v49 = vunpack.i.h.bf16 %v5899_v38  ;;  %v4766_v63 = vunpack.i.l.bf16 %v5899_v38  ;;  %v3870_v38 = vld [vmem:[%s7465_s1 + $0x54] sm:$0xf] }
 0x180   : > { %v5855_v10 = vpop.permute.xlu0 %4709  ;;  %1152 = vmatmul.bf16.gmra.mxu0 %v3855_v31  ;;  %v4722_v18 = vunpack.i.h.bf16 %v5821_v46  ;;  %v4721_v0 = vunpack.i.l.bf16 %v5821_v46  ;;  %v4717_v17 = vunpack.i.h.bf16 %v5853_v30  ;;  %v4716_v46 = vunpack.i.l.bf16 %v5853_v30 }
 0x181   : > { %784 = vmatmul.bf16.gmra.mxu2 %v3831_v55  ;;  %v4712_v8 = vunpack.i.h.bf16 %v5855_v10 }
 0x182   : > { %1329 = vmatpush.bf16.msrb.mxu1 %v1294_v4  ;;  %v3859_v4 = vor.u32 %v4136_v22, %v3858_v51  ;;  %v4752_v51 = vunpack.i.h.bf16 %v5867_v36  ;;  %v4751_v22 = vunpack.i.l.bf16 %v5867_v36 }
 0x186   : > { %1330 = vmatpush.bf16.msrb.mxu1 %v1293_v3  ;;  %v5935_v9 = vpop.permute.xlu2 %4779  ;;  %v4736_v3 = vunpack.i.l.bf16 %v5839_v33 }
 0x187   : > { %v5881_v50 = vpop.permute.xlu1 %4729  ;;  %973 = vmatmul.bf16.gmra.mxu3 %v3847_v20 }
 0x188   : > { %v5883_v24 = vpop.permute.xlu0 %4724  ;;  %v4731_v40 = vunpack.i.l.bf16 %v5881_v50 }
 0x189   : > { %v4727_v39 = vunpack.i.h.bf16 %v5883_v24  ;;  %v4726_v26 = vunpack.i.l.bf16 %v5883_v24  ;;  %v4139_v24 = vld [vmem:[%s7465_s1 + $0x70] sm:$0xf0] }
 0x18a   : > { %1331 = vmatpush.bf16.msrb.mxu1 %v1292_v57  ;;  %v4732_v57 = vunpack.i.h.bf16 %v5881_v50  ;;  %v3862_v50 = vld [vmem:[%s7465_s1 + $0xd0] sm:$0xf] }
 0x18b   : > { %v3863_v59 = vor.u32 %v4137_v14, %v3862_v50  ;;  %v1471_v62 = vsel %vm326_vm0, %v4726_v26, %v4766_v63  ;;  %v1472_v34 = vsel %vm326_vm0, %v4727_v39, %v4767_v49 }
 0x18c   : > { %v1482_v7 = vpack.c.bf16 %v1472_v34, %v1471_v62 }
 0x18e   : > { %1332 = vmatpush.bf16.msrb.mxu1 %v1291_v58  ;;  %v5947_v60 = vpop.permute.xlu2 %4794 }
 0x18f   : > { %v5905_v61 = vpop.permute.xlu1 %4744 }
 0x190   : > { %v5909_v13 = vpop.permute.xlu0 %4739  ;;  %1157 = vmatmul.bf16.gmra.mxu0 %v3859_v4  ;;  %v4711_v4 = vunpack.i.l.bf16 %v5855_v10  ;;  %v4747_v20 = vunpack.i.h.bf16 %v5905_v61  ;;  %v4746_v10 = vunpack.i.l.bf16 %v5905_v61  ;;  %v4140_v61 = vld [vmem:[%s7465_s1 + $0xb0] sm:$0xf0] }
 0x191   : > { %v4741_v49 = vunpack.i.l.bf16 %v5909_v13 }
 0x192   : > { %1333 = vmatpush.bf16.msrb.mxu1 %v1290_v1  ;;  %v3871_v1 = vor.u32 %v4139_v24, %v3870_v38  ;;  %v1465_v30 = vsel %vm326_vm0, %v4711_v4, %v4751_v22  ;;  %v4796_v22 = vunpack.i.l.bf16 %v5947_v60 }
 0x196   : > { %1334 = vmatpush.bf16.msrb.mxu1 %v1289_v27  ;;  %v5979_v42 = vpop.permute.xlu2 %4809 }
 0x197   : > { %v4760_v11 = vpop.permute.xlu1 %4759  ;;  %v4812_v63 = vunpack.i.h.bf16 %v5979_v42  ;;  %v4811_v26 = vunpack.i.l.bf16 %v5979_v42 }
 0x198   : > { %v5937_v12 = vpop.permute.xlu0 %4754  ;;  %v4762_v47 = vunpack.i.h.bf16 %v4760_v11  ;;  %v4761_v45 = vunpack.i.l.bf16 %v4760_v11 }
 0x199   : > { %v4757_v15 = vunpack.i.h.bf16 %v5937_v12  ;;  %v4756_v35 = vunpack.i.l.bf16 %v5937_v12 }
 0x19a   : > { %1335 = vmatpush.bf16.msrb.mxu1 %v1288_v52  ;;  %v1469_v55 = vsel %vm326_vm0, %v4721_v0, %v4761_v45  ;;  %v1470_v27 = vsel %vm326_vm0, %v4722_v18, %v4762_v47  ;;  %v4701_v47 = vunpack.i.l.bf16 %v5835_v41 }
 0x19b   : > { %v1481_v48 = vpack.c.bf16 %v1470_v27, %v1469_v55  ;;  %v1468_v29 = vsel %vm326_vm0, %v4717_v17, %v4757_v15  ;;  %v4142_v55 = vld [vmem:[%s7465_s1 + $0x34] sm:$0xf0] }
 0x19c   : > { %v1461_v18 = vsel %vm326_vm0, %v4701_v47, %v4741_v49  ;;  %v4143_v47 = vld [vmem:[%s7465_s1 + $0x74] sm:$0xf0] }
 0x19d   : > { %1336 = vmatmul.bf16.vlgmr.msrb.gmra.mxu1 %v3867_v54  ;;  %v1467_v54 = vsel %vm326_vm0, %v4716_v46, %v4756_v35 }
 0x19f   : > { %v4775_v37 = vpop.permute.xlu1 %4774 }
 0x1a0   : > { %v4777_v6 = vunpack.i.h.bf16 %v4775_v37  ;;  %v4776_v23 = vunpack.i.l.bf16 %v4775_v37  ;;  %v4770_v16 = vpop.permute.xlu0 %4769  ;;  %1162 = vmatmul.bf16.gmra.mxu0 %v3863_v59  ;;  %v1466_v37 = vsel %vm326_vm0, %v4712_v8, %v4752_v51  ;;  %v4797_v51 = vunpack.i.h.bf16 %v5947_v60  ;;  %v1744_v60 = vld [vmem:[%s7467_s3 + $0x8] sm:$0xff] }
 0x1a1   : > { %v4772_v28 = vunpack.i.h.bf16 %v4770_v16  ;;  %v4771_v31 = vunpack.i.l.bf16 %v4770_v16 }
 0x1a2   : > { %v1475_v25 = vsel %vm326_vm0, %v4736_v3, %v4776_v23  ;;  %v1476_v19 = vsel %vm326_vm0, %v4737_v21, %v4777_v6  ;;  %v1480_v21 = vpack.c.bf16 %v1468_v29, %v1467_v54 }
 0x1a3   : > { %v1484_v33 = vpack.c.bf16 %v1476_v19, %v1475_v25  ;;  %v1473_v58 = vsel %vm326_vm0, %v4731_v40, %v4771_v31  ;;  %v1474_v2 = vsel %vm326_vm0, %v4732_v57, %v4772_v28  ;;  %v4707_v28 = vunpack.i.h.bf16 %v5803_v53  ;;  %v4825_v57 = vpop.permute.xlu2 %4824  ;;  %v3874_v40 = vld [vmem:[%s7465_s1 + $0x94] sm:$0xf] }
 0x1a4   : > { %v1483_v44 = vpack.c.bf16 %v1474_v2, %v1473_v58  ;;  %v4706_v31 = vunpack.i.l.bf16 %v5803_v53  ;;  %v4742_v25 = vunpack.i.h.bf16 %v5909_v13  ;;  %v1479_v19 = vpack.c.bf16 %v1466_v37, %v1465_v30 }
 0x1a5   : > { %1517 = vmatpush.bf16.msrb.mxu2 %v1484_v33  ;;  %v1464_v39 = vsel %vm326_vm0, %v4707_v28, %v4747_v20  ;;  %v4827_v58 = vunpack.i.h.bf16 %v4825_v57  ;;  %v4826_v2 = vunpack.i.l.bf16 %v4825_v57  ;;  %v3875_v14 = vor.u32 %v4140_v61, %v3874_v40 }
 0x1a6   : > { %v1463_v53 = vsel %vm326_vm0, %v4706_v31, %v4746_v10  ;;  %v4702_v13 = vunpack.i.h.bf16 %v5835_v41  ;;  %v3882_v41 = vld [vmem:[%s7465_s1 + $0x18] sm:$0xf]  ;;  %v4980_v30 = vmov 0  }
 0x1a7   : > { %v5971_v32 = vpop.permute.xlu1 %4789  ;;  %v1478_v45 = vpack.c.bf16 %v1464_v39, %v1463_v53  ;;  %v589_v42 = vpop.f32.mrf.mxu1  ;;  %4858 = vset.pattern.permute.xlu0 %v4980_v30  ;;  %4859 = vset.pattern.permute.xlu1 %v4980_v30  ;;  %v1743_v39 = vld [vmem:[%s7467_s3] sm:$0xff] }
 0x1a8   : > { %v5973_v43 = vpop.permute.xlu0 %4784  ;;  %v1462_v0 = vsel %vm326_vm0, %v4702_v13, %v4742_v25  ;;  %1758 = vperm.xlu1 %4859, %v1744_v60   ;;  %4860 = vset.pattern.permute.xlu2 %v4980_v30  ;;  %v4792_v31 = vunpack.i.h.bf16 %v5971_v32  ;;  %v4791_v57 = vunpack.i.l.bf16 %v5971_v32  ;;  %v1745_v30 = vld [vmem:[%s7467_s3 + $0x10] sm:$0xff] }
 0x1a9   : > { %1518 = vmatpush.bf16.msrb.mxu2 %v1483_v44  ;;  %v1477_v8 = vpack.c.bf16 %v1462_v0, %v1461_v18  ;;  %1753 = vperm.xlu0 %4858, %v1743_v39  }
 0x1aa   : > { %1763 = vperm.xlu2 %4860, %v1745_v30   ;;  %v4158_v30 = vld [vmem:[%s7466_s2 + $0x24] sm:$0xf0] }
 0x1ab   : > { %v4840_v17 = vpop.permute.xlu2 %4839 }
 0x1ac   : > { %v4841_v54 = vunpack.i.l.bf16 %v4840_v17 }
 0x1ad   : > { %1519 = vmatpush.bf16.msrb.mxu2 %v1482_v7  ;;  %1341 = vmatmul.bf16.gmra.mxu1 %v3871_v1  ;;  %v536_v16 = vpop.f32.mrf.mxu0 }
 0x1ae   : > { %v6029_v27 = vadd.f32 %v589_v42, %v536_v16  ;;  %v4141_v16 = vld [vmem:[%s7465_s1 + $0xf0] sm:$0xf0] }
 0x1af   : > { %v4805_v5 = vpop.permute.xlu1 %4804  ;;  %v6038_v10 = vpop.f32.mrf.mxu1 }
 0x1b0   : > { %v4807_v11 = vunpack.i.h.bf16 %v4805_v5  ;;  %v4806_v12 = vunpack.i.l.bf16 %v4805_v5  ;;  %v4800_v52 = vpop.permute.xlu0 %4799 }
 0x1b1   : > { %v4802_v36 = vunpack.i.h.bf16 %v4800_v52  ;;  %v4801_v56 = vunpack.i.l.bf16 %v4800_v52  ;;  %1520 = vmatpush.bf16.msrb.mxu2 %v1481_v48  ;;  %v4842_v52 = vunpack.i.h.bf16 %v4840_v17 }
 0x1b3   : > { %v1664_v3 = vsel %vm326_vm0, %v4801_v56, %v4806_v12  ;;  %v1665_v6 = vsel %vm326_vm0, %v4802_v36, %v4807_v11  ;;  %v3883_v12 = vor.u32 %v4142_v55, %v3882_v41  ;;  %v4146_v41 = vld [vmem:[%s7465_s1 + $0x38] sm:$0xf0]  ;;  %v1749_v55 = vld [vmem:[%s7467_s3 + $0x30] sm:$0xff] }
 0x1b4   : > { %v1673_v23 = vpack.c.bf16 %v1665_v6, %v1664_v3  ;;  %v1656_v3 = vsel %vm326_vm0, %v4796_v22, %v4841_v54  ;;  %v1657_v6 = vsel %vm326_vm0, %v4797_v51, %v4842_v52  ;;  %v4147_v52 = vld [vmem:[%s7465_s1 + $0x78] sm:$0xf0] }
 0x1b5   : > { %1521 = vmatpush.bf16.msrb.mxu2 %v1480_v21  ;;  %v6019_v7 = vpop.f32.mrf.mxu0  ;;  %v1669_v61 = vpack.c.bf16 %v1657_v6, %v1656_v3  ;;  %v4145_v3 = vld [vmem:[%s7465_s1 + $0xf4] sm:$0xf0] }
 0x1b6   : > { %1706 = vmatpush.bf16.msrb.mxu3 %v1673_v23  ;;  %v3878_v23 = vld [vmem:[%s7465_s1 + $0xd4] sm:$0xf] }
 0x1b7   : > { %v4820_v33 = vpop.permute.xlu1 %4819  ;;  %v3879_v25 = vor.u32 %v4141_v16, %v3878_v23 }
 0x1b8   : > { %v4815_v50 = vpop.permute.xlu0 %4814  ;;  %v4822_v59 = vunpack.i.h.bf16 %v4820_v33  ;;  %v4821_v38 = vunpack.i.l.bf16 %v4820_v33 }
 0x1b9   : > { %v4817_v24 = vunpack.i.h.bf16 %v4815_v50  ;;  %v4816_v44 = vunpack.i.l.bf16 %v4815_v50  ;;  %1522 = vmatpush.bf16.msrb.mxu2 %v1479_v19  ;;  %v4855_v19 = vpop.permute.xlu2 %4854  ;;  %v1746_v50 = vld [vmem:[%s7467_s3 + $0x18] sm:$0xff] }
 0x1ba   : > { %v1660_v15 = vsel %vm326_vm0, %v4821_v38, %v4826_v2  ;;  %v1661_v35 = vsel %vm326_vm0, %v4822_v59, %v4827_v58  ;;  %v4786_v58 = vunpack.i.l.bf16 %v5973_v43  ;;  %1768 = vperm.xlu1 %4859, %v1746_v50  }
 0x1bb   : > { %v1662_v62 = vsel %vm326_vm0, %v4811_v26, %v4816_v44  ;;  %v1663_v34 = vsel %vm326_vm0, %v4812_v63, %v4817_v24  ;;  %v1671_v11 = vpack.c.bf16 %v1661_v35, %v1660_v15  ;;  %v4787_v26 = vunpack.i.h.bf16 %v5973_v43  ;;  %v3886_v43 = vld [vmem:[%s7465_s1 + $0x58] sm:$0xf]  ;;  %v3898_v35 = vld [vmem:[%s7465_s1 + $0x1c] sm:$0xf] }
 0x1bc   : > { %v1672_v1 = vpack.c.bf16 %v1663_v34, %v1662_v62  ;;  %v4856_v24 = vunpack.i.l.bf16 %v4855_v19  ;;  %v4782_v34 = vunpack.i.h.bf16 %v5935_v9  ;;  %v3887_v0 = vor.u32 %v4143_v47, %v3886_v43 }
 0x1bd   : > { %1523 = vmatpush.bf16.msrb.mxu2 %v1478_v45  ;;  %1346 = vmatmul.bf16.gmra.mxu1 %v3875_v14  ;;  %v541_v21 = vpop.f32.mrf.mxu0  ;;  %v4857_v14 = vunpack.i.h.bf16 %v4855_v19  ;;  %v594_v38 = vpop.f32.mrf.mxu1  ;;  %v3899_v17 = vor.u32 %v4146_v41, %v3898_v35 }
 0x1be   : > { %1707 = vmatpush.bf16.msrb.mxu3 %v1672_v1  ;;  %v595_v45 = vadd.f32 %v594_v38, %v541_v21  ;;  %v4781_v1 = vunpack.i.l.bf16 %v5935_v9  ;;  %v1748_v9 = vld [vmem:[%s7467_s3 + $0x28] sm:$0xff]  ;;  %v3894_v21 = vld [vmem:[%s7465_s1 + $0xd8] sm:$0xf] }
 0x1bf   : > { %v4835_v46 = vpop.permute.xlu1 %4834  ;;  %v1651_v15 = vsel %vm326_vm0, %v4782_v34, %v4857_v14  ;;  %1778 = vperm.xlu0 %4858, %v1748_v9   ;;  %v3895_v23 = vor.u32 %v4145_v3, %v3894_v21  ;;  %v1750_v38 = vld [vmem:[%s7467_s3 + $0x38] sm:$0xff]  ;;  %v3922_v34 = vld [vmem:[%s7466_s2 + $0x80] sm:$0xf]  ;;  %v4154_v9 = vld [vmem:[%s7466_s2 + $0x20] sm:$0xf0] }
 0x1c0   : > { %v4837_v4 = vunpack.i.h.bf16 %v4835_v46  ;;  %v4836_v5 = vunpack.i.l.bf16 %v4835_v46  ;;  %v4830_v48 = vpop.permute.xlu0 %4829  ;;  %v1650_v42 = vsel %vm326_vm0, %v4781_v1, %v4856_v24  ;;  %v4152_v1 = vld [vmem:[%s7466_s2 + $0x9c] sm:$0xf0] }
 0x1c1   : > { %v4832_v29 = vunpack.i.h.bf16 %v4830_v48  ;;  %v4831_v36 = vunpack.i.l.bf16 %v4830_v48  ;;  %1524 = vmatpush.bf16.msrb.mxu2 %v1477_v8  ;;  %v1666_v51 = vpack.c.bf16 %v1651_v15, %v1650_v42  ;;  %v4151_v42 = vld [vmem:[%s7466_s2 + $0x5c] sm:$0xf0] }
 0x1c2   : > { %1708 = vmatpush.bf16.msrb.mxu3 %v1671_v11  ;;  %1783 = vperm.xlu1 %4859, %v1749_v55   ;;  %v3938_v55 = vld [vmem:[%s7466_s2 + $0x4] sm:$0xf] }
 0x1c3   : > { %v1658_v56 = vsel %vm326_vm0, %v4831_v36, %v4836_v5  ;;  %v1659_v20 = vsel %vm326_vm0, %v4832_v29, %v4837_v4  ;;  %v3890_v4 = vld [vmem:[%s7465_s1 + $0x98] sm:$0xf] }
 0x1c4   : > { %1525 = vmatmul.bf16.vlgmr.msrb.gmra.mxu2 %v3883_v12  ;;  %v1670_v37 = vpack.c.bf16 %v1659_v20, %v1658_v56  ;;  %v4144_v5 = vld [vmem:[%s7465_s1 + $0xb4] sm:$0xf0]  ;;  %v3902_v12 = vld [vmem:[%s7465_s1 + $0x5c] sm:$0xf] }
 0x1c5   : > { %v6068_v62 = vpop.f32.mrf.mxu0  ;;  %v6086_v22 = vpop.f32.mrf.mxu1  ;;  %v3891_v11 = vor.u32 %v4144_v5, %v3890_v4  ;;  %v3903_v36 = vor.u32 %v4147_v52, %v3902_v12  ;;  %v4150_v4 = vld [vmem:[%s7466_s2 + $0x1c] sm:$0xf0]  ;;  %v3950_v52 = vld [vmem:[%s7466_s2 + $0xc4] sm:$0xf] }
 0x1c6   : > { %1709 = vmatpush.bf16.msrb.mxu3 %v1670_v37 }
 0x1c7   : > { %v4850_v28 = vpop.permute.xlu1 %4849 }
 0x1c8   : > { %v4845_v40 = vpop.permute.xlu0 %4844  ;;  %v4852_v49 = vunpack.i.h.bf16 %v4850_v28  ;;  %v4851_v63 = vunpack.i.l.bf16 %v4850_v28  ;;  %v4148_v28 = vld [vmem:[%s7465_s1 + $0xb8] sm:$0xf0] }
 0x1c9   : > { %v4847_v33 = vunpack.i.h.bf16 %v4845_v40  ;;  %v4846_v53 = vunpack.i.l.bf16 %v4845_v40 }
 0x1ca   : > { %1710 = vmatpush.bf16.msrb.mxu3 %v1669_v61  ;;  %v1652_v44 = vsel %vm326_vm0, %v4786_v58, %v4851_v63  ;;  %v1653_v13 = vsel %vm326_vm0, %v4787_v26, %v4852_v49  ;;  %v1747_v49 = vld [vmem:[%s7467_s3 + $0x20] sm:$0xff] }
 0x1cb   : > { %v1654_v32 = vsel %vm326_vm0, %v4791_v57, %v4846_v53  ;;  %v1655_v2 = vsel %vm326_vm0, %v4792_v31, %v4847_v33  ;;  %v1667_v18 = vpack.c.bf16 %v1653_v13, %v1652_v44  ;;  %1773 = vperm.xlu2 %4860, %v1747_v49   ;;  %v3910_v33 = vld [vmem:[%s7465_s1 + $0xdc] sm:$0xf] }
 0x1cc   : > { %v1668_v59 = vpack.c.bf16 %v1655_v2, %v1654_v32  ;;  %v4149_v53 = vld [vmem:[%s7465_s1 + $0xf8] sm:$0xf0] }
 0x1cd   : > { %1351 = vmatmul.bf16.gmra.mxu1 %v3879_v25  ;;  %v546_v46 = vpop.f32.mrf.mxu0  ;;  %v599_v8 = vpop.f32.mrf.mxu1  ;;  %v3911_v58 = vor.u32 %v4149_v53, %v3910_v33 }
 0x1ce   : > { %1711 = vmatpush.bf16.msrb.mxu3 %v1668_v59  ;;  %v600_v48 = vadd.f32 %v599_v8, %v546_v46  ;;  %v4156_v46 = vld [vmem:[%s7466_s2 + $0xa0] sm:$0xf0]  ;;  %v3914_v8 = vld [vmem:[%s7466_s2] sm:$0xf] }
 0x1d2   : > { %1712 = vmatpush.bf16.msrb.mxu3 %v1667_v18  ;;  %v3918_v18 = vld [vmem:[%s7466_s2 + $0x40] sm:$0xf] }
 0x1d3   : > { %1788 = vperm.xlu2 %4860, %v1750_v38   ;;  %v6166_v15 = vor.u32 %v4151_v42, %v3918_v18 }
 0x1d4   : > { %1530 = vmatmul.bf16.gmra.mxu2 %v3887_v0  ;;  %v770_v56 = vpop.f32.mrf.mxu2  ;;  %v6161_v0 = vor.u32 %v4152_v1, %v3922_v34 }
 0x1d5   : > { %v6100_v54 = vpop.f32.mrf.mxu0  ;;  %v6102_v29 = vpop.f32.mrf.mxu1  ;;  %v790_v20 = vadd.f32 %v770_v56, %v6029_v27  ;;  %v3906_v27 = vld [vmem:[%s7465_s1 + $0x9c] sm:$0xf]  ;;  %1968 = vrot.lane.b32.xlu0 %v6166_v15, %s4965_s10  ;;  %v3962_v56 = vld [vmem:[%s7466_s2 + $0x8] sm:$0xf] }
 0x1d6   : > { %1713 = vmatpush.bf16.msrb.mxu3 %v1666_v51  ;;  %v3907_v40 = vor.u32 %v4148_v28, %v3906_v27  ;;  %1970 = vrot.lane.b32.xlu1 %v6161_v0, %s4965_s10  ;;  %v3946_v51 = vld [vmem:[%s7466_s2 + $0x84] sm:$0xf]  ;;  %v6228_v3 = vor.u32 %v4158_v30, %v3962_v56 }
 0x1d7   : > { %v3942_v27 = vld [vmem:[%s7466_s2 + $0x44] sm:$0xf] }
 0x1d8   : > { %7506 = vst [vmem:[#allocation7_spill] sm:$0xff] %v6228_v3  ;;  %v4155_v28 = vld [vmem:[%s7466_s2 + $0x60] sm:$0xf0] }
 0x1d9   : > { %1714 = vmatmul.bf16.vlgmr.msrb.gmra.mxu3 %v3899_v17  ;;  %v6185_v17 = vor.u32 %v4154_v9, %v3938_v55 }
 0x1da   : > { %v959_v31 = vpop.f32.mrf.mxu3 }
 0x1db   : > { %v6122_v57 = vadd.f32 %v959_v31, %v790_v20  ;;  %v6244_v31 = vor.u32 %v4155_v28, %v3942_v27 }
 0x1dc   : > { %v6114_v16 = vpop.f32.mrf.mxu2 }
 0x1dd   : > { %v551_v60 = vpop.f32.mrf.mxu0  ;;  %v604_v37 = vpop.f32.mrf.mxu1  ;;  %7507 = vst [vmem:[#allocation8_spill] sm:$0xff] %v6244_v31 }
 0x1de   : > { %v605_v6 = vadd.f32 %v604_v37, %v551_v60  ;;  %2197 = vrot.lane.b32.xlu1 %v6185_v17, %s4965_s10  ;;  %v3926_v60 = vld [vmem:[%s7466_s2 + $0xc0] sm:$0xf] }
 0x1df   : > { %v4153_v37 = vld [vmem:[%s7466_s2 + $0xdc] sm:$0xf0] }
 0x1e2   : > { %v6124_v19 = vpop.f32.mrf.mxu3 }
 0x1e4   : > { %1535 = vmatmul.bf16.gmra.mxu2 %v3891_v11  ;;  %v775_v61 = vpop.f32.mrf.mxu2  ;;  %v6200_v11 = vor.u32 %v4150_v4, %v3914_v8 }
 0x1e5   : > { %v792_v25 = vadd.f32 %v775_v61, %v595_v45  ;;  %v6172_v35 = vpop.f32.mrf.mxu0  ;;  %v6174_v41 = vpop.f32.mrf.mxu1 }
 0x1e6   : > { %1966 = vrot.lane.b32.xlu2 %v6200_v11, %s4965_s10 }
 0x1e9   : > { %1719 = vmatmul.bf16.gmra.mxu3 %v3903_v36  ;;  %v4157_v36 = vld [vmem:[%s7466_s2 + $0xe0] sm:$0xf0] }
 0x1ea   : > { %v964_v39 = vpop.f32.mrf.mxu3  ;;  %v6217_v20 = vor.u32 %v4157_v36, %v3950_v52 }
 0x1eb   : > { %v6137_v26 = vadd.f32 %v964_v39, %v792_v25  ;;  %v592_v25 = vadd.f32 %v6038_v10, %v6019_v7  ;;  %v3970_v39 = vld [vmem:[%s7466_s2 + $0x88] sm:$0xf] }
 0x1ec   : > { %v6129_v63 = vpop.f32.mrf.mxu2  ;;  %7505 = vst [vmem:[#allocation6_spill] sm:$0xff] %v6217_v20  ;;  %2203 = vrot.lane.b32.xlu1 %v6217_v20, %s4965_s10 }
 0x1ed   : > { %v1148_v12 = vpop.f32.mrf.mxu0 }
 0x1ee   : > { %v1168_v53 = vadd.f32 %v1148_v12, %v6122_v57 }
 0x1f2   : > { %v6139_v50 = vpop.f32.mrf.mxu3 }
 0x1f4   : > { %1540 = vmatmul.bf16.gmra.mxu2 %v3895_v23  ;;  %v780_v32 = vpop.f32.mrf.mxu2 }
 0x1f5   : > { %v794_v2 = vadd.f32 %v780_v32, %v600_v48  ;;  %v6198_v48 = vor.u32 %v4156_v46, %v3946_v51  ;;  %v791_v32 = vadd.f32 %v6114_v16, %v592_v25  ;;  %v597_v16 = vadd.f32 %v6086_v22, %v6068_v62 }
 0x1f7   : > { %7504 = vst [vmem:[#allocation5_spill] sm:$0xff] %v6198_v48  ;;  %2201 = vrot.lane.b32.xlu0 %v6198_v48, %s4965_s10  ;;  %v980_v7 = vadd.f32 %v6124_v19, %v791_v32  ;;  %v793_v52 = vadd.f32 %v6129_v63, %v597_v16  ;;  %v4159_v32 = vld [vmem:[%s7466_s2 + $0x64] sm:$0xf0] }
 0x1f9   : > { %1724 = vmatmul.bf16.gmra.mxu3 %v3907_v40  ;;  %v1150_v40 = vpop.f32.mrf.mxu0 }
 0x1fa   : > { %v969_v59 = vpop.f32.mrf.mxu3  ;;  %v1169_v1 = vadd.f32 %v1150_v40, %v980_v7  ;;  %v602_v7 = vadd.f32 %v6102_v29, %v6100_v54 }
 0x1fb   : > { %v6146_v24 = vadd.f32 %v969_v59, %v794_v2 }
 0x1fc   : > { %v6141_v14 = vpop.f32.mrf.mxu2 }
 0x1ff   : > { %2395 = vrot.lane.b32.xlu0 %v6228_v3, %s4965_s10  ;;  %v4166_v3 = vld [vmem:[%s7466_s2 + $0x2c] sm:$0xf0] }
 0x201   : > { %v1153_v38 = vpop.f32.mrf.mxu0 }
 0x202   : > { %v6148_v43 = vpop.f32.mrf.mxu3  ;;  %v1170_v46 = vadd.f32 %v1153_v38, %v6137_v26  ;;  %v4161_v38 = vld [vmem:[%s7466_s2 + $0xe4] sm:$0xf0] }
 0x204   : > { %v785_v44 = vpop.f32.mrf.mxu2 }
 0x205   : > { %v796_v13 = vadd.f32 %v785_v44, %v605_v6  ;;  %v6230_v6 = vor.u32 %v4153_v37, %v3926_v60 }
 0x207   : > { %1972 = vrot.lane.b32.xlu2 %v6230_v6, %s4965_s10 }
 0x209   : > { %1729 = vmatmul.bf16.gmra.mxu3 %v3911_v58  ;;  %v4160_v58 = vld [vmem:[%s7466_s2 + $0xa4] sm:$0xf0]  ;;  %v1155_v9 = vpop.f32.mrf.mxu0 }
 0x20a   : > { %v974_v47 = vpop.f32.mrf.mxu3  ;;  %v6260_v2 = vor.u32 %v4160_v58, %v3970_v39 }
 0x20b   : > { %v6150_v45 = vadd.f32 %v974_v47, %v796_v13 }
 0x20c   : > { %v6196_v5 = vpop.f32.mrf.mxu2  ;;  %7508 = vst [vmem:[#allocation9_spill] sm:$0xff] %v6260_v2 }
 0x20f   : > { %2199 = vrot.lane.b32.xlu2 %v6244_v31, %s4965_s10 }
 0x211   : > { %v1158_v26 = vpop.f32.mrf.mxu0 }
 0x212   : > { %v6250_v33 = vpop.f32.mrf.mxu3 }
 0x217   : > { %2399 = vrot.lane.b32.xlu2 %v6260_v2, %s4965_s10 }
 0x21a   : > { %v1337_v21 = vpop.f32.mrf.mxu1  ;;  %v1759_v12 = vpop.permute.xlu1 %1758 }
 0x21b   : > { %v1357_v59 = vadd.f32 %v1337_v21, %v1168_v53  ;;  %v1754_v34 = vpop.permute.xlu0 %1753  ;;  %v982_v21 = vadd.f32 %v6139_v50, %v793_v52  ;;  %v3966_v50 = vld [vmem:[%s7466_s2 + $0x48] sm:$0xf] }
 0x21d   : > { %v1171_v25 = vadd.f32 %v1155_v9, %v982_v21 }
 0x222   : > { %v1339_v61 = vpop.f32.mrf.mxu1 }
 0x223   : > { %v1358_v18 = vadd.f32 %v1339_v61, %v1169_v1  ;;  %v1764_v61 = vpop.permute.xlu2 %1763 }
 0x22a   : > { %v1342_v57 = vpop.f32.mrf.mxu1 }
 0x22b   : > { %v1359_v30 = vadd.f32 %v1342_v57, %v1170_v46  ;;  %v1172_v57 = vadd.f32 %v1158_v26, %v6146_v24 }
 0x231   : > { %v1779_v26 = vpop.permute.xlu0 %1778 }
 0x232   : > { %v1344_v19 = vpop.f32.mrf.mxu1 }
 0x233   : > { %v1360_v39 = vadd.f32 %v1344_v19, %v1171_v25 }
 0x23a   : > { %v1347_v53 = vpop.f32.mrf.mxu1 }
 0x23b   : > { %v1361_v9 = vadd.f32 %v1347_v53, %v1172_v57 }
 0x242   : > { %v1349_v54 = vpop.f32.mrf.mxu1 }
 0x247   : > { %v1526_v23 = vpop.f32.mrf.mxu2 }
 0x248   : > { %v1546_v10 = vadd.f32 %v1526_v23, %v1357_v59  ;;  %v3974_v59 = vld [vmem:[%s7466_s2 + $0xc8] sm:$0xf] }
 0x249   : > { %v6289_v1 = vor.u32 %v4161_v38, %v3974_v59 }
 0x24b   : > { %7510 = vst [vmem:[#allocation11_spill] sm:$0xff] %v6289_v1 }
 0x24f   : > { %v1528_v49 = vpop.f32.mrf.mxu2 }
 0x250   : > { %v1547_v55 = vadd.f32 %v1528_v49, %v1358_v18  ;;  %v1769_v18 = vpop.permute.xlu1 %1768 }
 0x257   : > { %v1531_v47 = vpop.f32.mrf.mxu2 }
 0x258   : > { %v1548_v23 = vadd.f32 %v1531_v47, %v1359_v30 }
 0x25c   : > { %v1715_v44 = vpop.f32.mrf.mxu3 }
 0x25d   : > { %v1735_v13 = vadd.f32 %v1715_v44, %v1546_v10 }
 0x25f   : > { %v1791_v42 = vadd.f32 %v1754_v34, %v1735_v13  ;;  %v1533_v56 = vpop.f32.mrf.mxu2  ;;  %v6287_v34 = vor.u32 %v4159_v32, %v3966_v50 }
 0x260   : > { %v1549_v10 = vadd.f32 %v1533_v56, %v1360_v39 }
 0x261   : > { %v1799_v8 = vmax.f32 %v1791_v42, 0.0  ;;  %7509 = vst [vmem:[#allocation10_spill] sm:$0xff] %v6287_v34  ;;  %v795_v42 = vadd.f32 %v6141_v14, %v602_v7 }
 0x263   : > { %v1807_v60 = vpack.c.bf16 %v1799_v8, %v1799_v8  ;;  %v984_v29 = vadd.f32 %v6148_v43, %v795_v42  ;;  %v607_v43 = vadd.f32 %v6174_v41, %v6172_v35 }
 0x264   : > { %v1717_v51 = vpop.f32.mrf.mxu3 }
 0x265   : > { %v1736_v4 = vadd.f32 %v1717_v51, %v1547_v55  ;;  %v1823_v27 = vunpack.c.l.b16 %v1807_v60  ;;  %v1160_v55 = vpop.f32.mrf.mxu0  ;;  %v797_v25 = vadd.f32 %v6196_v5, %v607_v43 }
 0x266   : > { %v1173_v56 = vadd.f32 %v1160_v55, %v984_v29 }
 0x267   : > { %v1792_v36 = vadd.f32 %v1759_v12, %v1736_v4  ;;  %v1536_v58 = vpop.f32.mrf.mxu2  ;;  %v986_v50 = vadd.f32 %v6250_v33, %v797_v25 }
 0x268   : > { %v1550_v24 = vadd.f32 %v1536_v58, %v1361_v9  ;;  %v1362_v60 = vadd.f32 %v1349_v54, %v1173_v56 }
 0x269   : > { %v1800_v37 = vmax.f32 %v1792_v36, 0.0  ;;  %v1774_v36 = vpop.permute.xlu2 %1773 }
 0x26b   : > { %v1808_v62 = vpack.c.bf16 %v1800_v37, %v1800_v37 }
 0x26c   : > { %v1720_v22 = vpop.f32.mrf.mxu3 }
 0x26d   : > { %v1824_v28 = vunpack.c.l.b16 %v1808_v62  ;;  %v1737_v40 = vadd.f32 %v1720_v22, %v1548_v23  ;;  %v1163_v21 = vpop.f32.mrf.mxu0  ;;  %v1352_v62 = vpop.f32.mrf.mxu1 }
 0x26f   : > { %v1831_v49 = vpack.c.b16 %v1824_v28, %v1823_v27  ;;  %v1793_v63 = vadd.f32 %v1764_v61, %v1737_v40  ;;  %v1538_v4 = vpop.f32.mrf.mxu2  ;;  %v1174_v27 = vadd.f32 %v1163_v21, %v6150_v45 }
 0x270   : > { %v1551_v23 = vadd.f32 %v1538_v4, %v1362_v60 }
 0x271   : > { %1858 = vrot.lane.b32.xlu1 %v1831_v49, %s4981_s13  ;;  %1835 = vrot.lane.b32.xlu0 %v1831_v49, %s4982_s25  ;;  %v1801_v13 = vmax.f32 %v1793_v63, 0.0  ;;  %v1363_v53 = vadd.f32 %v1352_v62, %v1174_v27  ;;  %v1789_v55 = vpop.permute.xlu2 %1788 }
 0x273   : > { %v1809_v51 = vpack.c.bf16 %v1801_v13, %v1801_v13 }
 0x274   : > { %v1722_v44 = vpop.f32.mrf.mxu3 }
 0x275   : > { %v1738_v47 = vadd.f32 %v1722_v44, %v1549_v10  ;;  %v1825_v12 = vunpack.c.l.b16 %v1809_v51  ;;  %v1165_v35 = vpop.f32.mrf.mxu0  ;;  %v1354_v45 = vpop.f32.mrf.mxu1 }
 0x276   : > { %v1175_v10 = vadd.f32 %v1165_v35, %v986_v50  ;;  %v1784_v44 = vpop.permute.xlu1 %1783 }
 0x277   : > { %v1794_v16 = vadd.f32 %v1769_v18, %v1738_v47  ;;  %v1541_v61 = vpop.f32.mrf.mxu2 }
 0x278   : > { %v1552_v58 = vadd.f32 %v1541_v61, %v1363_v53  ;;  %v1364_v47 = vadd.f32 %v1354_v45, %v1175_v10 }
 0x279   : > { %v1802_v46 = vmax.f32 %v1794_v16, 0.0  ;;  %2397 = vrot.lane.b32.xlu1 %v6287_v34, %s4965_s10  ;;  %2401 = vrot.lane.b32.xlu0 %v6289_v1, %s4965_s10  ;;  %v6308_v4 = vpop.permute.xlu2 %1966 }
 0x27b   : > { %v1810_v8 = vpack.c.bf16 %v1802_v46, %v1802_v46 }
 0x27c   : > { %v1725_v19 = vpop.f32.mrf.mxu3 }
 0x27d   : > { %v1826_v14 = vunpack.c.l.b16 %v1810_v8  ;;  %v1739_v52 = vadd.f32 %v1725_v19, %v1550_v24 }
 0x27f   : > { %v1832_v30 = vpack.c.b16 %v1826_v14, %v1825_v12  ;;  %v1795_v37 = vadd.f32 %v1774_v36, %v1739_v52  ;;  %v1543_v13 = vpop.f32.mrf.mxu2  ;;  %v6312_v12 = vpop.permute.xlu1 %1970 }
 0x280   : > { %v1553_v18 = vadd.f32 %v1543_v13, %v1364_v47  ;;  %7512 = vst [vmem:[#allocation13_spill] sm:$0xff] %v6312_v12  ;;  %v6314_v14 = vpop.permute.xlu0 %1968 }
 0x281   : > { %1860 = vrot.lane.b32.xlu2 %v1832_v30, %s4981_s13  ;;  %1837 = vrot.lane.b32.xlu1 %v1832_v30, %s4982_s25  ;;  %v1803_v28 = vmax.f32 %v1795_v37, 0.0  ;;  %v6310_v19 = vpop.permute.xlu2 %1972 }
 0x282   : > { %7511 = vst [vmem:[#allocation12_spill] sm:$0xff] %v6310_v19 }
 0x283   : > { %v1811_v39 = vpack.c.bf16 %v1803_v28, %v1803_v28 }
 0x284   : > { %v1727_v22 = vpop.f32.mrf.mxu3 }
 0x285   : > { %v1740_v40 = vadd.f32 %v1727_v22, %v1551_v23  ;;  %v1827_v59 = vunpack.c.l.b16 %v1811_v39 }
 0x287   : > { %v1796_v49 = vadd.f32 %v1779_v26, %v1740_v40  ;;  %v6318_v36 = vpop.permute.xlu1 %2197 }
 0x288   : > { %v6320_v56 = vpop.permute.xlu0 %2201 }
 0x289   : > { %v1804_v63 = vmax.f32 %v1796_v49, 0.0  ;;  %v6316_v52 = vpop.permute.xlu2 %2199  ;;  %7514 = vst [vmem:[#allocation15_spill] sm:$0xff] %v6320_v56 }
 0x28a   : > { %7513 = vst [vmem:[#allocation14_spill] sm:$0xff] %v6316_v52 }
 0x28b   : > { %v1812_v32 = vpack.c.bf16 %v1804_v63, %v1804_v63 }
 0x28c   : > { %v1730_v41 = vpop.f32.mrf.mxu3 }
 0x28d   : > { %v1828_v38 = vunpack.c.l.b16 %v1812_v32  ;;  %v1741_v7 = vadd.f32 %v1730_v41, %v1552_v58 }
 0x28f   : > { %v1833_v57 = vpack.c.b16 %v1828_v38, %v1827_v59  ;;  %v1797_v5 = vadd.f32 %v1784_v44, %v1741_v7  ;;  %v6324_v60 = vpop.permute.xlu1 %2203 }
 0x290   : > { %7516 = vst [vmem:[#allocation17_spill] sm:$0xff] %v6324_v60  ;;  %v6326_v37 = vpop.permute.xlu0 %2395 }
 0x291   : > { %1839 = vrot.lane.b32.xlu2 %v1833_v57, %s4982_s25  ;;  %1862 = vrot.lane.b32.xlu0 %v1833_v57, %s4981_s13  ;;  %v1805_v42 = vmax.f32 %v1797_v5, 0.0  ;;  %v6322_v30 = vpop.permute.xlu2 %2399  ;;  %7517 = vst [vmem:[#allocation18_spill] sm:$0xff] %v6326_v37  ;;  %v4022_v37 = vld [vmem:[%s7466_s2 + $0xd0] sm:$0xf] }
 0x292   : > { %7515 = vst [vmem:[#allocation16_spill] sm:$0xff] %v6322_v30  ;;  %v4010_v30 = vld [vmem:[%s7466_s2 + $0x10] sm:$0xf] }
 0x293   : > { %v1813_v51 = vpack.c.bf16 %v1805_v42, %v1805_v42  ;;  %v6616_v19 = vor.u32 %v4166_v3, %v4010_v30  ;;  %v4169_v3 = vld [vmem:[%s7466_s2 + $0xec] sm:$0xf0] }
 0x294   : > { %v1732_v33 = vpop.f32.mrf.mxu3  ;;  %v4014_v30 = vld [vmem:[%s7466_s2 + $0x50] sm:$0xf]  ;;  %v6649_v52 = vor.u32 %v4169_v3, %v4022_v37 }
 0x295   : > { %v1742_v16 = vadd.f32 %v1732_v33, %v1553_v18  ;;  %v1829_v29 = vunpack.c.l.b16 %v1813_v51  ;;  %7537 = vst [vmem:[#allocation28_spill] sm:$0xff] %v6616_v19 }
 0x297   : > { %v1798_v9 = vadd.f32 %v1789_v55, %v1742_v16 }
 0x299   : > { %v1806_v46 = vmax.f32 %v1798_v9, 0.0 }
 0x29b   : > { %v1814_v54 = vpack.c.bf16 %v1806_v46, %v1806_v46 }
 0x29d   : > { %v1830_v24 = vunpack.c.l.b16 %v1814_v54 }
 0x29f   : > { %v1834_v8 = vpack.c.b16 %v1830_v24, %v1829_v29 }
 0x2a1   : > { %1864 = vrot.lane.b32.xlu1 %v1834_v8, %s4981_s13  ;;  %1841 = vrot.lane.b32.xlu0 %v1834_v8, %s4982_s25  ;;  %s7518_s13 = smov 126   ;;  %s7520_s25 = smov 123  }
 0x2db   : > { %v1861_v21 = vpop.permute.xlu2 %1860 }
 0x2dc   : > { %v1869_v35 = vsel %vm1843_vm1, 0, %v1861_v21 }
 0x2dd   : > { %v6384_v41 = vsel %vm1853_vm2, %v1869_v35, 0 }
 0x2e3   : > { %v1859_v43 = vpop.permute.xlu1 %1858  ;;  %v1836_v23 = vpop.permute.xlu0 %1835 }
 0x2e4   : > { %v1867_v62 = vsel %vm1843_vm1, 0, %v1859_v43  ;;  %v1846_v22 = vsel %vm1843_vm1, 0, %v1836_v23  ;;  %v3994_v23 = vld [vmem:[%s7466_s2 + $0x8c] sm:$0xf] }
 0x2e5   : > { %v6331_v27 = vsel %vm1853_vm2, %v1867_v62, 0  ;;  %v6334_v28 = vsel %vm1853_vm2, %v1846_v22, 0  ;;  %v4164_v62 = vld [vmem:[%s7466_s2 + $0xa8] sm:$0xf0] }
 0x2e6   : > { %1922 = vrot.lane.b32.xlu1 %v6331_v27, %s4967_s12  ;;  %1882 = vrot.lane.b32.xlu2 %v6331_v27, %s4965_s10  ;;  %v3986_v22 = vld [vmem:[%s7466_s2 + $0xc] sm:$0xf]  ;;  %v6544_v35 = vor.u32 %v4164_v62, %v3994_v23 }
 0x2e7   : > { %1914 = vrot.lane.b32.xlu0 %v6334_v28, %s4966_s11 }
 0x2e8   : > { %7531 = vst [vmem:[#allocation22_spill] sm:$0xff] %v6544_v35 }
 0x2eb   : > { %v1840_v40 = vpop.permute.xlu2 %1839  ;;  %v6352_v25 = vpop.permute.xlu1 %2397 }
 0x2ec   : > { %v1850_v26 = vsel %vm1843_vm1, 0, %v1840_v40  ;;  %7519 = vst [vmem:[#allocation19_spill] sm:$0xff] %v6352_v25  ;;  %v6360_v49 = vpop.permute.xlu0 %2401  ;;  %v4162_v40 = vld [vmem:[%s7466_s2 + $0x28] sm:$0xf0] }
 0x2ed   : > { %v6344_v61 = vsel %vm1853_vm2, %v1850_v26, 0  ;;  %7523 = vst [vmem:[#allocation20_spill] sm:$0xff] %v6360_v49 }
 0x2ee   : > { %2064 = vrot.lane.b32.xlu1 %v6331_v27, %s4969_s14  ;;  %2165 = vrot.lane.b32.xlu2 %v6334_v28, %s4970_s15 }
 0x2ef   : > { %2056 = vrot.lane.b32.xlu0 %v6334_v28, %s7518_s13 }
 0x2f3   : > { %v1838_v53 = vpop.permute.xlu1 %1837 }
 0x2f4   : > { %v1848_v39 = vsel %vm1843_vm1, 0, %v1838_v53 }
 0x2f5   : > { %v6371_v58 = vsel %vm1853_vm2, %v1848_v39, 0  ;;  %v3990_v39 = vld [vmem:[%s7466_s2 + $0x4c] sm:$0xf] }
 0x2f6   : > { %2363 = vrot.lane.b32.xlu1 %v6334_v28, %s7520_s25  ;;  %2254 = vrot.lane.b32.xlu2 %v6334_v28, %s7521_s7 }
 0x2f7   : > { %2173 = vrot.lane.b32.xlu0 %v6331_v27, %s7522_s23 }
 0x2fe   : > { %2452 = vrot.lane.b32.xlu1 %v6334_v28, %s7524_s16  ;;  %2371 = vrot.lane.b32.xlu2 %v6331_v27, %s7525_s17 }
 0x2ff   : > { %2262 = vrot.lane.b32.xlu0 %v6331_v27, %s7526_s6 }
 0x303   : > { %v1863_v63 = vpop.permute.xlu0 %1862 }
 0x304   : > { %v1871_v50 = vsel %vm1843_vm1, 0, %v1863_v63  ;;  %v4163_v63 = vld [vmem:[%s7466_s2 + $0x68] sm:$0xf0] }
 0x305   : > { %v6374_v32 = vsel %vm1853_vm2, %v1871_v50, 0 }
 0x306   : > { %1916 = vrot.lane.b32.xlu1 %v6371_v58, %s4966_s11  ;;  %2460 = vrot.lane.b32.xlu2 %v6331_v27, %s7527_s8 }
 0x307   : > { %2561 = vrot.lane.b32.xlu0 %v6334_v28, %s7528_s30 }
 0x30e   : > { %2058 = vrot.lane.b32.xlu1 %v6371_v58, %s7518_s13  ;;  %1924 = vrot.lane.b32.xlu2 %v6384_v41, %s4967_s12 }
 0x30f   : > { %1884 = vrot.lane.b32.xlu0 %v6384_v41, %s4965_s10 }
 0x313   : > { %v1865_v59 = vpop.permute.xlu1 %1864  ;;  %v1842_v38 = vpop.permute.xlu0 %1841 }
 0x314   : > { %v1873_v7 = vsel %vm1843_vm1, 0, %v1865_v59  ;;  %v1852_v45 = vsel %vm1843_vm1, 0, %v1842_v38  ;;  %v6546_v59 = vor.u32 %v4162_v40, %v3986_v22  ;;  %v6548_v38 = vor.u32 %v4163_v63, %v3990_v39 }
 0x315   : > { %v6395_v10 = vsel %vm1853_vm2, %v1873_v7, 0  ;;  %v6398_v57 = vsel %vm1853_vm2, %v1852_v45, 0  ;;  %v3998_v7 = vld [vmem:[%s7466_s2 + $0xcc] sm:$0xf] }
 0x316   : > { %2175 = vrot.lane.b32.xlu1 %v6384_v41, %s7522_s23  ;;  %2066 = vrot.lane.b32.xlu2 %v6384_v41, %s4969_s14  ;;  %7532 = vst [vmem:[#allocation23_spill] sm:$0xff] %v6546_v59  ;;  %v4165_v45 = vld [vmem:[%s7466_s2 + $0xe8] sm:$0xf0] }
 0x317   : > { %2167 = vrot.lane.b32.xlu0 %v6371_v58, %s4970_s15  ;;  %7533 = vst [vmem:[#allocation24_spill] sm:$0xff] %v6548_v38  ;;  %v6568_v40 = vor.u32 %v4165_v45, %v3998_v7 }
 0x319   : > { %7534 = vst [vmem:[#allocation25_spill] sm:$0xff] %v6568_v40 }
 0x31e   : > { %2264 = vrot.lane.b32.xlu1 %v6384_v41, %s7526_s6  ;;  %2365 = vrot.lane.b32.xlu2 %v6371_v58, %s7520_s25 }
 0x31f   : > { %2256 = vrot.lane.b32.xlu0 %v6371_v58, %s7521_s7 }
 0x326   : > { %2563 = vrot.lane.b32.xlu1 %v6371_v58, %s7528_s30  ;;  %2454 = vrot.lane.b32.xlu2 %v6371_v58, %s7524_s16 }
 0x327   : > { %2373 = vrot.lane.b32.xlu0 %v6384_v41, %s7525_s17 }
 0x32e   : > { %1918 = vrot.lane.b32.xlu2 %v6344_v61, %s4966_s11  ;;  %1886 = vrot.lane.b32.xlu1 %v6374_v32, %s4965_s10 }
 0x32f   : > { %2462 = vrot.lane.b32.xlu0 %v6384_v41, %s7527_s8 }
 0x336   : > { %2060 = vrot.lane.b32.xlu2 %v6344_v61, %s7518_s13  ;;  %2169 = vrot.lane.b32.xlu1 %v6344_v61, %s4970_s15 }
 0x337   : > { %1926 = vrot.lane.b32.xlu0 %v6374_v32, %s4967_s12 }
 0x33e   : > { %2177 = vrot.lane.b32.xlu2 %v6374_v32, %s7522_s23  ;;  %2258 = vrot.lane.b32.xlu1 %v6344_v61, %s7521_s7 }
 0x33f   : > { %2068 = vrot.lane.b32.xlu0 %v6374_v32, %s4969_s14 }
 0x340   : > { %v6436_v44 = vpop.permute.xlu2 %1882 }
 0x341   : > { %v1891_v31 = vsel %vm326_vm0, %v6334_v28, %v6436_v44 }
 0x346   : > { %2266 = vrot.lane.b32.xlu2 %v6374_v32, %s7526_s6  ;;  %2375 = vrot.lane.b32.xlu1 %v6374_v32, %s7525_s17 }
 0x347   : > { %2367 = vrot.lane.b32.xlu0 %v6344_v61, %s7520_s25 }
 0x348   : > { %v6444_v13 = vpop.permute.xlu2 %2165 }
 0x34e   : > { %2565 = vrot.lane.b32.xlu2 %v6344_v61, %s7528_s30  ;;  %2464 = vrot.lane.b32.xlu1 %v6374_v32, %s7527_s8 }
 0x34f   : > { %2456 = vrot.lane.b32.xlu0 %v6344_v61, %s7524_s16 }
 0x350   : > { %v6452_v47 = vpop.permute.xlu2 %2254 }
 0x356   : > { %1888 = vrot.lane.b32.xlu2 %v6395_v10, %s4965_s10  ;;  %1928 = vrot.lane.b32.xlu1 %v6395_v10, %s4967_s12  ;;  %s7529_s12 = smov 57  }
 0x357   : > { %1920 = vrot.lane.b32.xlu0 %v6398_v57, %s4966_s11 }
 0x358   : > { %v6460_v5 = vpop.permute.xlu1 %1922  ;;  %v6462_v18 = vpop.permute.xlu2 %2371 }
 0x359   : > { %v6464_v33 = vpop.permute.xlu0 %1914 }
 0x35e   : > { %2070 = vrot.lane.b32.xlu1 %v6395_v10, %s4969_s14  ;;  %2171 = vrot.lane.b32.xlu2 %v6398_v57, %s4970_s15 }
 0x35f   : > { %2062 = vrot.lane.b32.xlu0 %v6398_v57, %s7518_s13  ;;  %s4992_s13 = smov 52  }
 0x360   : > { %v6472_v42 = vpop.permute.xlu1 %2064  ;;  %v6474_v16 = vpop.permute.xlu2 %2460 }
 0x361   : > { %v6476_v55 = vpop.permute.xlu0 %2056 }
 0x366   : > { %2369 = vrot.lane.b32.xlu1 %v6398_v57, %s7520_s25  ;;  %2260 = vrot.lane.b32.xlu2 %v6398_v57, %s7521_s7  ;;  %s4987_s25 = smov 118   ;;  %s4988_s7 = smov 117  }
 0x367   : > { %2179 = vrot.lane.b32.xlu0 %v6395_v10, %s7522_s23 }
 0x368   : > { %v6484_v9 = vpop.permute.xlu1 %2363  ;;  %v6486_v51 = vpop.permute.xlu2 %1924 }
 0x369   : > { %v6488_v46 = vpop.permute.xlu0 %2173 }
 0x36e   : > { %2458 = vrot.lane.b32.xlu1 %v6398_v57, %s7524_s16  ;;  %2377 = vrot.lane.b32.xlu2 %v6395_v10, %s7525_s17  ;;  %s4983_s16 = smov 120   ;;  %s4984_s17 = smov 56  }
 0x36f   : > { %2268 = vrot.lane.b32.xlu0 %v6395_v10, %s7526_s6  ;;  %s4985_s6 = smov 119  }
 0x370   : > { %v6496_v54 = vpop.permute.xlu1 %2452  ;;  %v6498_v29 = vpop.permute.xlu2 %2066 }
 0x371   : > { %v6500_v24 = vpop.permute.xlu0 %2262 }
 0x376   : > { %2569 = vrot.lane.b32.xlu1 %v6331_v27, %s7529_s12  ;;  %2466 = vrot.lane.b32.xlu2 %v6395_v10, %s7527_s8  ;;  %s4986_s8 = smov 55  }
 0x377   : > { %2567 = vrot.lane.b32.xlu0 %v6398_v57, %s7528_s30  ;;  %s4997_s30 = smov 49  }
 0x378   : > { %v6508_v8 = vpop.permute.xlu1 %1916  ;;  %v6510_v21 = vpop.permute.xlu2 %2365 }
 0x379   : > { %v6512_v43 = vpop.permute.xlu0 %2561 }
 0x37a   : > { %7530 = vst [vmem:[#allocation21_spill] sm:$0xff] %v6512_v43 }
 0x37e   : > { %2575 = vrot.lane.b32.xlu1 %v6395_v10, %s7529_s12  ;;  %2571 = vrot.lane.b32.xlu2 %v6384_v41, %s7529_s12 }
 0x37f   : > { %2573 = vrot.lane.b32.xlu0 %v6374_v32, %s7529_s12  ;;  %s4182_s12 = sshll.u32 %s5052_s22, 6 }
 0x380   : > { %v6532_v26 = vpop.permute.xlu1 %2058  ;;  %v6534_v53 = vpop.permute.xlu2 %2454 }
 0x381   : > { %v6542_v50 = vpop.permute.xlu0 %1884 }
 0x386   : > { %2597 = vrot.lane.b32.xlu1 %v6544_v35, %s4965_s10  ;;  %2593 = vrot.lane.b32.xlu2 %v6546_v59, %s4965_s10 }
 0x387   : > { %2595 = vrot.lane.b32.xlu0 %v6548_v38, %s4965_s10 }
 0x388   : > { %v6562_v23 = vpop.permute.xlu1 %2175  ;;  %v6564_v62 = vpop.permute.xlu2 %1918 }
 0x389   : > { %v6566_v22 = vpop.permute.xlu0 %2167 }
 0x38e   : > { %2652 = vrot.lane.b32.xlu1 %v6371_v58, %s4983_s16  ;;  %2599 = vrot.lane.b32.xlu2 %v6568_v40, %s4965_s10 }
 0x38f   : > { %2650 = vrot.lane.b32.xlu0 %v6334_v28, %s4983_s16 }
 0x390   : > { %v6574_v39 = vpop.permute.xlu1 %2264  ;;  %v6576_v63 = vpop.permute.xlu2 %2060 }
 0x391   : > { %v6578_v1 = vpop.permute.xlu0 %2256 }
 0x396   : > { %2658 = vrot.lane.b32.xlu1 %v6331_v27, %s4984_s17  ;;  %2654 = vrot.lane.b32.xlu2 %v6344_v61, %s4983_s16 }
 0x397   : > { %2656 = vrot.lane.b32.xlu0 %v6398_v57, %s4983_s16  ;;  %s4989_s16 = smov 54  }
 0x398   : > { %v6583_v7 = vpop.permute.xlu1 %2563  ;;  %v6585_v45 = vpop.permute.xlu2 %2177 }
 0x399   : > { %7535 = vst [vmem:[#allocation26_spill] sm:$0xff] %v6583_v7  ;;  %v6587_v40 = vpop.permute.xlu0 %2373  ;;  %v1894_v7 = vsel %vm326_vm0, %v6371_v58, %v6542_v50 }
 0x39e   : > { %2664 = vrot.lane.b32.xlu1 %v6395_v10, %s4984_s17  ;;  %2660 = vrot.lane.b32.xlu2 %v6384_v41, %s4984_s17 }
 0x39f   : > { %2662 = vrot.lane.b32.xlu0 %v6374_v32, %s4984_s17  ;;  %s4990_s17 = smov 53  }
 0x3a0   : > { %v6592_v35 = vpop.permute.xlu2 %2266  ;;  %v1887_v2 = vpop.permute.xlu1 %1886 }
 0x3a1   : > { %v6594_v38 = vpop.permute.xlu0 %2462  ;;  %v1897_v48 = vsel %vm326_vm0, %v6344_v61, %v1887_v2 }
 0x3a6   : > { %2763 = vrot.lane.b32.xlu1 %v6344_v61, %s4985_s6  ;;  %2759 = vrot.lane.b32.xlu2 %v6334_v28, %s4985_s6 }
 0x3a7   : > { %2761 = vrot.lane.b32.xlu0 %v6371_v58, %s4985_s6 }
 0x3a8   : > { %v6599_v49 = vpop.permute.xlu2 %2565  ;;  %v6601_v34 = vpop.permute.xlu1 %2169 }
 0x3a9   : > { %7536 = vst [vmem:[#allocation27_spill] sm:$0xff] %v6599_v49  ;;  %v1927_v59 = vpop.permute.xlu0 %1926 }
 0x3ae   : > { %2769 = vrot.lane.b32.xlu1 %v6384_v41, %s4986_s8  ;;  %2765 = vrot.lane.b32.xlu2 %v6398_v57, %s4985_s6  ;;  %s4996_s6 = smov 113  }
 0x3af   : > { %2767 = vrot.lane.b32.xlu0 %v6331_v27, %s4986_s8 }
 0x3b0   : > { %v1889_v60 = vpop.permute.xlu2 %1888  ;;  %v6612_v20 = vpop.permute.xlu1 %2258 }
 0x3b1   : > { %v1900_v25 = vsel %vm326_vm0, %v6398_v57, %v1889_v60  ;;  %v2069_v56 = vpop.permute.xlu0 %2068  ;;  %v4167_v60 = vld [vmem:[%s7466_s2 + $0x6c] sm:$0xf0] }
 0x3b2   : > { %2031 = vmatpush.bf16.msra.mxu1 %v1900_v25  ;;  %v6651_v12 = vor.u32 %v4167_v60, %v4014_v30 }
 0x3b6   : > { %2791 = vrot.lane.b32.xlu1 %v6616_v19, %s4965_s10  ;;  %2771 = vrot.lane.b32.xlu2 %v6374_v32, %s4986_s8  ;;  %v4018_v19 = vld [vmem:[%s7466_s2 + $0x90] sm:$0xf] }
 0x3b7   : > { %2773 = vrot.lane.b32.xlu0 %v6395_v10, %s4986_s8  ;;  %2032 = vmatpush.bf16.msra.mxu1 %v1897_v48  ;;  %v4168_v48 = vld [vmem:[%s7466_s2 + $0xac] sm:$0xf0]  ;;  %s4991_s8 = smov 116  }
 0x3b8   : > { %v6636_v2 = vpop.permute.xlu1 %2375  ;;  %v2172_v25 = vpop.permute.xlu2 %2171  ;;  %v6653_v49 = vor.u32 %v4168_v48, %v4018_v19 }
 0x3b9   : > { %v6644_v43 = vpop.permute.xlu0 %2367 }
 0x3bb   : > { %2033 = vmatpush.bf16.msra.mxu1 %v1894_v7 }
 0x3be   : > { %2797 = vrot.lane.b32.xlu1 %v6649_v52, %s4965_s10  ;;  %2793 = vrot.lane.b32.xlu2 %v6651_v12, %s4965_s10 }
 0x3bf   : > { %2795 = vrot.lane.b32.xlu0 %v6653_v49, %s4965_s10  ;;  %2034 = vmatpush.bf16.msra.mxu1 %v1891_v31 }
 0x3c0   : > { %v6664_v37 = vpop.permute.xlu1 %2464  ;;  %v2261_v50 = vpop.permute.xlu2 %2260 }
 0x3c1   : > { %v6666_v7 = vpop.permute.xlu0 %2456 }
 0x3c2   : > { %3932 = vmatmul.msk.bf16.vlgmr.msra.gmra.mxu1 %vm326_vm0, %v6200_v11  ;;  %v1940_v11 = vsel %vm326_vm0, %v6564_v62, %v1927_v59  ;;  %v1932_v59 = vsel %vm326_vm0, %v6464_v33, %v6460_v5  ;;  %v2078_v5 = vsel %vm326_vm0, %v6532_v26, %v6498_v29  ;;  %v2389_v33 = vsel %vm326_vm0, %v6644_v43, %v6636_v2  ;;  %v4038_v43 = vld [vmem:[%s7466_s2 + $0x54] sm:$0xf] }
 0x3c6   : > { %2852 = vrot.lane.b32.xlu1 %v6344_v61, %s4987_s25  ;;  %2848 = vrot.lane.b32.xlu2 %v6334_v28, %s4987_s25 }
 0x3c7   : > { %2850 = vrot.lane.b32.xlu0 %v6371_v58, %s4987_s25 }
 0x3c8   : > { %v1929_v19 = vpop.permute.xlu1 %1928  ;;  %v2378_v44 = vpop.permute.xlu2 %2377 }
 0x3c9   : > { %v1921_v3 = vpop.permute.xlu0 %1920 }
 0x3ca   : > { %v1944_v31 = vsel %vm326_vm0, %v1921_v3, %v1929_v19  ;;  %v1936_v3 = vsel %vm326_vm0, %v6508_v8, %v6486_v51 }
 0x3cb   : > { %1990 = vmatpush.bf16.msra.mxu0 %v1944_v31 }
 0x3ce   : > { %2963 = vrot.lane.b32.xlu1 %v6398_v57, %s4988_s7  ;;  %2854 = vrot.lane.b32.xlu2 %v6398_v57, %s4987_s25  ;;  %s4993_s25 = smov 114  }
 0x3cf   : > { %2862 = vrot.lane.b32.xlu0 %v6395_v10, %s4989_s16  ;;  %1991 = vmatpush.bf16.msra.mxu0 %v1940_v11 }
 0x3d0   : > { %v2071_v30 = vpop.permute.xlu1 %2070  ;;  %v2467_v60 = vpop.permute.xlu2 %2466 }
 0x3d1   : > { %v2063_v48 = vpop.permute.xlu0 %2062 }
 0x3d2   : > { %v2086_v19 = vsel %vm326_vm0, %v2063_v48, %v2071_v30  ;;  %3933 = vmatmul.msk.bf16.gmra.mxu1 %vm326_vm0, %v6166_v15  ;;  %v2082_v15 = vsel %vm326_vm0, %v6576_v63, %v2069_v56  ;;  %v2191_v56 = vsel %vm326_vm0, %v6601_v34, %v6585_v45 }
 0x3d3   : > { %1992 = vmatpush.bf16.msra.mxu0 %v1936_v3  ;;  %2132 = vmatpush.bf16.msra.mxu2 %v2086_v19  ;;  %v7540_v19 = vld [vmem:[#allocation13_spill] sm:$0xff]  ;;  %v7541_v3 = vld [vmem:[#allocation14_spill] sm:$0xff] }
 0x3d6   : > { %2961 = vrot.lane.b32.xlu1 %v6344_v61, %s4988_s7  ;;  %2971 = vrot.lane.b32.xlu2 %v6395_v10, %s4990_s17 }
 0x3d7   : > { %2860 = vrot.lane.b32.xlu0 %v6374_v32, %s4989_s16  ;;  %1993 = vmatpush.bf16.msra.mxu0 %v1932_v59  ;;  %v7542_v59 = vld [vmem:[#allocation26_spill] sm:$0xff] }
 0x3d8   : > { %2133 = vmatpush.bf16.msra.mxu2 %v2082_v15  ;;  %v2370_v51 = vpop.permute.xlu1 %2369  ;;  %v6698_v8 = vpop.permute.xlu2 %2571 }
 0x3d9   : > { %v2393_v62 = vsel %vm326_vm0, %v2370_v51, %v2378_v44  ;;  %v2180_v31 = vpop.permute.xlu0 %2179  ;;  %v7539_v44 = vld [vmem:[#allocation27_spill] sm:$0xff]  ;;  %v2583_v15 = vsel %vm326_vm0, %v7542_v59, %v6698_v8  ;;  %v7543_v51 = vld [vmem:[#allocation21_spill] sm:$0xff] }
 0x3da   : > { %v2195_v11 = vsel %vm326_vm0, %v2172_v25, %v2180_v31  ;;  %3928 = vmatmul.msk.bf16.vlgmr.msra.gmra.mxu0 %vm326_vm0, %v6308_v4  ;;  %2419 = vmatpush.bf16.msrb.mxu1 %v2393_v62  ;;  %v2074_v4 = vsel %vm326_vm0, %v6476_v55, %v6472_v42  ;;  %v2187_v42 = vsel %vm326_vm0, %v6566_v22, %v6562_v23 }
 0x3db   : > { %2221 = vmatpush.bf16.msra.mxu3 %v2195_v11  ;;  %v2385_v55 = vsel %vm326_vm0, %v6510_v21, %v6587_v40  ;;  %v2381_v21 = vsel %vm326_vm0, %v6484_v9, %v6462_v18  ;;  %v4034_v18 = vld [vmem:[%s7466_s2 + $0x14] sm:$0xf]  ;;  %v2276_v40 = vsel %vm326_vm0, %v6578_v1, %v6574_v39  ;;  %v2474_v25 = vsel %vm326_vm0, %v6534_v53, %v6594_v38 }
 0x3dc   : > { %2134 = vmatpush.bf16.msra.mxu2 %v2078_v5  ;;  %v4170_v9 = vld [vmem:[%s7466_s2 + $0x30] sm:$0xf0]  ;;  %v2272_v1 = vsel %vm326_vm0, %v6452_v47, %v6500_v24  ;;  %v2470_v53 = vsel %vm326_vm0, %v6496_v54, %v6474_v16  ;;  %v7538_v16 = vld [vmem:[#allocation8_spill] sm:$0xff] }
 0x3dd   : > { %v6777_v2 = vor.u32 %v4170_v9, %v4034_v18  ;;  %v4173_v47 = vld [vmem:[%s7466_s2 + $0xf0] sm:$0xf0] }
 0x3de   : > { %2959 = vrot.lane.b32.xlu1 %v6371_v58, %s4988_s7  ;;  %2969 = vrot.lane.b32.xlu2 %v6374_v32, %s4990_s17  ;;  %v7551_v18 = vld [vmem:[#allocation7_spill] sm:$0xff] }
 0x3df   : > { %2858 = vrot.lane.b32.xlu0 %v6384_v41, %s4989_s16  ;;  %2222 = vmatpush.bf16.msra.mxu3 %v2191_v56  ;;  %v7544_v56 = vld [vmem:[#allocation18_spill] sm:$0xff] }
 0x3e0   : > { %2135 = vmatpush.bf16.msra.mxu2 %v2074_v4  ;;  %2420 = vmatpush.bf16.msrb.mxu1 %v2389_v33  ;;  %v2459_v29 = vpop.permute.xlu1 %2458  ;;  %v6722_v26 = vpop.permute.xlu2 %2593  ;;  %v7545_v4 = vld [vmem:[#allocation5_spill] sm:$0xff] }
 0x3e1   : > { %v2482_v63 = vsel %vm326_vm0, %v2459_v29, %v2467_v60  ;;  %v2269_v34 = vpop.permute.xlu0 %2268 }
 0x3e2   : > { %v2284_v45 = vsel %vm326_vm0, %v2261_v50, %v2269_v34  ;;  %3934 = vmatmul.msk.bf16.gmra.mxu1 %vm326_vm0, %v6161_v0  ;;  %v2183_v0 = vsel %vm326_vm0, %v6444_v13, %v6488_v46  ;;  %v4171_v13 = vld [vmem:[%s7466_s2 + $0x70] sm:$0xf0]  ;;  %v2478_v46 = vsel %vm326_vm0, %v6666_v7, %v6664_v37 }
 0x3e3   : > { %3952 = vmatmul.msk.bf16.vlgmr.msra.gmra.mxu2 %vm326_vm0, %v6185_v17  ;;  %2223 = vmatpush.bf16.msra.mxu3 %v2187_v42  ;;  %v2280_v17 = vsel %vm326_vm0, %v6612_v20, %v6592_v35  ;;  %v6772_v22 = vor.u32 %v4171_v13, %v4038_v43  ;;  %v4046_v37 = vld [vmem:[%s7466_s2 + $0xd4] sm:$0xf] }
 0x3e4   : > { %2528 = vmatpush.bf16.msrb.mxu2 %v2482_v63  ;;  %2330 = vmatpush.bf16.msrb.mxu0 %v2284_v45  ;;  %v6813_v54 = vor.u32 %v4173_v47, %v4046_v37  ;;  %v7546_v63 = vld [vmem:[#allocation12_spill] sm:$0xff]  ;;  %v7547_v34 = vld [vmem:[#allocation15_spill] sm:$0xff]  ;;  %v7554_v37 = vld [vmem:[#allocation10_spill] sm:$0xff] }
 0x3e5   : > { %2421 = vmatpush.bf16.msrb.mxu1 %v2385_v55 }
 0x3e6   : > { %2957 = vrot.lane.b32.xlu1 %v6334_v28, %s4988_s7  ;;  %2967 = vrot.lane.b32.xlu2 %v6384_v41, %s4990_s17  ;;  %s4994_s7 = smov 50  }
 0x3e7   : > { %2856 = vrot.lane.b32.xlu0 %v6331_v27, %s4989_s16  ;;  %2224 = vmatpush.bf16.msra.mxu3 %v2183_v0  ;;  %s4995_s16 = smov 115  }
 0x3e8   : > { %2331 = vmatpush.bf16.msrb.mxu0 %v2280_v17  ;;  %v2570_v23 = vpop.permute.xlu1 %2569  ;;  %v6760_v20 = vpop.permute.xlu2 %2599  ;;  %2529 = vmatpush.bf16.msrb.mxu2 %v2478_v46  ;;  %v7548_v17 = vld [vmem:[#allocation19_spill] sm:$0xff] }
 0x3e9   : > { %2422 = vmatpush.bf16.msrb.mxu1 %v2381_v21  ;;  %v2568_v35 = vpop.permute.xlu0 %2567  ;;  %v2579_v62 = vsel %vm326_vm0, %v7543_v51, %v2570_v23  ;;  %v7549_v21 = vld [vmem:[#allocation6_spill] sm:$0xff]  ;;  %v7550_v23 = vld [vmem:[#allocation17_spill] sm:$0xff] }
 0x3ea   : > { %3929 = vmatmul.msk.bf16.gmra.mxu0 %vm326_vm0, %v6314_v14  ;;  %3956 = vmatmul.msk.bf16.vlgmr.msra.gmra.mxu3 %vm326_vm0, %v6318_v36  ;;  %v4042_v14 = vld [vmem:[%s7466_s2 + $0x94] sm:$0xf] }
 0x3eb   : > { %v4172_v36 = vld [vmem:[%s7466_s2 + $0xb0] sm:$0xf0] }
 0x3ec   : > { %2332 = vmatpush.bf16.msrb.mxu0 %v2276_v40  ;;  %2530 = vmatpush.bf16.msrb.mxu2 %v2474_v25  ;;  %v6809_v7 = vor.u32 %v4172_v36, %v4042_v14  ;;  %v7553_v14 = vld [vmem:[#allocation23_spill] sm:$0xff] }
 0x3ee   : > { %2991 = vrot.lane.b32.xlu1 %v6772_v22, %s4965_s10  ;;  %2965 = vrot.lane.b32.xlu2 %v6331_v27, %s4990_s17  ;;  %s4998_s17 = smov 51  }
 0x3ef   : > { %2989 = vrot.lane.b32.xlu0 %v6777_v2, %s4965_s10 }
 0x3f0   : > { %2333 = vmatpush.bf16.msrb.mxu0 %v2272_v1  ;;  %v2576_v38 = vpop.permute.xlu1 %2575  ;;  %v2655_v39 = vpop.permute.xlu2 %2654  ;;  %2531 = vmatpush.bf16.msrb.mxu2 %v2470_v53  ;;  %v7552_v1 = vld [vmem:[#allocation16_spill] sm:$0xff] }
 0x3f1   : > { %v2591_v24 = vsel %vm326_vm0, %v2568_v35, %v2576_v38  ;;  %v2574_v50 = vpop.permute.xlu0 %2573 }
 0x3f2   : > { %3935 = vmatmul.msk.bf16.gmra.mxu1 %vm326_vm0, %v6230_v6  ;;  %2617 = vmatpush.bf16.msrb.mxu3 %v2591_v24  ;;  %v2587_v30 = vsel %vm326_vm0, %v7539_v44, %v2574_v50  ;;  %v7555_v50 = vld [vmem:[#allocation20_spill] sm:$0xff] }
 0x3f3   : > { %3953 = vmatmul.msk.bf16.gmra.mxu2 %vm326_vm0, %v7538_v16  ;;  %v7556_v16 = vld [vmem:[#allocation24_spill] sm:$0xff] }
 0x3f6   : > { %3046 = vrot.lane.b32.xlu1 %v6334_v28, %s4991_s8  ;;  %2993 = vrot.lane.b32.xlu2 %v6809_v7, %s4965_s10 }
 0x3f7   : > { %2995 = vrot.lane.b32.xlu0 %v6813_v54, %s4965_s10  ;;  %2618 = vmatpush.bf16.msrb.mxu3 %v2587_v30 }
 0x3f8   : > { %v6822_v6 = vpop.permute.xlu1 %2597  ;;  %v2661_v60 = vpop.permute.xlu2 %2660 }
 0x3f9   : > { %v6824_v48 = vpop.permute.xlu0 %2595 }
 0x3fa   : > { %3930 = vmatmul.msk.bf16.gmra.mxu0 %vm326_vm0, %v7540_v19  ;;  %3957 = vmatmul.msk.bf16.gmra.mxu3 %vm326_vm0, %v7541_v3  ;;  %v7557_v3 = vld [vmem:[#allocation9_spill] sm:$0xff] }
 0x3fb   : > { %2619 = vmatpush.bf16.msrb.mxu3 %v2583_v15 }
 0x3fe   : > { %3052 = vrot.lane.b32.xlu1 %v6398_v57, %s4991_s8  ;;  %3048 = vrot.lane.b32.xlu2 %v6371_v58, %s4991_s8 }
 0x3ff   : > { %3050 = vrot.lane.b32.xlu0 %v6344_v61, %s4991_s8  ;;  %2620 = vmatpush.bf16.msrb.mxu3 %v2579_v62 }
 0x400   : > { %v2653_v31 = vpop.permute.xlu1 %2652  ;;  %v6838_v11 = vpop.permute.xlu2 %2759 }
 0x401   : > { %v2651_v5 = vpop.permute.xlu0 %2650  ;;  %v2672_v9 = vsel %vm326_vm0, %v2653_v31, %v2661_v60 }
 0x402   : > { %3980 = vmatmul.msk.bf16.vlgmr.msrb.gmra.mxu1 %vm326_vm0, %v7544_v56 }
 0x403   : > { %3954 = vmatmul.msk.bf16.gmra.mxu2 %vm326_vm0, %v7545_v4 }
 0x406   : > { %3060 = vrot.lane.b32.xlu1 %v6395_v10, %s4992_s13  ;;  %3250 = vrot.lane.b32.xlu2 %v6398_v57, %s4993_s25 }
 0x407   : > { %3258 = vrot.lane.b32.xlu0 %v6395_v10, %s4994_s7 }
 0x408   : > { %v2659_v8 = vpop.permute.xlu1 %2658  ;;  %v2766_v33 = vpop.permute.xlu2 %2765 }
 0x409   : > { %v2657_v29 = vpop.permute.xlu0 %2656 }
 0x40a   : > { %3931 = vmatmul.msk.bf16.gmra.mxu0 %vm326_vm0, %v7546_v63  ;;  %3958 = vmatmul.msk.bf16.gmra.mxu3 %vm326_vm0, %v7547_v34  ;;  %v7559_v63 = vld [vmem:[#allocation11_spill] sm:$0xff] }
 0x40e   : > { %3161 = vrot.lane.b32.xlu1 %v6398_v57, %s4995_s16  ;;  %3359 = vrot.lane.b32.xlu2 %v6398_v57, %s4996_s6 }
 0x40f   : > { %3367 = vrot.lane.b32.xlu0 %v6395_v10, %s4997_s30 }
 0x410   : > { %v2665_v45 = vpop.permute.xlu1 %2664  ;;  %v2772_v42 = vpop.permute.xlu2 %2771 }
 0x411   : > { %v2680_v55 = vsel %vm326_vm0, %v2657_v29, %v2665_v45  ;;  %v2663_v0 = vpop.permute.xlu0 %2662 }
 0x412   : > { %3981 = vmatmul.msk.bf16.gmra.mxu1 %vm326_vm0, %v7548_v17  ;;  %2726 = vmatpush.bf16.msra.mxu0 %v2680_v55  ;;  %v2676_v57 = vsel %vm326_vm0, %v2655_v39, %v2663_v0  ;;  %v4090_v55 = vld [vmem:[%s7466_s2 + $0x9c] sm:$0xf] }
 0x413   : > { %3955 = vmatmul.msk.bf16.gmra.mxu2 %vm326_vm0, %v7549_v21  ;;  %v4180_v0 = vld [vmem:[%s7466_s2 + $0xb8] sm:$0xf0] }
 0x414   : > { %v4086_v17 = vld [vmem:[%s7466_s2 + $0x5c] sm:$0xf] }
 0x416   : > { %3256 = vrot.lane.b32.xlu1 %v6374_v32, %s4994_s7  ;;  %3169 = vrot.lane.b32.xlu2 %v6395_v10, %s4998_s17  ;;  %v2668_v10 = vsel %vm326_vm0, %v2651_v5, %v2659_v8  ;;  %v4174_v5 = vld [vmem:[%s7466_s2 + $0x34] sm:$0xf0]  ;;  %v4082_v8 = vld [vmem:[%s7466_s2 + $0x1c] sm:$0xf] }
 0x417   : > { %3248 = vrot.lane.b32.xlu0 %v6344_v61, %s4993_s25  ;;  %2727 = vmatpush.bf16.msra.mxu0 %v2676_v57 }
 0x418   : > { %v2764_v43 = vpop.permute.xlu1 %2763  ;;  %v6872_v13 = vpop.permute.xlu2 %2793 }
 0x419   : > { %v2762_v46 = vpop.permute.xlu0 %2761 }
 0x41a   : > { %3959 = vmatmul.msk.bf16.gmra.mxu3 %vm326_vm0, %v7550_v23  ;;  %3976 = vmatmul.msk.bf16.vlgmr.msrb.gmra.mxu0 %vm326_vm0, %v7551_v18 }
 0x41b   : > { %2728 = vmatpush.bf16.msra.mxu0 %v2672_v9 }
 0x41e   : > { %3365 = vrot.lane.b32.xlu1 %v6374_v32, %s4997_s30  ;;  %3058 = vrot.lane.b32.xlu2 %v6374_v32, %s4992_s13 }
 0x41f   : > { %3357 = vrot.lane.b32.xlu0 %v6344_v61, %s4996_s6  ;;  %2729 = vmatpush.bf16.msra.mxu0 %v2668_v10  ;;  %v7002_v10 = vor.u32 %v4180_v0, %v4090_v55 }
 0x420   : > { %v2770_v35 = vpop.permute.xlu1 %2769  ;;  %v6886_v40 = vpop.permute.xlu2 %2848 }
 0x421   : > { %v2768_v25 = vpop.permute.xlu0 %2767 }
 0x422   : > { %3982 = vmatmul.msk.bf16.gmra.mxu1 %vm326_vm0, %v7552_v1  ;;  %v2777_v44 = vsel %vm326_vm0, %v6838_v11, %v2768_v25  ;;  %v4058_v11 = vld [vmem:[%s7466_s2 + $0x18] sm:$0xf]  ;;  %v7560_v25 = vld [vmem:[#allocation25_spill] sm:$0xff] }
 0x423   : > { %4000 = vmatmul.msk.bf16.vlgmr.msrb.gmra.mxu2 %vm326_vm0, %v7553_v14  ;;  %v6968_v45 = vor.u32 %v4174_v5, %v4058_v11 }
 0x426   : > { %3246 = vrot.lane.b32.xlu1 %v6371_v58, %s4993_s25  ;;  %3159 = vrot.lane.b32.xlu2 %v6344_v61, %s4995_s16  ;;  %v2785_v61 = vsel %vm326_vm0, %v2764_v43, %v2772_v42  ;;  %v4062_v43 = vld [vmem:[%s7466_s2 + $0x58] sm:$0xf] }
 0x427   : > { %3167 = vrot.lane.b32.xlu0 %v6374_v32, %s4998_s17 }
 0x428   : > { %v2792_v36 = vpop.permute.xlu1 %2791  ;;  %v2855_v53 = vpop.permute.xlu2 %2854 }
 0x429   : > { %v2774_v38 = vpop.permute.xlu0 %2773 }
 0x42a   : > { %v2789_v39 = vsel %vm326_vm0, %v2766_v33, %v2774_v38  ;;  %3977 = vmatmul.msk.bf16.gmra.mxu0 %vm326_vm0, %v7554_v37  ;;  %4004 = vmatmul.msk.bf16.vlgmr.msrb.gmra.mxu3 %vm326_vm0, %v6722_v26  ;;  %v2781_v26 = vsel %vm326_vm0, %v2762_v46, %v2770_v35  ;;  %v4175_v46 = vld [vmem:[%s7466_s2 + $0x74] sm:$0xf0] }
 0x42b   : > { %2815 = vmatpush.bf16.msra.mxu1 %v2789_v39  ;;  %v7008_v1 = vor.u32 %v4175_v46, %v4062_v43  ;;  %v4066_v38 = vld [vmem:[%s7466_s2 + $0x98] sm:$0xf]  ;;  %v4104_v43 = vld [vmem:[%s5083_s9 + $0x80] sm:$0xff]  ;;  %v3448_v46 = vld [vmem:[%s5083_s9 + $0x30] sm:$0xff] }
 0x42c   : > { %v4176_v39 = vld [vmem:[%s7466_s2 + $0xb4] sm:$0xf0] }
 0x42e   : > { %3355 = vrot.lane.b32.xlu1 %v6371_v58, %s4996_s6  ;;  %3254 = vrot.lane.b32.xlu2 %v6384_v41, %s4994_s7 }
 0x42f   : > { %3056 = vrot.lane.b32.xlu0 %v6384_v41, %s4992_s13  ;;  %2816 = vmatpush.bf16.msra.mxu1 %v2785_v61 }
 0x430   : > { %v6910_v32 = vpop.permute.xlu1 %2797  ;;  %v2972_v47 = vpop.permute.xlu2 %2971 }
 0x431   : > { %v6912_v24 = vpop.permute.xlu0 %2795 }
 0x432   : > { %3983 = vmatmul.msk.bf16.gmra.mxu1 %vm326_vm0, %v7555_v50  ;;  %v4094_v50 = vld [vmem:[%s7466_s2 + $0xdc] sm:$0xf] }
 0x433   : > { %4001 = vmatmul.msk.bf16.gmra.mxu2 %vm326_vm0, %v7556_v16  ;;  %2817 = vmatpush.bf16.msra.mxu1 %v2781_v26  ;;  %v4181_v26 = vld [vmem:[%s7466_s2 + $0xf8] sm:$0xf0] }
 0x436   : > { %3165 = vrot.lane.b32.xlu1 %v6384_v41, %s4998_s17  ;;  %3363 = vrot.lane.b32.xlu2 %v6384_v41, %s4997_s30 }
 0x437   : > { %3157 = vrot.lane.b32.xlu0 %v6371_v58, %s4995_s16  ;;  %2818 = vmatpush.bf16.msra.mxu1 %v2777_v44 }
 0x438   : > { %v2853_v30 = vpop.permute.xlu1 %2852  ;;  %v2970_v60 = vpop.permute.xlu2 %2969 }
 0x439   : > { %v2851_v19 = vpop.permute.xlu0 %2850 }
 0x43a   : > { %3978 = vmatmul.msk.bf16.gmra.mxu0 %vm326_vm0, %v7557_v3  ;;  %4005 = vmatmul.msk.bf16.gmra.mxu3 %vm326_vm0, %v6824_v48  ;;  %v7558_v48 = vld [vmem:[#allocation22_spill] sm:$0xff]  ;;  %v7047_v3 = vor.u32 %v4176_v39, %v4066_v38 }
 0x43e   : > { %3054 = vrot.lane.b32.xlu1 %v6331_v27, %s4992_s13  ;;  %3244 = vrot.lane.b32.xlu2 %v6334_v28, %s4993_s25 }
 0x43f   : > { %3252 = vrot.lane.b32.xlu0 %v6331_v27, %s4994_s7  ;;  %v2036_v58 = vpop.f32.mrf.mxu1 }
 0x440   : > { %v2964_v41 = vpop.permute.xlu1 %2963  ;;  %v2968_v59 = vpop.permute.xlu2 %2967 }
 0x441   : > { %v2987_v15 = vsel %vm326_vm0, %v2964_v41, %v2972_v47  ;;  %v2863_v51 = vpop.permute.xlu0 %2862 }
 0x442   : > { %v2878_v62 = vsel %vm326_vm0, %v2855_v53, %v2863_v51  ;;  %4028 = vmatmul.msk.bf16.vlgmr.msra.gmra.mxu1 %vm326_vm0, %v2792_v36  ;;  %3013 = vmatpush.bf16.msra.mxu3 %v2987_v15  ;;  %v4177_v53 = vld [vmem:[%s7466_s2 + $0xf4] sm:$0xf0]  ;;  %v3444_v51 = vld [vmem:[%s5083_s9 + $0x10] sm:$0xff] }
 0x443   : > { %4002 = vmatmul.msk.bf16.gmra.mxu2 %vm326_vm0, %v7558_v48  ;;  %v3443_v48 = vld [vmem:[%s5083_s9 + $0x8] sm:$0xff] }
 0x444   : > { %2924 = vmatpush.bf16.msra.mxu2 %v2878_v62  ;;  %v3442_v62 = vld [vmem:[%s5083_s9] sm:$0xff] }
 0x446   : > { %3155 = vrot.lane.b32.xlu1 %v6334_v28, %s4995_s16  ;;  %3353 = vrot.lane.b32.xlu2 %v6334_v28, %s4996_s6  ;;  %v4178_v28 = vld [vmem:[%s7466_s2 + $0x38] sm:$0xf0]  ;;  %s4921_s16 = scalar_lea.hbm %s7469_s5, 128 }
 0x447   : > { %3361 = vrot.lane.b32.xlu0 %v6331_v27, %s4997_s30  ;;  %v6948_v31 = vpop.f32.mrf.mxu1  ;;  %v6970_v42 = vor.u32 %v4178_v28, %v4082_v8 }
 0x448   : > { %v2962_v56 = vpop.permute.xlu1 %2961  ;;  %v2966_v4 = vpop.permute.xlu2 %2965 }
 0x449   : > { %v2861_v33 = vpop.permute.xlu0 %2860  ;;  %v2983_v29 = vsel %vm326_vm0, %v2962_v56, %v2970_v60 }
 0x44a   : > { %3979 = vmatmul.msk.bf16.gmra.mxu0 %vm326_vm0, %v7559_v63  ;;  %4006 = vmatmul.msk.bf16.gmra.mxu3 %vm326_vm0, %v6822_v6  ;;  %v2874_v34 = vsel %vm326_vm0, %v2853_v30, %v2861_v33  ;;  %v7561_v30 = vld [vmem:[#allocation28_spill] sm:$0xff]  ;;  %v3447_v33 = vld [vmem:[%s5083_s9 + $0x28] sm:$0xff]  ;;  %v3446_v63 = vld [vmem:[%s5083_s9 + $0x20] sm:$0xff] }
 0x44b   : > { %2925 = vmatpush.bf16.msra.mxu2 %v2874_v34  ;;  %3014 = vmatpush.bf16.msra.mxu3 %v2983_v29  ;;  %v3445_v29 = vld [vmem:[%s5083_s9 + $0x18] sm:$0xff] }
 0x44e   : > { %3187 = vrot.lane.b32.xlu1 %v6968_v45, %s4965_s10  ;;  %3163 = vrot.lane.b32.xlu2 %v6331_v27, %s4998_s17  ;;  %v4179_v27 = vld [vmem:[%s7466_s2 + $0x78] sm:$0xf0] }
 0x44f   : > { %3385 = vrot.lane.b32.xlu0 %v6970_v42, %s4965_s10  ;;  %v2041_v6 = vpop.f32.mrf.mxu1  ;;  %v7004_v35 = vor.u32 %v4179_v27, %v4086_v17 }
 0x450   : > { %v2960_v21 = vpop.permute.xlu1 %2959  ;;  %v6990_v57 = vpop.permute.xlu2 %2993 }
 0x451   : > { %v2859_v23 = vpop.permute.xlu0 %2858  ;;  %v2979_v18 = vsel %vm326_vm0, %v2960_v21, %v2968_v59 }
 0x452   : > { %4029 = vmatmul.msk.bf16.gmra.mxu1 %vm326_vm0, %v6872_v13  ;;  %v2870_v9 = vsel %vm326_vm0, %v2851_v19, %v2859_v23  ;;  %3015 = vmatpush.bf16.msra.mxu3 %v2979_v18  ;;  %v4070_v13 = vld [vmem:[%s7466_s2 + $0xd8] sm:$0xf] }
 0x453   : > { %4003 = vmatmul.msk.bf16.gmra.mxu2 %vm326_vm0, %v7560_v25  ;;  %v7045_v19 = vor.u32 %v4177_v53, %v4070_v13  ;;  %v3449_v23 = vld [vmem:[%s5083_s9 + $0x38] sm:$0xff] }
 0x454   : > { %2926 = vmatpush.bf16.msra.mxu2 %v2870_v9 }
 0x456   : > { %3389 = vrot.lane.b32.xlu1 %v7002_v10, %s4965_s10  ;;  %3387 = vrot.lane.b32.xlu2 %v7004_v35, %s4965_s10 }
 0x457   : > { %3189 = vrot.lane.b32.xlu0 %v7008_v1, %s4965_s10  ;;  %v1995_v14 = vpop.f32.mrf.mxu0  ;;  %v7019_v36 = vpop.f32.mrf.mxu1 }
 0x458   : > { %v2037_v37 = vadd.f32 %v2036_v58, %v1995_v14  ;;  %v2958_v61 = vpop.permute.xlu1 %2957  ;;  %v7030_v47 = vpop.permute.xlu2 %3048  ;;  %v7049_v58 = vor.u32 %v4181_v26, %v4094_v50  ;;  %v4105_v50 = vld [vmem:[%s5083_s9 + $0x88] sm:$0xff]  ;;  %v4106_v26 = vld [vmem:[%s5083_s9 + $0x90] sm:$0xff] }
 0x459   : > { %v2857_v16 = vpop.permute.xlu0 %2856  ;;  %v2975_v44 = vsel %vm326_vm0, %v2958_v61, %v2966_v4  ;;  %v4107_v61 = vld [vmem:[%s5083_s9 + $0x98] sm:$0xff] }
 0x45a   : > { %4007 = vmatmul.msk.bf16.gmra.mxu3 %vm326_vm0, %v6760_v20  ;;  %4024 = vmatmul.msk.bf16.vlgmr.msra.gmra.mxu0 %vm326_vm0, %v7561_v30  ;;  %v2866_v60 = vsel %vm326_vm0, %v6886_v40, %v2857_v16 }
 0x45b   : > { %2927 = vmatpush.bf16.msra.mxu2 %v2866_v60  ;;  %3016 = vmatpush.bf16.msra.mxu3 %v2975_v44 }
 0x45e   : > { %3193 = vrot.lane.b32.xlu1 %v7045_v19, %s4965_s10  ;;  %3191 = vrot.lane.b32.xlu2 %v7047_v3, %s4965_s10 }
 0x45f   : > { %3391 = vrot.lane.b32.xlu0 %v7049_v58, %s4965_s10  ;;  %v7057_v20 = vpop.f32.mrf.mxu0  ;;  %v2046_v40 = vpop.f32.mrf.mxu1  ;;  %s218_s10 = sand.u32 1, %s4955_s19  }
 0x460   : > { %v2992_v41 = vpop.permute.xlu1 %2991  ;;  %v3251_v59 = vpop.permute.xlu2 %3250 }
 0x461   : > { %v2990_v15 = vpop.permute.xlu0 %2989 }
 0x462   : > { %4030 = vmatmul.msk.bf16.gmra.mxu1 %vm326_vm0, %v6912_v24 }
 0x463   : > { %4048 = vmatmul.msk.bf16.vlgmr.msra.gmra.mxu2 %vm326_vm0, %v6777_v2 }
 0x466   : > { %v2137_v11 = vpop.f32.mrf.mxu2  ;;  %3462 = vrot.lane.b32.xlu1 %v3444_v51, %s4966_s11  ;;  %3458 = vrot.lane.b32.xlu2 %v3442_v62, %s4966_s11 }
 0x467   : > { %v2157_v5 = vadd.f32 %v2137_v11, %v2037_v37  ;;  %3460 = vrot.lane.b32.xlu0 %v3443_v48, %s4966_s11  ;;  %v2000_v56 = vpop.f32.mrf.mxu0  ;;  %v7069_v4 = vpop.f32.mrf.mxu1  ;;  %v4110_v48 = vld [vmem:[%s5083_s9 + $0xb0] sm:$0xff]  ;;  %v4108_v11 = vld [vmem:[%s5083_s9 + $0xa0] sm:$0xff] }
 0x468   : > { %v2042_v24 = vadd.f32 %v2041_v6, %v2000_v56  ;;  %v7071_v8 = vpop.permute.xlu1 %3046  ;;  %v3360_v2 = vpop.permute.xlu2 %3359 }
 0x469   : > { %v7073_v28 = vpop.permute.xlu0 %2995 }
 0x46a   : > { %4025 = vmatmul.msk.bf16.gmra.mxu0 %vm326_vm0, %v6651_v12  ;;  %4052 = vmatmul.msk.bf16.vlgmr.msra.gmra.mxu3 %vm326_vm0, %v2990_v15 }
 0x46d   : > { %v2226_v34 = vpop.f32.mrf.mxu3 }
 0x46e   : > { %v7081_v55 = vpop.f32.mrf.mxu2  ;;  %v7083_v6 = vadd.f32 %v2226_v34, %v2157_v5  ;;  %3468 = vrot.lane.b32.xlu1 %v3447_v33, %s4966_s11  ;;  %3464 = vrot.lane.b32.xlu2 %v3445_v29, %s4966_s11  ;;  %v4109_v5 = vld [vmem:[%s5083_s9 + $0xa8] sm:$0xff] }
 0x46f   : > { %3466 = vrot.lane.b32.xlu0 %v3446_v63, %s4966_s11  ;;  %v7088_v12 = vpop.f32.mrf.mxu0  ;;  %v2051_v0 = vpop.f32.mrf.mxu1 }
 0x470   : > { %v3053_v17 = vpop.permute.xlu1 %3052  ;;  %v3170_v27 = vpop.permute.xlu2 %3169 }
 0x471   : > { %v3051_v21 = vpop.permute.xlu0 %3050 }
 0x472   : > { %4031 = vmatmul.msk.bf16.gmra.mxu1 %vm326_vm0, %v6910_v32 }
 0x473   : > { %4049 = vmatmul.msk.bf16.gmra.mxu2 %vm326_vm0, %v6772_v22 }
 0x475   : > { %v7097_v18 = vpop.f32.mrf.mxu3 }
 0x476   : > { %v2142_v9 = vpop.f32.mrf.mxu2  ;;  %3506 = vrot.lane.b32.xlu1 %v4104_v43, %s4966_s11  ;;  %3470 = vrot.lane.b32.xlu2 %v3448_v46, %s4966_s11 }
 0x477   : > { %v2159_v25 = vadd.f32 %v2142_v9, %v2042_v24  ;;  %3472 = vrot.lane.b32.xlu0 %v3449_v23, %s4966_s11  ;;  %v2005_v32 = vpop.f32.mrf.mxu0  ;;  %v7102_v13 = vpop.f32.mrf.mxu1 }
 0x478   : > { %v2047_v22 = vadd.f32 %v2046_v40, %v2005_v32  ;;  %v3061_v14 = vpop.permute.xlu1 %3060  ;;  %v3059_v53 = vpop.permute.xlu2 %3058 }
 0x479   : > { %v3076_v38 = vsel %vm326_vm0, %v3053_v17, %v3061_v14  ;;  %v3259_v39 = vpop.permute.xlu0 %3258 }
 0x47a   : > { %v3274_v37 = vsel %vm326_vm0, %v3251_v59, %v3259_v39  ;;  %4026 = vmatmul.msk.bf16.gmra.mxu0 %vm326_vm0, %v6653_v49  ;;  %4053 = vmatmul.msk.bf16.gmra.mxu3 %vm326_vm0, %v2992_v41  ;;  %v3072_v49 = vsel %vm326_vm0, %v3051_v21, %v3059_v53  ;;  %v4111_v21 = vld [vmem:[%s5083_s9 + $0xb8] sm:$0xff] }
 0x47b   : > { %3122 = vmatpush.bf16.msrb.mxu0 %v3076_v38  ;;  %3320 = vmatpush.bf16.msrb.mxu2 %v3274_v37 }
 0x47d   : > { %v2231_v16 = vpop.f32.mrf.mxu3 }
 0x47e   : > { %v7112_v44 = vpop.f32.mrf.mxu2  ;;  %v7114_v30 = vadd.f32 %v2231_v16, %v2159_v25  ;;  %3512 = vrot.lane.b32.xlu1 %v4107_v61, %s4966_s11  ;;  %3508 = vrot.lane.b32.xlu2 %v4105_v50, %s4966_s11  ;;  %v2039_v16 = vadd.f32 %v6948_v31, %v7057_v20 }
 0x47f   : > { %3510 = vrot.lane.b32.xlu0 %v4106_v26, %s4966_s11  ;;  %v7120_v60 = vpop.f32.mrf.mxu0  ;;  %v2424_v40 = vpop.f32.mrf.mxu1  ;;  %3123 = vmatpush.bf16.msrb.mxu0 %v3072_v49 }
 0x480   : > { %v3162_v41 = vpop.permute.xlu1 %3161  ;;  %v3160_v59 = vpop.permute.xlu2 %3159 }
 0x481   : > { %v3185_v15 = vsel %vm326_vm0, %v3162_v41, %v3170_v27  ;;  %v3368_v51 = vpop.permute.xlu0 %3367 }
 0x482   : > { %v3383_v62 = vsel %vm326_vm0, %v3360_v2, %v3368_v51  ;;  %3211 = vmatpush.bf16.msrb.mxu1 %v3185_v15  ;;  %v2158_v15 = vadd.f32 %v7081_v55, %v2039_v16 }
 0x483   : > { %4050 = vmatmul.msk.bf16.gmra.mxu2 %vm326_vm0, %v6809_v7  ;;  %3409 = vmatpush.bf16.msrb.mxu3 %v3383_v62 }
 0x484   : > { %v2247_v51 = vadd.f32 %v7097_v18, %v2158_v15 }
 0x485   : > { %v7129_v56 = vpop.f32.mrf.mxu3 }
 0x486   : > { %v2147_v24 = vpop.f32.mrf.mxu2  ;;  %3518 = vrot.lane.b32.xlu1 %v4110_v48, %s4966_s11  ;;  %3514 = vrot.lane.b32.xlu2 %v4108_v11, %s4966_s11 }
 0x487   : > { %v2161_v33 = vadd.f32 %v2147_v24, %v2047_v22  ;;  %3516 = vrot.lane.b32.xlu0 %v4109_v5, %s4966_s11  ;;  %v2010_v2 = vpop.f32.mrf.mxu0  ;;  %v2426_v29 = vpop.f32.mrf.mxu1 }
 0x488   : > { %v2052_v63 = vadd.f32 %v2051_v0, %v2010_v2  ;;  %v3257_v34 = vpop.permute.xlu1 %3256  ;;  %v3255_v7 = vpop.permute.xlu2 %3254 }
 0x489   : > { %v3249_v17 = vpop.permute.xlu0 %3248 }
 0x48a   : > { %4027 = vmatmul.msk.bf16.gmra.mxu0 %vm326_vm0, %v6649_v52  ;;  %4054 = vmatmul.msk.bf16.gmra.mxu3 %vm326_vm0, %v6990_v57  ;;  %v3270_v27 = vsel %vm326_vm0, %v3249_v17, %v3257_v34 }
 0x48b   : > { %3321 = vmatpush.bf16.msrb.mxu2 %v3270_v27 }
 0x48d   : > { %v2236_v43 = vpop.f32.mrf.mxu3 }
 0x48e   : > { %v7140_v46 = vpop.f32.mrf.mxu2  ;;  %v7142_v23 = vadd.f32 %v2236_v43, %v2161_v33  ;;  %3520 = vrot.lane.b32.xlu2 %v4111_v21, %s4966_s11  ;;  %v2044_v21 = vadd.f32 %v7019_v36, %v7088_v12  ;;  %s3764_s11 = sshll.u32 %s218_s10, 6 }
 0x48f   : > { %v7145_v0 = vpop.f32.mrf.mxu0  ;;  %v2429_v32 = vpop.f32.mrf.mxu1 }
 0x490   : > { %v3366_v9 = vpop.permute.xlu1 %3365  ;;  %v3364_v25 = vpop.permute.xlu2 %3363 }
 0x491   : > { %v3358_v52 = vpop.permute.xlu0 %3357 }
 0x492   : > { %v3379_v22 = vsel %vm326_vm0, %v3358_v52, %v3366_v9 }
 0x493   : > { %4051 = vmatmul.msk.bf16.gmra.mxu2 %vm326_vm0, %v6813_v54  ;;  %3410 = vmatpush.bf16.msrb.mxu3 %v3379_v22 }
 0x495   : > { %v7150_v57 = vpop.f32.mrf.mxu3 }
 0x496   : > { %v2152_v14 = vpop.f32.mrf.mxu2 }
 0x497   : > { %v2163_v53 = vadd.f32 %v2152_v14, %v2052_v63  ;;  %v2335_v38 = vpop.f32.mrf.mxu0  ;;  %v2431_v41 = vpop.f32.mrf.mxu1 }
 0x498   : > { %v2355_v39 = vadd.f32 %v2335_v38, %v7083_v6  ;;  %v3247_v37 = vpop.permute.xlu1 %3246  ;;  %v3245_v61 = vpop.permute.xlu2 %3244 }
 0x499   : > { %v3168_v50 = vpop.permute.xlu0 %3167  ;;  %v3266_v26 = vsel %vm326_vm0, %v3247_v37, %v3255_v7 }
 0x49a   : > { %4055 = vmatmul.msk.bf16.gmra.mxu3 %vm326_vm0, %v7073_v28  ;;  %v3181_v54 = vsel %vm326_vm0, %v3160_v59, %v3168_v50  ;;  %3322 = vmatpush.bf16.msrb.mxu2 %v3266_v26  ;;  %v2444_v49 = vadd.f32 %v2424_v40, %v2355_v39 }
 0x49b   : > { %3212 = vmatpush.bf16.msrb.mxu1 %v3181_v54 }
 0x49d   : > { %v2241_v6 = vpop.f32.mrf.mxu3 }
 0x49e   : > { %v7161_v62 = vpop.f32.mrf.mxu2  ;;  %v7163_v48 = vadd.f32 %v2241_v6, %v2163_v53 }
 0x49f   : > { %v2337_v11 = vpop.f32.mrf.mxu0  ;;  %v2434_v55 = vpop.f32.mrf.mxu1 }
 0x4a0   : > { %v2356_v31 = vadd.f32 %v2337_v11, %v2247_v51  ;;  %v3356_v20 = vpop.permute.xlu1 %3355  ;;  %v3354_v5 = vpop.permute.xlu2 %3353 }
 0x4a1   : > { %v3057_v28 = vpop.permute.xlu0 %3056  ;;  %v3375_v59 = vsel %vm326_vm0, %v3356_v20, %v3364_v25 }
 0x4a2   : > { %v3068_v40 = vsel %vm326_vm0, %v7030_v47, %v3057_v28  ;;  %3411 = vmatpush.bf16.msrb.mxu3 %v3375_v59  ;;  %v2445_v24 = vadd.f32 %v2426_v29, %v2356_v31  ;;  %v2160_v29 = vadd.f32 %v7112_v44, %v2044_v21 }
 0x4a3   : > { %3124 = vmatpush.bf16.msrb.mxu0 %v3068_v40 }
 0x4a4   : > { %v2249_v25 = vadd.f32 %v7129_v56, %v2160_v29 }
 0x4a5   : > { %v7168_v33 = vpop.f32.mrf.mxu3 }
 0x4a6   : > { %v2533_v18 = vpop.f32.mrf.mxu2 }
 0x4a7   : > { %v2553_v2 = vadd.f32 %v2533_v18, %v2444_v49  ;;  %v2340_v63 = vpop.f32.mrf.mxu0  ;;  %v2436_v14 = vpop.f32.mrf.mxu1 }
 0x4a8   : > { %v2357_v34 = vadd.f32 %v2340_v63, %v7114_v30  ;;  %v3166_v7 = vpop.permute.xlu1 %3165  ;;  %v3164_v17 = vpop.permute.xlu2 %3163  ;;  %v4885_v63 = vld [vmem:[%s5083_s9 + $0x40] sm:$0xff] }
 0x4a9   : > { %v3158_v27 = vpop.permute.xlu0 %3157 }
 0x4aa   : > { %v3177_v43 = vsel %vm326_vm0, %v3158_v27, %v3166_v7  ;;  %v2446_v47 = vadd.f32 %v2429_v32, %v2357_v34 }
 0x4ab   : > { %3213 = vmatpush.bf16.msrb.mxu1 %v3177_v43 }
 0x4ad   : > { %v2622_v9 = vpop.f32.mrf.mxu3 }
 0x4ae   : > { %v2535_v52 = vpop.f32.mrf.mxu2  ;;  %v7176_v22 = vadd.f32 %v2622_v9, %v2553_v2 }
 0x4af   : > { %v2554_v30 = vadd.f32 %v2535_v52, %v2445_v24  ;;  %v2342_v53 = vpop.f32.mrf.mxu0 }
 0x4b0   : > { %v2358_v38 = vadd.f32 %v2342_v53, %v2249_v25  ;;  %v3055_v39 = vpop.permute.xlu1 %3054  ;;  %v7178_v37 = vpop.permute.xlu2 %3387 }
 0x4b1   : > { %v3253_v36 = vpop.permute.xlu0 %3252  ;;  %v3064_v12 = vsel %vm326_vm0, %v7071_v8, %v3055_v39 }
 0x4b2   : > { %3125 = vmatpush.bf16.msrb.mxu0 %v3064_v12  ;;  %v3262_v44 = vsel %vm326_vm0, %v3245_v61, %v3253_v36  ;;  %v2447_v32 = vadd.f32 %v2431_v41, %v2358_v38  ;;  %v2439_v61 = vpop.f32.mrf.mxu1 }
 0x4b3   : > { %3323 = vmatpush.bf16.msrb.mxu2 %v3262_v44 }
 0x4b5   : > { %v2624_v56 = vpop.f32.mrf.mxu3  ;;  %4072 = vmatmul.msk.bf16.vlgmr.msrb.gmra.mxu0 %vm326_vm0, %v6968_v45  ;;  %v2049_v45 = vadd.f32 %v7069_v4, %v7120_v60 }
 0x4b6   : > { %v2538_v50 = vpop.f32.mrf.mxu2  ;;  %v7185_v26 = vadd.f32 %v2624_v56, %v2554_v30  ;;  %4096 = vmatmul.msk.bf16.vlgmr.msrb.gmra.mxu2 %vm326_vm0, %v6970_v42 }
 0x4b7   : > { %v2555_v16 = vadd.f32 %v2538_v50, %v2446_v47  ;;  %v2345_v54 = vpop.f32.mrf.mxu0  ;;  %v2162_v42 = vadd.f32 %v7140_v46, %v2049_v45  ;;  %v4886_v47 = vld [vmem:[%s5083_s9 + $0x58] sm:$0xff]  ;;  %v4889_v45 = vld [vmem:[%s5083_s9 + $0xc8] sm:$0xff] }
 0x4b8   : > { %v2359_v49 = vadd.f32 %v2345_v54, %v7142_v23  ;;  %v3156_v8 = vpop.permute.xlu1 %3155  ;;  %v7190_v15 = vpop.permute.xlu2 %3191 }
 0x4b9   : > { %v3362_v41 = vpop.permute.xlu0 %3361  ;;  %v3173_v6 = vsel %vm326_vm0, %v3156_v8, %v3164_v17  ;;  %v2251_v23 = vadd.f32 %v7150_v57, %v2162_v42 }
 0x4ba   : > { %3214 = vmatpush.bf16.msrb.mxu1 %v3173_v6  ;;  %v3371_v51 = vsel %vm326_vm0, %v3354_v5, %v3362_v41  ;;  %v2448_v11 = vadd.f32 %v2434_v55, %v2359_v49  ;;  %v2441_v5 = vpop.f32.mrf.mxu1  ;;  %v4888_v41 = vld [vmem:[%s5083_s9 + $0x50] sm:$0xff] }
 0x4bb   : > { %3412 = vmatpush.bf16.msrb.mxu3 %v3371_v51 }
 0x4bd   : > { %v2627_v31 = vpop.f32.mrf.mxu3 }
 0x4be   : > { %v2540_v20 = vpop.f32.mrf.mxu2  ;;  %v7198_v28 = vadd.f32 %v2627_v31, %v2555_v16 }
 0x4bf   : > { %v2556_v59 = vadd.f32 %v2540_v20, %v2447_v32  ;;  %v2347_v40 = vpop.f32.mrf.mxu0  ;;  %v4887_v32 = vld [vmem:[%s5083_s9 + $0x70] sm:$0xff] }
 0x4c0   : > { %v2360_v24 = vadd.f32 %v2347_v40, %v2251_v23  ;;  %v3188_v18 = vpop.permute.xlu1 %3187  ;;  %v3459_v2 = vpop.permute.xlu2 %3458 }
 0x4c1   : > { %v3482_v4 = vmax.f32 %v4885_v63, %v3459_v2  ;;  %v3386_v60 = vpop.permute.xlu0 %3385  ;;  %4076 = vmatmul.msk.bf16.vlgmr.msrb.gmra.mxu1 %vm326_vm0, %v3188_v18  ;;  %v4891_v63 = vld [vmem:[%s5083_s9 + $0x68] sm:$0xff] }
 0x4c2   : > { %4100 = vmatmul.msk.bf16.vlgmr.msrb.gmra.mxu3 %vm326_vm0, %v3386_v60  ;;  %v2449_v46 = vadd.f32 %v2436_v14, %v2360_v24  ;;  %v4892_v60 = vld [vmem:[%s5083_s9 + $0xe0] sm:$0xff] }
 0x4c3   : > { %3546 = vrot.lane.b32.xlu0 %v3482_v4, %s4970_s15 }
 0x4c5   : > { %v2629_v57 = vpop.f32.mrf.mxu3  ;;  %4073 = vmatmul.msk.bf16.gmra.mxu0 %vm326_vm0, %v7008_v1  ;;  %v2054_v1 = vadd.f32 %v7102_v13, %v7145_v0 }
 0x4c6   : > { %v2543_v55 = vpop.f32.mrf.mxu2  ;;  %v7206_v34 = vadd.f32 %v2629_v57, %v2556_v59  ;;  %4097 = vmatmul.msk.bf16.gmra.mxu2 %vm326_vm0, %v7004_v35  ;;  %v2820_v35 = vpop.f32.mrf.mxu1  ;;  %v4893_v57 = vld [vmem:[%s5083_s9 + $0x60] sm:$0xff] }
 0x4c7   : > { %v2557_v7 = vadd.f32 %v2543_v55, %v2448_v11  ;;  %v2350_v17 = vpop.f32.mrf.mxu0  ;;  %v2164_v52 = vadd.f32 %v7161_v62, %v2054_v1 }
 0x4c8   : > { %v2361_v27 = vadd.f32 %v2350_v17, %v7163_v48  ;;  %v7211_v21 = vpop.permute.xlu1 %3389  ;;  %v3465_v43 = vpop.permute.xlu2 %3464 }
 0x4c9   : > { %v3485_v29 = vmax.f32 %v4886_v47, %v3465_v43  ;;  %v3190_v9 = vpop.permute.xlu0 %3189  ;;  %v2253_v30 = vadd.f32 %v7168_v33, %v2164_v52 }
 0x4ca   : > { %v2450_v25 = vadd.f32 %v2439_v61, %v2361_v27 }
 0x4cb   : > { %3552 = vrot.lane.b32.xlu0 %v3485_v29, %s4970_s15 }
 0x4cd   : > { %v2632_v14 = vpop.f32.mrf.mxu3 }
 0x4ce   : > { %v2545_v48 = vpop.f32.mrf.mxu2  ;;  %v7219_v53 = vadd.f32 %v2632_v14, %v2557_v7  ;;  %v2822_v16 = vpop.f32.mrf.mxu1  ;;  %v4896_v14 = vld [vmem:[%s5083_s9 + $0x78] sm:$0xff] }
 0x4cf   : > { %v2558_v38 = vadd.f32 %v2545_v48, %v2449_v46  ;;  %v2352_v39 = vpop.f32.mrf.mxu0 }
 0x4d0   : > { %v2362_v36 = vadd.f32 %v2352_v39, %v2253_v30  ;;  %v7221_v12 = vpop.permute.xlu1 %3193  ;;  %v3471_v44 = vpop.permute.xlu2 %3470 }
 0x4d1   : > { %v3488_v13 = vmax.f32 %v4887_v32, %v3471_v44  ;;  %v7224_v0 = vpop.permute.xlu0 %3391  ;;  %4077 = vmatmul.msk.bf16.gmra.mxu1 %vm326_vm0, %v3190_v9  ;;  %v4894_v9 = vld [vmem:[%s5083_s9 + $0xc0] sm:$0xff] }
 0x4d2   : > { %4101 = vmatmul.msk.bf16.gmra.mxu3 %vm326_vm0, %v7178_v37  ;;  %v2451_v62 = vadd.f32 %v2441_v5, %v2362_v36 }
 0x4d3   : > { %3558 = vrot.lane.b32.xlu0 %v3488_v13, %s4970_s15  ;;  %v3612_v13 = vld [vmem:[%s7468_s4 + $0x10] sm:$0xff] }
 0x4d5   : > { %v2634_v33 = vpop.f32.mrf.mxu3  ;;  %4074 = vmatmul.msk.bf16.gmra.mxu0 %vm326_vm0, %v7047_v3  ;;  %v4890_v3 = vld [vmem:[%s5083_s9 + $0x48] sm:$0xff] }
 0x4d6   : > { %v2548_v56 = vpop.f32.mrf.mxu2  ;;  %v7232_v50 = vadd.f32 %v2634_v33, %v2558_v38  ;;  %4098 = vmatmul.msk.bf16.gmra.mxu2 %vm326_vm0, %v7002_v10  ;;  %v2825_v2 = vpop.f32.mrf.mxu1 }
 0x4d7   : > { %v2559_v54 = vadd.f32 %v2548_v56, %v2450_v25  ;;  %v2731_v49 = vpop.f32.mrf.mxu0  ;;  %v4895_v25 = vld [vmem:[%s5083_s9 + $0xf8] sm:$0xff] }
 0x4d8   : > { %v2751_v37 = vadd.f32 %v2731_v49, %v7176_v22  ;;  %v3463_v8 = vpop.permute.xlu1 %3462  ;;  %v3509_v61 = vpop.permute.xlu2 %3508 }
 0x4d9   : > { %v3484_v6 = vmax.f32 %v4888_v41, %v3463_v8  ;;  %v3531_v51 = vmax.f32 %v4889_v45, %v3509_v61  ;;  %v3461_v11 = vpop.permute.xlu0 %3460  ;;  %v4899_v45 = vld [vmem:[%s5083_s9 + $0xf0] sm:$0xff] }
 0x4da   : > { %v3483_v42 = vmax.f32 %v4890_v3, %v3461_v11  ;;  %v2840_v31 = vadd.f32 %v2820_v35, %v2751_v37  ;;  %v4900_v3 = vld [vmem:[%s5083_s9 + $0xe8] sm:$0xff] }
 0x4db   : > { %3550 = vrot.lane.b32.xlu2 %v3484_v6, %s4970_s15  ;;  %3580 = vrot.lane.b32.xlu0 %v3531_v51, %s7522_s23 }
 0x4dc   : > { %3548 = vrot.lane.b32.xlu1 %v3483_v42, %s4970_s15 }
 0x4dd   : > { %v2637_v10 = vpop.f32.mrf.mxu3 }
 0x4de   : > { %v2550_v22 = vpop.f32.mrf.mxu2  ;;  %v7243_v23 = vadd.f32 %v2637_v10, %v2559_v54  ;;  %v2827_v48 = vpop.f32.mrf.mxu1 }
 0x4df   : > { %v2560_v20 = vadd.f32 %v2550_v22, %v2451_v62  ;;  %v2733_v59 = vpop.f32.mrf.mxu0  ;;  %v4897_v62 = vld [vmem:[%s5083_s9 + $0xd8] sm:$0xff] }
 0x4e0   : > { %v2752_v40 = vadd.f32 %v2733_v59, %v7185_v26  ;;  %v3469_v24 = vpop.permute.xlu1 %3468  ;;  %v3515_v18 = vpop.permute.xlu2 %3514 }
 0x4e1   : > { %v3487_v4 = vmax.f32 %v4891_v63, %v3469_v24  ;;  %v3534_v46 = vmax.f32 %v4892_v60, %v3515_v18  ;;  %v3467_v5 = vpop.permute.xlu0 %3466  ;;  %4078 = vmatmul.msk.bf16.gmra.mxu1 %vm326_vm0, %v7190_v15  ;;  %v3611_v24 = vld [vmem:[%s7468_s4 + $0x8] sm:$0xff]  ;;  %v3610_v18 = vld [vmem:[%s7468_s4] sm:$0xff] }
 0x4e2   : > { %v3486_v55 = vmax.f32 %v4893_v57, %v3467_v5  ;;  %4102 = vmatmul.msk.bf16.gmra.mxu3 %vm326_vm0, %v7211_v21  ;;  %v2841_v7 = vadd.f32 %v2822_v16, %v2752_v40  ;;  %v4898_v16 = vld [vmem:[%s5083_s9 + $0xd0] sm:$0xff]  ;;  %v3614_v5 = vld [vmem:[%s7468_s4 + $0x20] sm:$0xff]  ;;  %s3694_s9 = scalar_lea.hbm %s7469_s5, %s4182_s12 }
 0x4e3   : > { %3556 = vrot.lane.b32.xlu2 %v3487_v4, %s4970_s15  ;;  %3586 = vrot.lane.b32.xlu0 %v3534_v46, %s7522_s23  ;;  %s3697_s8 = sshll.u32 %s3694_s9, 4  ;;  %s3698_s8 = int_to_ptr.hbm [resolvable:$true] %s3697_s8 }
 0x4e4   : > { %3554 = vrot.lane.b32.xlu1 %v3486_v55, %s4970_s15  ;;  %v3613_v55 = vld [vmem:[%s7468_s4 + $0x18] sm:$0xff]  ;;  %s4915_s13 = sshra.s32 %s3698_s8, 4  ;;  %s4916_s13 = int_to_ptr.hbm [resolvable:$true] %s4915_s13 }
 0x4e5   : > { %v2639_v26 = vpop.f32.mrf.mxu3  ;;  %4075 = vmatmul.msk.bf16.gmra.mxu0 %vm326_vm0, %v7045_v19  ;;  %s4917_s25 = scalar_lea.hbm %s4916_s13, 64  ;;  %p4922_p0 = scmp.lt.s32.totalorder %s4916_s13, %s7469_s5 }
 0x4e6   : > { %v7258_v15 = vadd.f32 %v2639_v26, %v2560_v20  ;;  %v2929_v17 = vpop.f32.mrf.mxu2  ;;  %4099 = vmatmul.msk.bf16.gmra.mxu2 %vm326_vm0, %v7049_v58  ;;  %p4918_p11 = scmp.ne.s32.totalorder %s4916_s13, %s4917_s25  ;;  %p4923_p1 = scmp.lt.s32.totalorder %s4921_s16, %s4917_s25 }
 0x4e7   : > { %v2949_v27 = vadd.f32 %v2929_v17, %v2840_v31  ;;  %v2736_v21 = vpop.f32.mrf.mxu0 }
 0x4e8   : > { %v2753_v43 = vadd.f32 %v2736_v21, %v7198_v28  ;;  %v3507_v47 = vpop.permute.xlu1 %3506  ;;  %v3521_v29 = vpop.permute.xlu2 %3520  ;;  %p4919_p12 = pnand %p4918_p11, %p5069_p5  ;;  %p4924_p2 = por %p4923_p1, %p4922_p0 }
 0x4e9   : > { %v3530_v1 = vmax.f32 %v4894_v9, %v3507_v47  ;;  %v3537_v52 = vmax.f32 %v4895_v25, %v3521_v29  ;;  %v3473_v35 = vpop.permute.xlu0 %3472 }
 0x4ea   : > { %v3489_v19 = vmax.f32 %v4896_v14, %v3473_v35  ;;  %v2842_v30 = vadd.f32 %v2825_v2, %v2753_v43  ;;  %p4920_p13 = pneg %p4919_p12 }
 0x4eb   : > { %3578 = vrot.lane.b32.xlu2 %v3530_v1, %s7522_s23  ;;  %3592 = vrot.lane.b32.xlu0 %v3537_v52, %s7522_s23 }
 0x4ec   : > { %3560 = vrot.lane.b32.xlu1 %v3489_v19, %s4970_s15  ;;  %s7386_s15 = scalar_lea.vmem [#allocation2], %s3764_s11  ;;  %p4925_p3 = pnand %p4924_p2, %p4920_p13 }
 0x4ed   : > { %v3018_v58 = vpop.f32.mrf.mxu3  ;;  %s3695_s22 = sshll.u32 %s7386_s15, 4  ;;  %s3696_s22 = int_to_ptr.vmem [resolvable:$true] %s3695_s22 }
 0x4ee   : > { %v2931_v28 = vpop.f32.mrf.mxu2  ;;  %v7269_v38 = vadd.f32 %v3018_v58, %v2949_v27  ;;  %v3617_v27 = vld [vmem:[%s7468_s4 + $0x38] sm:$0xff] }
 0x4ef   : > { %v2950_v39 = vadd.f32 %v2931_v28, %v2841_v7  ;;  %v2738_v36 = vpop.f32.mrf.mxu0 }
 0x4f0   : > { %v2754_v44 = vadd.f32 %v2738_v36, %v7206_v34  ;;  %v3513_v32 = vpop.permute.xlu1 %3512  ;;  %v7283_v34 = vpop.f32.mrf.mxu1 }
 0x4f1   : > { %v3533_v33 = vmax.f32 %v4897_v62, %v3513_v32  ;;  %v3511_v56 = vpop.permute.xlu0 %3510  ;;  %4079 = vmatmul.msk.bf16.gmra.mxu1 %vm326_vm0, %v7221_v12 }
 0x4f2   : > { %v3532_v54 = vmax.f32 %v4898_v16, %v3511_v56  ;;  %4103 = vmatmul.msk.bf16.gmra.mxu3 %vm326_vm0, %v7224_v0  ;;  %v2843_v49 = vadd.f32 %v2827_v48, %v2754_v44  ;;  %v3615_v0 = vld [vmem:[%s7468_s4 + $0x28] sm:$0xff] }
 0x4f3   : > { %3584 = vrot.lane.b32.xlu2 %v3533_v33, %s7522_s23  ;;  %3630 = vperm.xlu0 %4858, %v3612_v13  }
 0x4f4   : > { %3582 = vrot.lane.b32.xlu1 %v3532_v54, %s7522_s23 }
 0x4f5   : > { %v3020_v37 = vpop.f32.mrf.mxu3 }
 0x4f6   : > { %v2934_v8 = vpop.f32.mrf.mxu2  ;;  %v7285_v61 = vadd.f32 %v3020_v37, %v2950_v39 }
 0x4f7   : > { %v2951_v12 = vadd.f32 %v2934_v8, %v2842_v30  ;;  %v7287_v41 = vpop.f32.mrf.mxu0 }
 0x4f8   : > { %v3519_v6 = vpop.permute.xlu1 %3518  ;;  %v7298_v20 = vpop.f32.mrf.mxu1 }
 0x4f9   : > { %v3536_v51 = vmax.f32 %v4899_v45, %v3519_v6  ;;  %v3517_v11 = vpop.permute.xlu0 %3516  ;;  %v2755_v45 = vadd.f32 %v7287_v41, %v7219_v53 }
 0x4fa   : > { %v3535_v42 = vmax.f32 %v4900_v3, %v3517_v11 }
 0x4fb   : > { %3590 = vrot.lane.b32.xlu2 %v3536_v51, %s7522_s23  ;;  %3645 = vperm.xlu0 %4858, %v3615_v0  }
 0x4fc   : > { %3588 = vrot.lane.b32.xlu1 %v3535_v42, %s7522_s23  ;;  %s3683_s23 = scalar_lea.sflag [#allocation3], %s218_s10 }
 0x4fd   : > { %v3023_v31 = vpop.f32.mrf.mxu3 }
 0x4fe   : > { %v2936_v10 = vpop.f32.mrf.mxu2  ;;  %v7296_v22 = vadd.f32 %v3023_v31, %v2951_v12 }
 0x4ff   : > { %v2952_v59 = vadd.f32 %v2936_v10, %v2843_v49  ;;  %v7300_v40 = vpop.f32.mrf.mxu0 }
 0x500   : > { %v2835_v57 = vpop.f32.mrf.mxu1  ;;  %v2756_v53 = vadd.f32 %v7300_v40, %v7232_v50 }
 0x502   : > { %v2845_v40 = vadd.f32 %v7298_v20, %v2756_v53 }
 0x503   : > { %3625 = vperm.xlu2 %4860, %v3611_v24  }
 0x504   : > { %3620 = vperm.xlu1 %4859, %v3610_v18   ;;  %v2844_v18 = vadd.f32 %v7283_v34, %v2755_v45 }
 0x505   : > { %v3025_v2 = vpop.f32.mrf.mxu3 }
 0x506   : > { %v2939_v63 = vpop.f32.mrf.mxu2  ;;  %v7308_v4 = vadd.f32 %v3025_v2, %v2952_v59 }
 0x507   : > { %v2746_v60 = vpop.f32.mrf.mxu0  ;;  %v2953_v2 = vadd.f32 %v2939_v63, %v2844_v18 }
 0x508   : > { %v2757_v46 = vadd.f32 %v2746_v60, %v7243_v23  ;;  %v3616_v23 = vld [vmem:[%s7468_s4 + $0x30] sm:$0xff]  ;;  %v7339_v19 = vpop.f32.mrf.mxu1 }
 0x50a   : > { %v2846_v7 = vadd.f32 %v2835_v57, %v2757_v46 }
 0x50b   : > { %3640 = vperm.xlu2 %4860, %v3614_v5  }
 0x50c   : > { %3635 = vperm.xlu1 %4859, %v3613_v55  }
 0x50d   : > { %v3028_v26 = vpop.f32.mrf.mxu3 }
 0x50e   : > { %v7317_v17 = vpop.f32.mrf.mxu2 }
 0x50f   : > { %v7329_v1 = vpop.f32.mrf.mxu0 }
 0x513   : > { %3655 = vperm.xlu2 %4860, %v3617_v27  }
 0x514   : > { %3650 = vperm.xlu1 %4859, %v3616_v23  }
 0x515   : > { %v7325_v21 = vpop.f32.mrf.mxu3 }
 0x516   : > { %v2944_v43 = vpop.f32.mrf.mxu2 }
 0x517   : > { %v2955_v47 = vadd.f32 %v2944_v43, %v2846_v7 }
 0x51d   : > { %v3033_v29 = vpop.f32.mrf.mxu3 }
 0x51e   : > { %v7327_v9 = vadd.f32 %v3033_v29, %v2955_v47  ;;  %v7331_v25 = vpop.f32.mrf.mxu2 }
 0x525   : > { %v7343_v58 = vpop.f32.mrf.mxu3 }
 0x532   : > { %v7333_v52 = vpop.f32.mrf.mxu0 }
 0x535   : > { %v7335_v35 = vpop.permute.xlu2 %3550  ;;  %v7337_v14 = vpop.permute.xlu0 %3546 }
 0x539   : > { %v7341_v30 = vpop.f32.mrf.mxu2 }
 0x53a   : > { %v3129_v48 = vpop.f32.mrf.mxu0 }
 0x53b   : > { %v3148_v51 = vadd.f32 %v3129_v48, %v7285_v61  ;;  %v3042_v61 = vadd.f32 %v3028_v26, %v2953_v2 }
 0x53d   : > { %v7345_v28 = vpop.permute.xlu2 %3556  ;;  %v7347_v39 = vpop.permute.xlu0 %3552 }
 0x53e   : > { %v7349_v36 = vpop.f32.mrf.mxu1 }
 0x541   : > { %v3327_v44 = vpop.f32.mrf.mxu2 }
 0x542   : > { %v3132_v32 = vpop.f32.mrf.mxu0 }
 0x543   : > { %v3149_v5 = vadd.f32 %v3132_v32, %v7296_v22  ;;  %v2954_v22 = vadd.f32 %v7317_v17, %v2845_v40 }
 0x545   : > { %v7351_v13 = vpop.f32.mrf.mxu3  ;;  %v7353_v62 = vpop.permute.xlu2 %3578 }
 0x546   : > { %v7355_v33 = vpop.permute.xlu0 %3558  ;;  %v3218_v56 = vpop.f32.mrf.mxu1 }
 0x547   : > { %v3237_v31 = vadd.f32 %v3218_v56, %v3148_v51 }
 0x549   : > { %v3330_v16 = vpop.f32.mrf.mxu2  ;;  %v3346_v60 = vadd.f32 %v3327_v44, %v3237_v31  ;;  %v3043_v44 = vadd.f32 %v7325_v21, %v2954_v22 }
 0x54a   : > { %v7357_v54 = vpop.f32.mrf.mxu0 }
 0x54d   : > { %v3416_v49 = vpop.f32.mrf.mxu3  ;;  %v7359_v37 = vpop.permute.xlu2 %3584 }
 0x54e   : > { %v3549_v8 = vpop.permute.xlu1 %3548  ;;  %v3581_v12 = vpop.permute.xlu0 %3580  ;;  %v3435_v41 = vadd.f32 %v3416_v49, %v3346_v60 }
 0x54f   : > { %v3221_v6 = vpop.f32.mrf.mxu1  ;;  %v3603_v63 = vsel %vm326_vm0, %v3549_v8, %v3581_v12 }
 0x550   : > { %v3238_v43 = vadd.f32 %v3221_v6, %v3149_v5 }
 0x551   : > { %v7361_v0 = vpop.f32.mrf.mxu2 }
 0x552   : > { %v3137_v11 = vpop.f32.mrf.mxu0  ;;  %v3347_v48 = vadd.f32 %v3330_v16, %v3238_v43 }
 0x553   : > { %v3151_v7 = vadd.f32 %v3137_v11, %v3042_v61  ;;  %v3147_v61 = vadd.f32 %v7333_v52, %v7269_v38 }
 0x555   : > { %v3419_v3 = vpop.f32.mrf.mxu3  ;;  %v7366_v42 = vpop.permute.xlu2 %3590 }
 0x556   : > { %v3555_v10 = vpop.permute.xlu1 %3554  ;;  %v3587_v59 = vpop.permute.xlu0 %3586  ;;  %v3436_v49 = vadd.f32 %v3419_v3, %v3347_v48 }
 0x557   : > { %v7368_v24 = vpop.f32.mrf.mxu1  ;;  %v3606_v21 = vsel %vm326_vm0, %v3555_v10, %v3587_v59 }
 0x559   : > { %v3335_v46 = vpop.f32.mrf.mxu2 }
 0x55a   : > { %v3139_v47 = vpop.f32.mrf.mxu0 }
 0x55b   : > { %v3152_v6 = vadd.f32 %v3139_v47, %v3043_v44 }
 0x55d   : > { %v7377_v57 = vpop.f32.mrf.mxu3  ;;  %v3626_v55 = vpop.permute.xlu2 %3625 }
 0x55e   : > { %v3659_v27 = vadd.f32 %v3626_v55, %v3435_v41  ;;  %v7379_v23 = vpop.permute.xlu1 %3560  ;;  %v7381_v34 = vpop.permute.xlu0 %3592 }
 0x55f   : > { %v3226_v50 = vpop.f32.mrf.mxu1 }
 0x560   : > { %v3667_v26 = vadd.f32 %v3659_v27, %v3603_v63  ;;  %v3240_v29 = vadd.f32 %v3226_v50, %v3151_v7  ;;  %v3236_v7 = vadd.f32 %v7349_v36, %v3147_v61  ;;  %v3150_v50 = vadd.f32 %v7357_v54, %v7308_v4 }
 0x561   : > { %v3337_v56 = vpop.f32.mrf.mxu2 }
 0x562   : > { %3675 = vst [vmem:[%s7386_s15 + $0x8] sm:$0xff] %v3667_v26  ;;  %v3349_v32 = vadd.f32 %v3335_v46, %v3240_v29  ;;  %v3142_v2 = vpop.f32.mrf.mxu0  ;;  %v2758_v46 = vadd.f32 %v7329_v1, %v7258_v15  ;;  %v3345_v38 = vadd.f32 %v7341_v30, %v3236_v7  ;;  %v3602_v30 = vsel %vm326_vm0, %v7337_v14, %v7353_v62 }
 0x563   : > { %v3153_v54 = vadd.f32 %v3142_v2, %v7327_v9  ;;  %v3605_v62 = vsel %vm326_vm0, %v7347_v39, %v7359_v37 }
 0x564   : > { %v2847_v27 = vadd.f32 %v7339_v19, %v2758_v46  ;;  %v3434_v36 = vadd.f32 %v7351_v13, %v3345_v38 }
 0x565   : > { %v3424_v8 = vpop.f32.mrf.mxu3  ;;  %v3641_v12 = vpop.permute.xlu2 %3640 }
 0x566   : > { %v3438_v20 = vadd.f32 %v3424_v8, %v3349_v32  ;;  %v3583_v45 = vpop.permute.xlu1 %3582  ;;  %v3631_v51 = vpop.permute.xlu0 %3630  ;;  %v2956_v1 = vadd.f32 %v7331_v25, %v2847_v27 }
 0x567   : > { %v3604_v17 = vsel %vm326_vm0, %v7335_v35, %v3583_v45  ;;  %v3660_v11 = vadd.f32 %v3631_v51, %v3436_v49  ;;  %v3228_v31 = vpop.f32.mrf.mxu1 }
 0x568   : > { %v3662_v18 = vadd.f32 %v3641_v12, %v3438_v20  ;;  %v3241_v16 = vadd.f32 %v3228_v31, %v3152_v6  ;;  %v3045_v47 = vadd.f32 %v7343_v58, %v2956_v1 }
 0x569   : > { %v3668_v60 = vadd.f32 %v3660_v11, %v3604_v17  ;;  %v3340_v59 = vpop.f32.mrf.mxu2 }
 0x56a   : > { %v3670_v3 = vadd.f32 %v3662_v18, %v3606_v21  ;;  %v3350_v53 = vadd.f32 %v3337_v56, %v3241_v16  ;;  %v3144_v52 = vpop.f32.mrf.mxu0 }
 0x56b   : > { %3676 = vst [vmem:[%s7386_s15 + $0x10] sm:$0xff] %v3668_v60  ;;  %v3154_v40 = vadd.f32 %v3144_v52, %v3045_v47 }
 0x56c   : > { %3678 = vst [vmem:[%s7386_s15 + $0x20] sm:$0xff] %v3670_v3 }
 0x56d   : > { %v3426_v35 = vpop.f32.mrf.mxu3  ;;  %v3656_v49 = vpop.permute.xlu2 %3655 }
 0x56e   : > { %v3439_v41 = vadd.f32 %v3426_v35, %v3350_v53  ;;  %v3589_v5 = vpop.permute.xlu1 %3588  ;;  %v3646_v55 = vpop.permute.xlu0 %3645 }
 0x56f   : > { %v3231_v10 = vpop.f32.mrf.mxu1  ;;  %v3607_v15 = vsel %vm326_vm0, %v7345_v28, %v3589_v5  ;;  %v3239_v28 = vadd.f32 %v7368_v24, %v3150_v50 }
 0x570   : > { %v3663_v63 = vadd.f32 %v3646_v55, %v3439_v41  ;;  %v3242_v8 = vadd.f32 %v3231_v10, %v3153_v54 }
 0x571   : > { %v3342_v48 = vpop.f32.mrf.mxu2  ;;  %v3348_v13 = vadd.f32 %v7361_v0, %v3239_v28 }
 0x572   : > { %v3671_v43 = vadd.f32 %v3663_v63, %v3607_v15  ;;  %v3351_v6 = vadd.f32 %v3340_v59, %v3242_v8 }
 0x573   : > { %v3437_v4 = vadd.f32 %v7377_v57, %v3348_v13  ;;  %v3609_v57 = vsel %vm326_vm0, %v7379_v23, %v7381_v34  ;;  %v3608_v23 = vsel %vm326_vm0, %v7355_v33, %v7366_v42 }
 0x574   : > { %3679 = vst [vmem:[%s7386_s15 + $0x28] sm:$0xff] %v3671_v43 }
 0x575   : > { %v3429_v19 = vpop.f32.mrf.mxu3 }
 0x576   : > { %v3621_v26 = vpop.permute.xlu1 %3620  ;;  %v3440_v20 = vadd.f32 %v3429_v19, %v3351_v6 }
 0x577   : > { %v3658_v29 = vadd.f32 %v3621_v26, %v3434_v36  ;;  %v3233_v25 = vpop.f32.mrf.mxu1 }
 0x578   : > { %v3243_v22 = vadd.f32 %v3233_v25, %v3154_v40 }
 0x579   : > { %v3666_v58 = vadd.f32 %v3658_v29, %v3602_v30 }
 0x57a   : > { %v3352_v44 = vadd.f32 %v3342_v48, %v3243_v22 }
 0x57b   : > { %3674 = vst [vmem:[%s7386_s15] sm:$0xff] %v3666_v58 }
 0x57d   : > { %v3431_v24 = vpop.f32.mrf.mxu3 }
 0x57e   : > { %v3441_v32 = vadd.f32 %v3431_v24, %v3352_v44  ;;  %v3636_v56 = vpop.permute.xlu1 %3635 }
 0x57f   : > { %v3661_v14 = vadd.f32 %v3636_v56, %v3437_v4 }
 0x580   : > { %v3665_v0 = vadd.f32 %v3656_v49, %v3441_v32 }
 0x581   : > { %v3669_v9 = vadd.f32 %v3661_v14, %v3605_v62 }
 0x582   : > { %v3673_v12 = vadd.f32 %v3665_v0, %v3609_v57 }
 0x583   : > { %3677 = vst [vmem:[%s7386_s15 + $0x18] sm:$0xff] %v3669_v9 }
 0x584   : > { %3681 = vst [vmem:[%s7386_s15 + $0x38] sm:$0xff] %v3673_v12 }
 0x586   : > { %v3651_v39 = vpop.permute.xlu1 %3650 }
 0x587   : > { %v3664_v37 = vadd.f32 %v3651_v39, %v3440_v20 }
 0x589   : > { %v3672_v34 = vadd.f32 %v3664_v37, %v3608_v23 }
 0x58b   : > { %3680 = vst [vmem:[%s7386_s15 + $0x30] sm:$0xff] %v3672_v34 }
 0x58c   : > { %4928 = shalt.err (!%p4925_p3)
}
 0x58d   : > { %s4999_s10 = smov 128   ;;  %s5000_s11 = smov 8  }
 0x58e   : > { %4183 = dma.vmem_to_hbm [thread:$0]  (%p5069_p5), %s3696_s22, 1024, %s3698_s8, %s3683_s23, %s4999_s10, %s4999_s10, %s5000_s11  }
 0x58f PF: > { %p4189_p4 = scmp.ge.s32.totalorder %s4963_s21, 2  ;;  %s3712_s15 = sand.u32 1, %s4951_s18  }
 0x590   : > { %s3713_s12 = scalar_lea.sflag [#allocation3], %s3712_s15 }
 0x591   : > { %p4186_p7 = pnand %p4189_p4, %p5073_p6 }
 0x593   : > { %p4187_p8 = pneg %p4186_p7 }
 0x595   : > { %4946 = dma.done.wait (%p4187_p8), %s3713_s12, 1024  }
 0x596   : > { %4948 = vsyncadd (%p4187_p8), %s3713_s12, 4294966272  ;;  %p15_p9 = scmp.ge.s32.totalorder %s5056_s24, 4   ;;  %s7562_s18 = smov %s4955_s19 }
 0x597   : > { %s7563_s19 = smov %s4959_s20  ;;  %s7564_s20 = smov %s5067_s27 }
 0x598   : > { %s7565_s21 = smov %s5056_s24  ;;  %17 = sbr.rel (!%p15_p9) target bundleno = 3 (0x3), region = 76 }
 0x59d   :  { %3719 = vsyncpa [#allocation3], 1 }
 0x59e   :  { %3721 = vsyncpa [#allocation3 + $0x1], 1 }

</bundles_post_ra>
